<compile_context>
chip_gen: v5e
topology: v5e:2x2
jax: 0.10.0
libtpu: 0.0.40
codegen_flags: <defaults>
</compile_context>

<pallas_src>
from collections import namedtuple

import jax
import jax.numpy as jnp
from jax.experimental import pallas as pl
from jax.experimental.pallas import tpu as pltpu

Outputs = namedtuple("Outputs", ["loss", "inputs_embeds", "logits"])


def _round_up(x, m):
    return ((x + m - 1) // m) * m


# ----------------------------------------------------------------------------
# Fused kernel: latent injection + LM head (tiled over V) + online CE loss
# ----------------------------------------------------------------------------
def _make_coconut_kernel(vocab_size, tv, emit_logits):
    neg_inf = float("-inf")

    def kernel(gath_ref, injidx_ref, lbl_ref, lat_ref, et_ref, *rest):
        # gath_ref  : (1, tq, H) f32   gathered embedding rows E[ids]
        # injidx_ref: (1, tq, 1) int32 latent slot index per position (-1 = keep)
        # lbl_ref   : (1, tq, 1) int32 shifted labels (-100 = ignore)
        # lat_ref   : (1, n_lat, H) f32 per-sample latents
        # et_ref    : (H, tv) bf16     vocab tile of E^T (canonical K,N for MXU)
        if emit_logits:
            (logits_ref, emb_ref, nll_ref, valid_ref,
             emb_scr, m_scr, l_scr, lblo_scr) = rest
        else:
            logits_ref = None
            (emb_ref, nll_ref, valid_ref,
             emb_scr, m_scr, l_scr, lblo_scr) = rest

        v = pl.program_id(2)
        nv = pl.num_programs(2)
        n_lat = lat_ref.shape[1]

        @pl.when(v == 0)
        def _init():
            emb = gath_ref[0]                          # (tq, H) f32
            idx = injidx_ref[0]                        # (tq, 1) int32
            lats = lat_ref[0]                          # (n_lat, H) f32
            for j in range(n_lat):                     # n_lat tiny; static unroll
                emb = jnp.where(idx == j, lats[j:j + 1, :], emb)
            emb_ref[0] = emb                           # injected embeddings (f32)
            emb_scr[...] = emb.astype(jnp.bfloat16)    # resident bf16 copy for MXU
            m_scr[...] = jnp.full_like(m_scr, neg_inf)
            l_scr[...] = jnp.zeros_like(l_scr)
            lblo_scr[...] = jnp.zeros_like(lblo_scr)

        # LM-head tile: (tq, H) bf16 x (H, tv) bf16 -> (tq, tv) f32 on the MXU.
        logits = jnp.dot(emb_scr[...], et_ref[...],
                         preferred_element_type=jnp.float32)
        if emit_logits:
            logits_ref[0] = logits

        # v-independent iota + relative label (saves a full-tile add per step)
        col = jax.lax.broadcasted_iota(jnp.int32, logits.shape, 1)
        lbl_rel = lbl_ref[0] - v * tv                  # (tq, 1); -100 never matches
        lblo_scr[...] += jnp.sum(jnp.where(col == lbl_rel, logits, 0.0),
                                 axis=-1, keepdims=True)

        if vocab_size % tv != 0:
            # last vocab tile contains padded columns -> exclude from the LSE
            logits = jnp.where(col < (vocab_size - v * tv), logits, neg_inf)

        # online logsumexp over vocab tiles
        m_prev = m_scr[...]
        m_new = jnp.maximum(m_prev, jnp.max(logits, axis=-1, keepdims=True))
        l_scr[...] = (l_scr[...] * jnp.exp(m_prev - m_new)
                      + jnp.sum(jnp.exp(logits - m_new), axis=-1, keepdims=True))
        m_scr[...] = m_new

        @pl.when(v == nv - 1)
        def _finalize():
            valid = (lbl_ref[0] >= 0).astype(jnp.float32)      # (tq, 1)
            lse = m_scr[...] + jnp.log(l_scr[...])
            nll = valid * (lse - lblo_scr[...])
            nll_ref[0, 0] = jnp.sum(nll, axis=0, keepdims=True)      # (1, 1)
            valid_ref[0, 0] = jnp.sum(valid, axis=0, keepdims=True)  # (1, 1)

    return kernel


def fused_inject_lm_head_loss(E_t_bf16, gathered, inj_idx, shifted_labels,
                              latents, *, tq=512, tv=1024, return_logits=True):
    """E_t_bf16: (H, V) transposed tied embedding table (bf16)."""
    B, S, H = gathered.shape
    V = E_t_bf16.shape[1]
    n_lat = latents.shape[1]

    # tile selection (sublane/lane aligned), with padding instead of asserts
    tq = min(tq, _round_up(S, 8))
    S_pad = _round_up(S, tq)
    tv = min(tv, _round_up(V, 128))
    V_pad = _round_up(V, tv)

    if S_pad != S:
        p = S_pad - S
        gathered = jnp.pad(gathered, ((0, 0), (0, p), (0, 0)))
        inj_idx = jnp.pad(inj_idx, ((0, 0), (0, p), (0, 0)), constant_values=-1)
        shifted_labels = jnp.pad(shifted_labels, ((0, 0), (0, p), (0, 0)),
                                 constant_values=-100)
    if V_pad != V:
        E_t_bf16 = jnp.pad(E_t_bf16, ((0, 0), (0, V_pad - V)))

    nS, nV = S_pad // tq, V_pad // tv

    out_shape = []
    out_specs = []
    if return_logits:
        out_shape.append(jax.ShapeDtypeStruct((B, S_pad, V_pad), jnp.float32))
        out_specs.append(pl.BlockSpec((1, tq, tv), lambda b, s, v: (b, s, v)))
    out_shape += [
        jax.ShapeDtypeStruct((B, S_pad, H), jnp.float32),      # injected embeds
        jax.ShapeDtypeStruct((B, nS, 1, 1), jnp.float32),      # nll partial sums
        jax.ShapeDtypeStruct((B, nS, 1, 1), jnp.float32),      # valid counts
    ]
    out_specs += [
        pl.BlockSpec((1, tq, H), lambda b, s, v: (b, s, 0)),
        pl.BlockSpec((1, 1, 1, 1), lambda b, s, v: (b, s, 0, 0)),
        pl.BlockSpec((1, 1, 1, 1), lambda b, s, v: (b, s, 0, 0)),
    ]

    kernel = _make_coconut_kernel(V, tv, return_logits)

    outs = pl.pallas_call(
        kernel,
        out_shape=tuple(out_shape),
        grid_spec=pltpu.PrefetchScalarGridSpec(
            num_scalar_prefetch=0,
            grid=(B, nS, nV),
            in_specs=[
                pl.BlockSpec((1, tq, H), lambda b, s, v: (b, s, 0)),      # gathered
                pl.BlockSpec((1, tq, 1), lambda b, s, v: (b, s, 0)),      # inj idx
                pl.BlockSpec((1, tq, 1), lambda b, s, v: (b, s, 0)),      # labels
                pl.BlockSpec((1, n_lat, H), lambda b, s, v: (b, 0, 0)),   # latents
                pl.BlockSpec((H, tv), lambda b, s, v: (0, v)),            # E^T tile
            ],
            out_specs=tuple(out_specs),
            scratch_shapes=[
                pltpu.VMEM((tq, H), jnp.bfloat16),   # injected embeds (bf16)
                pltpu.VMEM((tq, 1), jnp.float32),    # running max
                pltpu.VMEM((tq, 1), jnp.float32),    # running sum-exp
                pltpu.VMEM((tq, 1), jnp.float32),    # label logit
            ],
        ),
        compiler_params=pltpu.CompilerParams(
            dimension_semantics=("parallel", "parallel", "arbitrary"),
            vmem_limit_bytes=40 * 1024 * 1024,   # fits v7x (64 MiB) and v5e/v6e
        ),
        cost_estimate=pl.CostEstimate(
            flops=2 * B * S_pad * H * V_pad,
            transcendentals=B * S_pad * V_pad,
            bytes_accessed=(2 * 4 * B * S_pad * H + 2 * V_pad * H * B * nS
                            + (4 * B * S_pad * V_pad if return_logits else 0)
                            + 8 * B * nS),
        ),
    )(gathered, inj_idx, shifted_labels, latents, E_t_bf16)

    if return_logits:
        logits, embeds, nll, valid = outs
        if S_pad != S or V_pad != V:
            logits = logits[:, :S, :V]
    else:
        embeds, nll, valid = outs
        logits = None
    if S_pad != S:
        embeds = embeds[:, :S]
    return logits, embeds, nll, valid


# ----------------------------------------------------------------------------
# Coconut module (JAX/Pallas)
# ----------------------------------------------------------------------------
class CoconutPallas:
    def __init__(self, vocab_size, hidden_size, latent_token_id,
                 start_latent_id=None, end_latent_id=None, eos_token_id=None,
                 key=None):
        self.latent_token_id = latent_token_id
        self.start_latent_id = start_latent_id
        self.end_latent_id = end_latent_id
        self.eos_token_id = eos_token_id
        key = key if key is not None else jax.random.PRNGKey(0)
        # deterministic synthetic embedding table (V, H); LM head is tied
        self.embedding = 0.02 * jax.random.normal(
            key, (vocab_size, hidden_size), dtype=jnp.float32)
        # one-time bf16 transposed copy (H, V) for the MXU LM head (K, N layout)
        self.embedding_t_bf16 = self.embedding.astype(jnp.bfloat16).T

    def forward(self, input_ids, attention_mask, labels,
                pixel_values=None, position_ids=None, latents=None, **kwargs):
        # TODO(synk): attention_mask / position_ids / pixel_values are accepted
        # but unused -- the synthetic tied-embedding base LM has no transformer.
        B, S = input_ids.shape
        V, H = self.embedding.shape

        ids = jnp.clip(input_ids.astype(jnp.int32), 0, V - 1)
        gathered = jnp.take(self.embedding, ids, axis=0)       # XLA gather (DMA)

        if latents is not None:
            n_lat = latents.shape[1]
            is_lat = input_ids == self.latent_token_id
            rank = jnp.cumsum(is_lat.astype(jnp.int32), axis=1) - 1
            inj_idx = jnp.where(is_lat & (rank < n_lat), rank,
                                -1).astype(jnp.int32)[..., None]
            lat = latents.astype(jnp.float32)
        else:
            inj_idx = jnp.full((B, S, 1), -1, jnp.int32)
            lat = jnp.zeros((B, 1, H), jnp.float32)

        # HF causal-LM shifted labels: predict labels[:, 1:] from logits[:, :-1]
        shifted = jnp.concatenate(
            [labels[:, 1:], jnp.full((B, 1), -100, labels.dtype)], axis=1)
        shifted = shifted.astype(jnp.int32)
        shifted = jnp.where(shifted >= V, V - 1, shifted)[..., None]  # clip like ref

        logits, embeds, nll_sum, valid_sum = fused_inject_lm_head_loss(
            self.embedding_t_bf16, gathered, inj_idx, shifted, lat,
            tq=kwargs.get("tq", 512), tv=kwargs.get("tv", 1024),
            return_logits=kwargs.get("return_logits", True))
        loss = jnp.sum(nll_sum) / jnp.maximum(jnp.sum(valid_sum), 1.0)
        return Outputs(loss=loss,
                       inputs_embeds=embeds if latents is not None else None,
                       logits=logits)


# ----------------------------------------------------------------------------
# Pure-JAX reference (same bf16 MXU path for the LM head)
# ----------------------------------------------------------------------------
def ref_forward(E, ids, labels, latents, latent_token_id):
    emb = E[ids]                                               # (B, S, H)
    if latents is not None:
        is_lat = ids == latent_token_id
        rank = jnp.cumsum(is_lat.astype(jnp.int32), axis=1) - 1
        use = is_lat & (rank < latents.shape[1])
        gathered = jnp.take_along_axis(
            latents, jnp.clip(rank, 0, latents.shape[1] - 1)[..., None], axis=1)
        emb = jnp.where(use[..., None], gathered, emb)
    B, S, H = emb.shape
    V = E.shape[0]
    logits = jnp.dot(emb.astype(jnp.bfloat16).reshape(B * S, H),
                     E.astype(jnp.bfloat16).T,
                     preferred_element_type=jnp.float32).reshape(B, S, V)
    sl = logits[:, :-1]
    lb = labels[:, 1:]
    valid = lb >= 0
    lse = jax.nn.logsumexp(sl, axis=-1)
    lbl_logit = jnp.take_along_axis(sl, jnp.clip(lb, 0)[..., None], axis=-1)[..., 0]
    nll = jnp.where(valid, lse - lbl_logit, 0.0)
    loss = nll.sum() / valid.sum()
    return loss, emb, logits


if __name__ == "__main__":
    # deliberately non-tile-aligned shapes to exercise padding + last-tile masking
    B, S, H, V = 2, 200, 128, 500
    N_LAT = 4
    LATENT_ID = 5

    key = jax.random.PRNGKey(0)
    k_emb, k_ids, k_lbl, k_lat = jax.random.split(key, 4)

    model = CoconutPallas(vocab_size=V, hidden_size=H,
                          latent_token_id=LATENT_ID, eos_token_id=2, key=k_emb)

    input_ids = jax.random.randint(k_ids, (B, S), 0, V, dtype=jnp.int32)
    # drop some latent tokens into each sequence
    input_ids = input_ids.at[0, 3].set(LATENT_ID).at[0, 4].set(LATENT_ID)
    input_ids = input_ids.at[1, 6].set(LATENT_ID).at[1, 7].set(LATENT_ID)
    input_ids = input_ids.at[1, 8].set(LATENT_ID)
    attention_mask = jnp.ones((B, S), jnp.int32)
    labels = jax.random.randint(k_lbl, (B, S), 0, V, dtype=jnp.int32)
    labels = labels.at[:, :4].set(-100)                        # ignore prefix
    latents = jax.random.normal(k_lat, (B, N_LAT, H), jnp.float32)

    ref_loss, ref_emb, ref_logits = ref_forward(
        model.embedding, input_ids, labels, latents, LATENT_ID)

    # 1) default (large) tiles
    out = model.forward(input_ids, attention_mask, labels, latents=latents)
    jax.block_until_ready(out.loss)
    jax.block_until_ready(out.logits)
    assert jnp.allclose(out.inputs_embeds, ref_emb, atol=1e-5, rtol=1e-5)
    assert jnp.allclose(out.logits, ref_logits, atol=2e-3, rtol=2e-3)
    assert jnp.allclose(out.loss, ref_loss, atol=1e-3, rtol=1e-3)

    # 2) small tiles: multi-tile online LSE + seq/vocab padding paths
    out_t = model.forward(input_ids, attention_mask, labels, latents=latents,
                          tq=128, tv=256)
    jax.block_until_ready(out_t.loss)
    assert jnp.allclose(out_t.logits, ref_logits, atol=2e-3, rtol=2e-3)
    assert jnp.allclose(out_t.loss, ref_loss, atol=1e-3, rtol=1e-3)

    # 3) loss-only mode (skips the (B,S,V) logits HBM write)
    out_lo = model.forward(input_ids, attention_mask, labels, latents=latents,
                           return_logits=False)
    jax.block_until_ready(out_lo.loss)
    assert out_lo.logits is None
    assert jnp.allclose(out_lo.loss, ref_loss, atol=1e-3, rtol=1e-3)

    # 4) no-latents branch
    out2 = model.forward(input_ids, attention_mask, labels, latents=None)
    jax.block_until_ready(out2.loss)
    assert out2.inputs_embeds is None
    ref_loss2, _, ref_logits2 = ref_forward(
        model.embedding, input_ids, labels, None, LATENT_ID)
    assert jnp.allclose(out2.logits, ref_logits2, atol=2e-3, rtol=2e-3)
    assert jnp.allclose(out2.loss, ref_loss2, atol=1e-3, rtol=1e-3)

    print("KERNEL_OK")
</pallas_src>

<mosaic_0001>
module attributes {stable_mosaic.version = 11 : i64} {
  func.func @kernel(%arg0: i32, %arg1: i32, %arg2: i32, %arg3: memref<1x200x128xf32, #tpu.memory_space<vmem>>, %arg4: memref<1x200x1xi32, #tpu.memory_space<vmem>>, %arg5: memref<1x200x1xi32, #tpu.memory_space<vmem>>, %arg6: memref<1x4x128xf32, #tpu.memory_space<vmem>>, %arg7: memref<128x512xbf16, #tpu.memory_space<vmem>>, %arg8: memref<1x200x512xf32, #tpu.memory_space<vmem>>, %arg9: memref<1x200x128xf32, #tpu.memory_space<vmem>>, %arg10: memref<1x1x1x1xf32, #tpu.memory_space<vmem>>, %arg11: memref<1x1x1x1xf32, #tpu.memory_space<vmem>>, %arg12: memref<200x128xbf16, #tpu.memory_space<vmem>>, %arg13: memref<200x1xf32, #tpu.memory_space<vmem>>, %arg14: memref<200x1xf32, #tpu.memory_space<vmem>>, %arg15: memref<200x1xf32, #tpu.memory_space<vmem>>) attributes {dimension_semantics = [#tpu.dimension_semantics<parallel>, #tpu.dimension_semantics<parallel>, #tpu.dimension_semantics<arbitrary>], iteration_bounds = array<i64: 2, 1, 1>, scalar_prefetch = 0 : i64, scratch_operands = 4 : i64, tpu.core_type = #tpu.core_type<tc>, window_params = [{transform_indices = @transform_0, window_bounds = array<i64: 1, 200, 128>}, {transform_indices = @transform_1, window_bounds = array<i64: 1, 200, 1>}, {transform_indices = @transform_2, window_bounds = array<i64: 1, 200, 1>}, {transform_indices = @transform_3, window_bounds = array<i64: 1, 4, 128>}, {transform_indices = @transform_4, window_bounds = array<i64: 128, 512>}, {transform_indices = @transform_5, window_bounds = array<i64: 1, 200, 512>}, {transform_indices = @transform_6, window_bounds = array<i64: 1, 200, 128>}, {transform_indices = @transform_7, window_bounds = array<i64: 1, 1, 1, 1>}, {transform_indices = @transform_8, window_bounds = array<i64: 1, 1, 1, 1>}]} {
    %c0_i32 = arith.constant 0 : i32
    %0 = arith.cmpi eq, %arg2, %c0_i32 : i32
    %1 = arith.extui %0 : i1 to i32
    %c0_i32_0 = arith.constant 0 : i32
    %2 = arith.cmpi ne, %1, %c0_i32_0 : i32
    scf.if %2 {
      %c0_30 = arith.constant 0 : index
      %c0_31 = arith.constant 0 : index
      %c0_32 = arith.constant 0 : index
      %49 = vector.load %arg3[%c0_30, %c0_31, %c0_32] : memref<1x200x128xf32, #tpu.memory_space<vmem>>, vector<1x200x128xf32>
      %50 = vector.shape_cast %49 : vector<1x200x128xf32> to vector<200x128xf32>
      %c0_33 = arith.constant 0 : index
      %c0_34 = arith.constant 0 : index
      %c0_35 = arith.constant 0 : index
      %51 = vector.load %arg4[%c0_33, %c0_34, %c0_35] : memref<1x200x1xi32, #tpu.memory_space<vmem>>, vector<1x200x1xi32>
      %52 = vector.shape_cast %51 : vector<1x200x1xi32> to vector<200x1xi32>
      %c0_36 = arith.constant 0 : index
      %c0_37 = arith.constant 0 : index
      %c0_38 = arith.constant 0 : index
      %53 = vector.load %arg6[%c0_36, %c0_37, %c0_38] : memref<1x4x128xf32, #tpu.memory_space<vmem>>, vector<1x4x128xf32>
      %54 = vector.shape_cast %53 : vector<1x4x128xf32> to vector<4x128xf32>
      %c0_i32_39 = arith.constant 0 : i32
      %55 = vector.broadcast %c0_i32_39 : i32 to vector<200x1xi32>
      %56 = arith.cmpi eq, %52, %55 : vector<200x1xi32>
      %57 = vector.extract_strided_slice %54 {offsets = [0, 0], sizes = [1, 128], strides = [1, 1]} : vector<4x128xf32> to vector<1x128xf32>
      %58 = vector.shape_cast %56 : vector<200x1xi1> to vector<200x1xi1>
      %59 = vector.broadcast %58 : vector<200x1xi1> to vector<200x128xi1>
      %60 = vector.shape_cast %57 : vector<1x128xf32> to vector<1x128xf32>
      %61 = vector.broadcast %60 : vector<1x128xf32> to vector<200x128xf32>
      %62 = arith.select %59, %61, %50 : vector<200x128xi1>, vector<200x128xf32>
      %c1_i32 = arith.constant 1 : i32
      %63 = vector.broadcast %c1_i32 : i32 to vector<200x1xi32>
      %64 = arith.cmpi eq, %52, %63 : vector<200x1xi32>
      %65 = vector.extract_strided_slice %54 {offsets = [1, 0], sizes = [1, 128], strides = [1, 1]} : vector<4x128xf32> to vector<1x128xf32>
      %66 = vector.shape_cast %64 : vector<200x1xi1> to vector<200x1xi1>
      %67 = vector.broadcast %66 : vector<200x1xi1> to vector<200x128xi1>
      %68 = vector.shape_cast %65 : vector<1x128xf32> to vector<1x128xf32>
      %69 = vector.broadcast %68 : vector<1x128xf32> to vector<200x128xf32>
      %70 = arith.select %67, %69, %62 : vector<200x128xi1>, vector<200x128xf32>
      %c2_i32 = arith.constant 2 : i32
      %71 = vector.broadcast %c2_i32 : i32 to vector<200x1xi32>
      %72 = arith.cmpi eq, %52, %71 : vector<200x1xi32>
      %73 = vector.extract_strided_slice %54 {offsets = [2, 0], sizes = [1, 128], strides = [1, 1]} : vector<4x128xf32> to vector<1x128xf32>
      %74 = vector.shape_cast %72 : vector<200x1xi1> to vector<200x1xi1>
      %75 = vector.broadcast %74 : vector<200x1xi1> to vector<200x128xi1>
      %76 = vector.shape_cast %73 : vector<1x128xf32> to vector<1x128xf32>
      %77 = vector.broadcast %76 : vector<1x128xf32> to vector<200x128xf32>
      %78 = arith.select %75, %77, %70 : vector<200x128xi1>, vector<200x128xf32>
      %c3_i32 = arith.constant 3 : i32
      %79 = vector.broadcast %c3_i32 : i32 to vector<200x1xi32>
      %80 = arith.cmpi eq, %52, %79 : vector<200x1xi32>
      %81 = vector.extract_strided_slice %54 {offsets = [3, 0], sizes = [1, 128], strides = [1, 1]} : vector<4x128xf32> to vector<1x128xf32>
      %82 = vector.shape_cast %80 : vector<200x1xi1> to vector<200x1xi1>
      %83 = vector.broadcast %82 : vector<200x1xi1> to vector<200x128xi1>
      %84 = vector.shape_cast %81 : vector<1x128xf32> to vector<1x128xf32>
      %85 = vector.broadcast %84 : vector<1x128xf32> to vector<200x128xf32>
      %86 = arith.select %83, %85, %78 : vector<200x128xi1>, vector<200x128xf32>
      %c0_40 = arith.constant 0 : index
      %c0_41 = arith.constant 0 : index
      %c0_42 = arith.constant 0 : index
      %87 = vector.load %arg9[%c0_40, %c0_41, %c0_42] : memref<1x200x128xf32, #tpu.memory_space<vmem>>, vector<1x200x128xf32>
      %88 = vector.shape_cast %87 : vector<1x200x128xf32> to vector<200x128xf32>
      %89 = vector.shape_cast %86 : vector<200x128xf32> to vector<1x200x128xf32>
      tpu.vector_store %arg9[%c0_40, %c0_41, %c0_42], %89 {strides = array<i32>} : memref<1x200x128xf32, #tpu.memory_space<vmem>>, vector<1x200x128xf32>,
      %90 = arith.truncf %86 : vector<200x128xf32> to vector<200x128xbf16>
      %c0_43 = arith.constant 0 : index
      %c0_44 = arith.constant 0 : index
      %91 = vector.load %arg12[%c0_43, %c0_44] : memref<200x128xbf16, #tpu.memory_space<vmem>>, vector<200x128xbf16>
      tpu.vector_store %arg12[%c0_43, %c0_44], %90 {strides = array<i32>} : memref<200x128xbf16, #tpu.memory_space<vmem>>, vector<200x128xbf16>,
      %cst_45 = arith.constant 0xFF800000 : f32
      %92 = vector.broadcast %cst_45 : f32 to vector<200x1xf32>
      %c0_46 = arith.constant 0 : index
      %c0_47 = arith.constant 0 : index
      %93 = vector.load %arg13[%c0_46, %c0_47] : memref<200x1xf32, #tpu.memory_space<vmem>>, vector<200x1xf32>
      tpu.vector_store %arg13[%c0_46, %c0_47], %92 {strides = array<i32>} : memref<200x1xf32, #tpu.memory_space<vmem>>, vector<200x1xf32>,
      %cst_48 = arith.constant 0.000000e+00 : f32
      %94 = vector.broadcast %cst_48 : f32 to vector<200x1xf32>
      %c0_49 = arith.constant 0 : index
      %c0_50 = arith.constant 0 : index
      %95 = vector.load %arg14[%c0_49, %c0_50] : memref<200x1xf32, #tpu.memory_space<vmem>>, vector<200x1xf32>
      tpu.vector_store %arg14[%c0_49, %c0_50], %94 {strides = array<i32>} : memref<200x1xf32, #tpu.memory_space<vmem>>, vector<200x1xf32>,
      %cst_51 = arith.constant 0.000000e+00 : f32
      %96 = vector.broadcast %cst_51 : f32 to vector<200x1xf32>
      %c0_52 = arith.constant 0 : index
      %c0_53 = arith.constant 0 : index
      %97 = vector.load %arg15[%c0_52, %c0_53] : memref<200x1xf32, #tpu.memory_space<vmem>>, vector<200x1xf32>
      tpu.vector_store %arg15[%c0_52, %c0_53], %96 {strides = array<i32>} : memref<200x1xf32, #tpu.memory_space<vmem>>, vector<200x1xf32>,
    } else {
    }
    %c0 = arith.constant 0 : index
    %c0_1 = arith.constant 0 : index
    %3 = vector.load %arg12[%c0, %c0_1] : memref<200x128xbf16, #tpu.memory_space<vmem>>, vector<200x128xbf16>
    %c0_2 = arith.constant 0 : index
    %c0_3 = arith.constant 0 : index
    %4 = vector.load %arg7[%c0_2, %c0_3] : memref<128x512xbf16, #tpu.memory_space<vmem>>, vector<128x512xbf16>
    %cst = arith.constant dense<0.000000e+00> : vector<200x512xf32>
    %5 = tpu.matmul %3, %4, %cst {dimension_numbers = #tpu.dot_dimension_numbers<[1], [0], [0], [1], [0, 0, 1, 1], [], []>} : vector<200x128xbf16>, vector<128x512xbf16>, vector<200x512xf32> -> vector<200x512xf32>
    %c0_4 = arith.constant 0 : index
    %c0_5 = arith.constant 0 : index
    %c0_6 = arith.constant 0 : index
    %6 = vector.load %arg8[%c0_4, %c0_5, %c0_6] : memref<1x200x512xf32, #tpu.memory_space<vmem>>, vector<1x200x512xf32>
    %7 = vector.shape_cast %6 : vector<1x200x512xf32> to vector<200x512xf32>
    %8 = vector.shape_cast %5 : vector<200x512xf32> to vector<1x200x512xf32>
    tpu.vector_store %arg8[%c0_4, %c0_5, %c0_6], %8 {strides = array<i32>} : memref<1x200x512xf32, #tpu.memory_space<vmem>>, vector<1x200x512xf32>,
    %9 = tpu.iota {dimensions = array<i32: 1>} : vector<200x512xi32>
    %c0_7 = arith.constant 0 : index
    %c0_8 = arith.constant 0 : index
    %c0_9 = arith.constant 0 : index
    %10 = vector.load %arg5[%c0_7, %c0_8, %c0_9] : memref<1x200x1xi32, #tpu.memory_space<vmem>>, vector<1x200x1xi32>
    %11 = vector.shape_cast %10 : vector<1x200x1xi32> to vector<200x1xi32>
    %c512_i32 = arith.constant 512 : i32
    %12 = arith.muli %arg2, %c512_i32 : i32
    %13 = vector.broadcast %12 : i32 to vector<200x1xi32>
    %14 = arith.subi %11, %13 : vector<200x1xi32>
    %c0_10 = arith.constant 0 : index
    %c0_11 = arith.constant 0 : index
    %15 = vector.load %arg15[%c0_10, %c0_11] : memref<200x1xf32, #tpu.memory_space<vmem>>, vector<200x1xf32>
    %16 = vector.broadcast %14 : vector<200x1xi32> to vector<200x512xi32>
    %17 = arith.cmpi eq, %9, %16 : vector<200x512xi32>
    %cst_12 = arith.constant 0.000000e+00 : f32
    %18 = vector.broadcast %cst_12 : f32 to vector<200x512xf32>
    %19 = arith.select %17, %5, %18 : vector<200x512xi1>, vector<200x512xf32>
    %cst_13 = arith.constant dense<0.000000e+00> : vector<200xf32>
    %20 = vector.multi_reduction <add>, %19, %cst_13 [1] : vector<200x512xf32> to vector<200xf32>
    %21 = vector.shape_cast %20 : vector<200xf32> to vector<200x1xf32>
    %22 = arith.addf %15, %21 : vector<200x1xf32>
    %c0_14 = arith.constant 0 : index
    %c0_15 = arith.constant 0 : index
    %23 = vector.load %arg15[%c0_14, %c0_15] : memref<200x1xf32, #tpu.memory_space<vmem>>, vector<200x1xf32>
    tpu.vector_store %arg15[%c0_14, %c0_15], %22 {strides = array<i32>} : memref<200x1xf32, #tpu.memory_space<vmem>>, vector<200x1xf32>,
    %c512_i32_16 = arith.constant 512 : i32
    %24 = arith.muli %arg2, %c512_i32_16 : i32
    %c500_i32 = arith.constant 500 : i32
    %25 = arith.subi %c500_i32, %24 : i32
    %26 = vector.broadcast %25 : i32 to vector<200x512xi32>
    %27 = arith.cmpi slt, %9, %26 : vector<200x512xi32>
    %cst_17 = arith.constant 0xFF800000 : f32
    %28 = vector.broadcast %cst_17 : f32 to vector<200x512xf32>
    %29 = arith.select %27, %5, %28 : vector<200x512xi1>, vector<200x512xf32>
    %c0_18 = arith.constant 0 : index
    %c0_19 = arith.constant 0 : index
    %30 = vector.load %arg13[%c0_18, %c0_19] : memref<200x1xf32, #tpu.memory_space<vmem>>, vector<200x1xf32>
    %cst_20 = arith.constant dense<0xFF800000> : vector<200xf32>
    %31 = vector.multi_reduction <maximumf>, %29, %cst_20 [1] : vector<200x512xf32> to vector<200xf32>
    %32 = vector.shape_cast %31 : vector<200xf32> to vector<200x1xf32>
    %33 = arith.maximumf %30, %32 : vector<200x1xf32>
    %c0_21 = arith.constant 0 : index
    %c0_22 = arith.constant 0 : index
    %34 = vector.load %arg14[%c0_21, %c0_22] : memref<200x1xf32, #tpu.memory_space<vmem>>, vector<200x1xf32>
    %35 = arith.subf %30, %33 : vector<200x1xf32>
    %36 = math.exp %35 : vector<200x1xf32>
    %37 = arith.mulf %34, %36 : vector<200x1xf32>
    %38 = vector.broadcast %33 : vector<200x1xf32> to vector<200x512xf32>
    %39 = arith.subf %29, %38 : vector<200x512xf32>
    %40 = math.exp %39 : vector<200x512xf32>
    %cst_23 = arith.constant dense<0.000000e+00> : vector<200xf32>
    %41 = vector.multi_reduction <add>, %40, %cst_23 [1] : vector<200x512xf32> to vector<200xf32>
    %42 = vector.shape_cast %41 : vector<200xf32> to vector<200x1xf32>
    %43 = arith.addf %37, %42 : vector<200x1xf32>
    %c0_24 = arith.constant 0 : index
    %c0_25 = arith.constant 0 : index
    %44 = vector.load %arg14[%c0_24, %c0_25] : memref<200x1xf32, #tpu.memory_space<vmem>>, vector<200x1xf32>
    tpu.vector_store %arg14[%c0_24, %c0_25], %43 {strides = array<i32>} : memref<200x1xf32, #tpu.memory_space<vmem>>, vector<200x1xf32>,
    %c0_26 = arith.constant 0 : index
    %c0_27 = arith.constant 0 : index
    %45 = vector.load %arg13[%c0_26, %c0_27] : memref<200x1xf32, #tpu.memory_space<vmem>>, vector<200x1xf32>
    tpu.vector_store %arg13[%c0_26, %c0_27], %33 {strides = array<i32>} : memref<200x1xf32, #tpu.memory_space<vmem>>, vector<200x1xf32>,
    %c0_i32_28 = arith.constant 0 : i32
    %46 = arith.cmpi eq, %arg2, %c0_i32_28 : i32
    %47 = arith.extui %46 : i1 to i32
    %c0_i32_29 = arith.constant 0 : i32
    %48 = arith.cmpi ne, %47, %c0_i32_29 : i32
    scf.if %48 {
      %c0_30 = arith.constant 0 : index
      %c0_31 = arith.constant 0 : index
      %c0_32 = arith.constant 0 : index
      %49 = vector.load %arg5[%c0_30, %c0_31, %c0_32] : memref<1x200x1xi32, #tpu.memory_space<vmem>>, vector<1x200x1xi32>
      %50 = vector.shape_cast %49 : vector<1x200x1xi32> to vector<200x1xi32>
      %c0_i32_33 = arith.constant 0 : i32
      %51 = vector.broadcast %c0_i32_33 : i32 to vector<200x1xi32>
      %52 = arith.cmpi sge, %50, %51 : vector<200x1xi32>
      %53 = arith.extui %52 : vector<200x1xi1> to vector<200x1xi32>
      %54 = arith.sitofp %53 : vector<200x1xi32> to vector<200x1xf32>
      %c0_34 = arith.constant 0 : index
      %c0_35 = arith.constant 0 : index
      %55 = vector.load %arg13[%c0_34, %c0_35] : memref<200x1xf32, #tpu.memory_space<vmem>>, vector<200x1xf32>
      %c0_36 = arith.constant 0 : index
      %c0_37 = arith.constant 0 : index
      %56 = vector.load %arg14[%c0_36, %c0_37] : memref<200x1xf32, #tpu.memory_space<vmem>>, vector<200x1xf32>
      %57 = math.log %56 : vector<200x1xf32>
      %58 = arith.addf %55, %57 : vector<200x1xf32>
      %c0_38 = arith.constant 0 : index
      %c0_39 = arith.constant 0 : index
      %59 = vector.load %arg15[%c0_38, %c0_39] : memref<200x1xf32, #tpu.memory_space<vmem>>, vector<200x1xf32>
      %60 = arith.subf %58, %59 : vector<200x1xf32>
      %61 = arith.mulf %54, %60 : vector<200x1xf32>
      %cst_40 = arith.constant dense<0.000000e+00> : vector<1xf32>
      %62 = vector.multi_reduction <add>, %61, %cst_40 [0] : vector<200x1xf32> to vector<1xf32>
      %63 = vector.shape_cast %62 : vector<1xf32> to vector<1x1xf32>
      %c0_41 = arith.constant 0 : index
      %c0_42 = arith.constant 0 : index
      %c0_43 = arith.constant 0 : index
      %c0_44 = arith.constant 0 : index
      %64 = vector.load %arg10[%c0_41, %c0_42, %c0_43, %c0_44] : memref<1x1x1x1xf32, #tpu.memory_space<vmem>>, vector<1x1x1x1xf32>
      %65 = vector.shape_cast %64 : vector<1x1x1x1xf32> to vector<1x1xf32>
      %66 = vector.shape_cast %63 : vector<1x1xf32> to vector<1x1x1x1xf32>
      tpu.vector_store %arg10[%c0_41, %c0_42, %c0_43, %c0_44], %66 {strides = array<i32>} : memref<1x1x1x1xf32, #tpu.memory_space<vmem>>, vector<1x1x1x1xf32>,
      %cst_45 = arith.constant dense<0.000000e+00> : vector<1xf32>
      %67 = vector.multi_reduction <add>, %54, %cst_45 [0] : vector<200x1xf32> to vector<1xf32>
      %68 = vector.shape_cast %67 : vector<1xf32> to vector<1x1xf32>
      %c0_46 = arith.constant 0 : index
      %c0_47 = arith.constant 0 : index
      %c0_48 = arith.constant 0 : index
      %c0_49 = arith.constant 0 : index
      %69 = vector.load %arg11[%c0_46, %c0_47, %c0_48, %c0_49] : memref<1x1x1x1xf32, #tpu.memory_space<vmem>>, vector<1x1x1x1xf32>
      %70 = vector.shape_cast %69 : vector<1x1x1x1xf32> to vector<1x1xf32>
      %71 = vector.shape_cast %68 : vector<1x1xf32> to vector<1x1x1x1xf32>
      tpu.vector_store %arg11[%c0_46, %c0_47, %c0_48, %c0_49], %71 {strides = array<i32>} : memref<1x1x1x1xf32, #tpu.memory_space<vmem>>, vector<1x1x1x1xf32>,
    } else {
    }
    return
  }
  func.func @transform_0(%arg0: i32, %arg1: i32, %arg2: i32) -> (i32, i32, i32) {
    %c0_i32 = arith.constant 0 : i32
    %c0_i32_0 = arith.constant 0 : i32
    return %arg0, %arg1, %c0_i32 : i32, i32, i32
  }
  func.func @transform_1(%arg0: i32, %arg1: i32, %arg2: i32) -> (i32, i32, i32) {
    %c0_i32 = arith.constant 0 : i32
    %c0_i32_0 = arith.constant 0 : i32
    return %arg0, %arg1, %c0_i32 : i32, i32, i32
  }
  func.func @transform_2(%arg0: i32, %arg1: i32, %arg2: i32) -> (i32, i32, i32) {
    %c0_i32 = arith.constant 0 : i32
    %c0_i32_0 = arith.constant 0 : i32
    return %arg0, %arg1, %c0_i32 : i32, i32, i32
  }
  func.func @transform_3(%arg0: i32, %arg1: i32, %arg2: i32) -> (i32, i32, i32) {
    %c0_i32 = arith.constant 0 : i32
    %c0_i32_0 = arith.constant 0 : i32
    %c0_i32_1 = arith.constant 0 : i32
    return %arg0, %c0_i32, %c0_i32_0 : i32, i32, i32
  }
  func.func @transform_4(%arg0: i32, %arg1: i32, %arg2: i32) -> (i32, i32) {
    %c0_i32 = arith.constant 0 : i32
    %c0_i32_0 = arith.constant 0 : i32
    return %c0_i32, %arg2 : i32, i32
  }
  func.func @transform_5(%arg0: i32, %arg1: i32, %arg2: i32) -> (i32, i32, i32) {
    %c0_i32 = arith.constant 0 : i32
    return %arg0, %arg1, %arg2 : i32, i32, i32
  }
  func.func @transform_6(%arg0: i32, %arg1: i32, %arg2: i32) -> (i32, i32, i32) {
    %c0_i32 = arith.constant 0 : i32
    %c0_i32_0 = arith.constant 0 : i32
    return %arg0, %arg1, %c0_i32 : i32, i32, i32
  }
  func.func @transform_7(%arg0: i32, %arg1: i32, %arg2: i32) -> (i32, i32, i32, i32) {
    %c0_i32 = arith.constant 0 : i32
    %c0_i32_0 = arith.constant 0 : i32
    %c0_i32_1 = arith.constant 0 : i32
    return %arg0, %arg1, %c0_i32, %c0_i32_0 : i32, i32, i32, i32
  }
  func.func @transform_8(%arg0: i32, %arg1: i32, %arg2: i32) -> (i32, i32, i32, i32) {
    %c0_i32 = arith.constant 0 : i32
    %c0_i32_0 = arith.constant 0 : i32
    %c0_i32_1 = arith.constant 0 : i32
    return %arg0, %arg1, %c0_i32, %c0_i32_0 : i32, i32, i32, i32
  }
}

</mosaic_0001>

<bundles_post_ra>
// kernel: tpu_custom_call.1
= control target key start
LH: loop header
LB: loop body
LE: loop exit
PB: predicated region body
PF: predicated region fallthrough
CT: control target
= control target key end

     0   :  { %s8345_s0 = inlined_call_operand.vmem [shape: f32[2,200,128], index: 0, kind: input, shape index: {}]   ;;  %s8346_s1 = inlined_call_operand.vmem [shape: s32[2,200,1], index: 1, kind: input, shape index: {}]   ;;  %s8347_s2 = inlined_call_operand.vmem [shape: s32[2,200,1], index: 2, kind: input, shape index: {}]   ;;  %s8348_s3 = inlined_call_operand.vmem [shape: f32[2,4,128], index: 3, kind: input, shape index: {}]   ;;  %s8349_s4 = inlined_call_operand.vmem [shape: bf16[128,512], index: 4, kind: input, shape index: {}]   ;;  %s8350_s5 = inlined_call_operand.hbm [shape: f32[2,200,512], index: 5, kind: output, shape index: {0}]   ;;  %s8351_s6 = inlined_call_operand.hbm [shape: f32[2,200,128], index: 6, kind: output, shape index: {1}]   ;;  %s8352_s7 = inlined_call_operand.vmem [shape: f32[2,1,1,1], index: 7, kind: output, shape index: {2}]   ;;  %s8353_s8 = inlined_call_operand.vmem [shape: f32[2,1,1,1], index: 8, kind: output, shape index: {3}]  }
   0x1   :  { %8426 = sst [smem:[#allocation56_spill]] %s8345_s0 }
   0x2   :  { %8427 = sst [smem:[#allocation57_spill]] %s8346_s1 }
   0x3   :  { %8428 = sst [smem:[#allocation58_spill]] %s8347_s2 }
   0x4   :  { %14 = vsyncpa [#allocation7], 0 }
   0x5   :  { %16 = vsyncpa [#allocation7 + $0x1], 0 }
   0x6   :  { %17 = vsyncpa [#allocation9], 0 }
   0x7   :  { %19 = vsyncpa [#allocation9 + $0x1], 0  ;;  %s5319_s27 = smov 0   ;;  %s5321_s28 = smov 0  }
   0x8   :  { %s5323_s29 = smov 0   ;;  %s5325_s30 = smov 0  }
   0x9   :  { %s5327_s9 = smov 0   ;;  %s5329_s10 = smov 0  }
   0xa LB: > { %s4375_s11 = sadd.s32 4294967295, %s5265_s10   ;;  %s4376_s12 = sadd.s32 4294967294, %s5265_s10   ;;  %s5265_s10 = sphi %s5329_s10, %s25_s10   ;;  %s5261_s9 = sphi %s5327_s9, %s8646_s9   ;;  %s5257_s30 = sphi %s5325_s30, %s8645_s30   ;;  %s5253_s29 = sphi %s5323_s29, %s8644_s29   ;;  %s5249_s28 = sphi %s5321_s28, %s8643_s28   ;;  %s5245_s27 = sphi %s5319_s27, %s8642_s27  }
   0xb   : > { %s44_s13 = sadd.s32 1, %s5261_s9  ;;  %s191_s14 = sadd.s32 1, %s5253_s29 }
   0xc   : > { %p46_p0 = scmp.ge.s32.totalorder %s44_s13, 2  ;;  %p201_p1 = scmp.ne.s32.totalorder %s5253_s29, %s5249_s28 }
   0xd   : > { %p202_p2 = scmp.eq.s32.totalorder %s4375_s11, 1  ;;  %p207_p3 = scmp.ne.s32.totalorder %s5249_s28, %s5245_s27 }
   0xe   : > { %s8648_s13 = smov (%p46_p0, %s44_s13), 0  ;;  %p208_p5 = scmp.eq.s32.totalorder %s4376_s12, 1 }
   0xf   : > { %8429 = sst [smem:[#allocation12_spill]] %s8648_s13  ;;  %p5359_p4 = por %p202_p2, %p201_p1 }
  0x10   : > { %s184_s16 = ssub.s32 %s5261_s9, %s8648_s13  ;;  %p4380_p6 = scmp.ge.s32.totalorder %s5265_s10, 1 }
  0x11   : > { %p189_p7 = scmp.eq.s32.totalorder %s184_s16, 0  ;;  %p5366_p8 = por %p208_p5, %p207_p3 }
  0x12   : > { %p365_p9 = scmp.lt.s32.totalorder %s5265_s10, 3 }
  0x13   : > { %s5372_s18 = scalar_select %p189_p7, %s5253_s29, %s191_s14  }
  0x14   : > { %p366_p10 = pnand %p4380_p6, %p365_p9 }
  0x16   : > { %369 = sbr.rel (%p366_p10) target bundleno = 1177 (0x499), region = 40 }
  0x1b   : > { %p448_p11 = scmp.lt.s32.totalorder %s5257_s30, 1  ;;  %v5267_v0 = vmov 0   ;;  %s8432_s1 = sld [smem:[#allocation57_spill]] }
  0x1c   : > { %4779 = vset.pattern.permute.xlu2 %v5267_v0  ;;  %4778 = vset.pattern.permute.xlu1 %v5267_v0  ;;  %s8451_s2 = sld [smem:[#allocation58_spill]]  ;;  %s5921_s21 = sand.u32 1, %s5249_s28  }
  0x1d   : > { %4777 = vset.pattern.permute.xlu0 %v5267_v0  ;;  %s5379_s19 = scalar_select %p448_p11, %s5257_s30, 1 }
  0x1e   : > { %s8455_s0 = sld [smem:[#allocation56_spill]]  ;;  %s4078_s14 = scalar_lea.sflag [#allocation7], %s5921_s21 }
  0x1f   : > { %s5382_s20 = smul.u32 200, %s5379_s19  ;;  %s5175_s22 = scalar_lea.hbm %s8350_s5, 1600 }
  0x21   : > { %s5388_s23 = scalar_lea.vmem %s8432_s1, %s5382_s20  ;;  %s4384_s1 = sshll.u32 %s5379_s19, 2 }
  0x22   : > { %v5391_v1 = vld [vmem:[%s5388_s23 + $0x20] sm:$0xff]  ;;  %v5394_v2 = vld [vmem:[%s5388_s23 + $0x10] sm:$0xff]  ;;  %v5405_v6 = vld [vmem:[%s5388_s23 + $0x28] sm:$0xff]  ;;  %s5781_s26 = scalar_lea.vmem %s8451_s2, %s5382_s20  ;;  %s480_s13 = scalar_lea.vmem %s8348_s3, %s4384_s1 }
  0x23   : > { %vm561_vm0 = vcmp.eq.s32.totalorder %v5391_v1, 0  ;;  %vm559_vm1 = vcmp.eq.s32.totalorder %v5394_v2, 0  ;;  %v5399_v3 = vld [vmem:[%s5388_s23] sm:$0xff]  ;;  %v5408_v7 = vld [vmem:[%s5388_s23 + $0x18] sm:$0xff]  ;;  %v5412_v9 = vld [vmem:[%s5388_s23 + $0x8] sm:$0xff]  ;;  %vm562_vm3 = vcmp.eq.s32.totalorder %v5405_v6, 0 }
  0x24   : > { %v586_v4 = vsel %vm561_vm0, 1, %v5267_v0  ;;  %v584_v5 = vsel %vm559_vm1, 1, %v5267_v0  ;;  %vm557_vm2 = vcmp.eq.s32.totalorder %v5399_v3, 0  ;;  %vm560_vm4 = vcmp.eq.s32.totalorder %v5408_v7, 0  ;;  %v5421_v13 = vld [vmem:[%s5388_s23 + $0x40] sm:$0xff]  ;;  %v5424_v14 = vld [vmem:[%s5388_s23 + $0x38] sm:$0xff]  ;;  %s5930_s24 = scalar_lea.vmem %s8455_s0, %s5382_s20 }
  0x25   : > { %620 = vperm.xlu2 %4779, %v586_v4   ;;  %614 = vperm.xlu1 %4778, %v584_v5   ;;  %v582_v8 = vsel %vm557_vm2, 1, %v5267_v0  ;;  %vm558_vm5 = vcmp.eq.s32.totalorder %v5412_v9, 0  ;;  %v587_v10 = vsel %vm562_vm3, 1, %v5267_v0  ;;  %v585_v11 = vsel %vm560_vm4, 1, %v5267_v0  ;;  %v5427_v15 = vld [vmem:[%s5388_s23 + $0x30] sm:$0xff]  ;;  %v5436_v19 = vld [vmem:[%s5388_s23 + $0x58] sm:$0xff] }
  0x26   : > { %608 = vperm.xlu0 %4777, %v582_v8   ;;  %v583_v12 = vsel %vm558_vm5, 1, %v5267_v0  ;;  %vm565_vm6 = vcmp.eq.s32.totalorder %v5421_v13, 0  ;;  %vm564_vm7 = vcmp.eq.s32.totalorder %v5424_v14, 0  ;;  %vm563_vm8 = vcmp.eq.s32.totalorder %v5427_v15, 0  ;;  %v5439_v20 = vld [vmem:[%s5388_s23 + $0x50] sm:$0xff]  ;;  %v5442_v21 = vld [vmem:[%s5388_s23 + $0x48] sm:$0xff] }
  0x27   : > { %v590_v16 = vsel %vm565_vm6, 1, %v5267_v0  ;;  %v589_v17 = vsel %vm564_vm7, 1, %v5267_v0  ;;  %v588_v18 = vsel %vm563_vm8, 1, %v5267_v0  ;;  %vm568_vm9 = vcmp.eq.s32.totalorder %v5436_v19, 0  ;;  %v5451_v25 = vld [vmem:[%s5388_s23 + $0x70] sm:$0xff]  ;;  %v5454_v26 = vld [vmem:[%s5388_s23 + $0x68] sm:$0xff] }
  0x28   : > { %vm567_vm10 = vcmp.eq.s32.totalorder %v5439_v20, 0  ;;  %vm566_vm11 = vcmp.eq.s32.totalorder %v5442_v21, 0  ;;  %v593_v22 = vsel %vm568_vm9, 1, %v5267_v0  ;;  %v5457_v27 = vld [vmem:[%s5388_s23 + $0x60] sm:$0xff]  ;;  %vm571_vm12 = vcmp.eq.s32.totalorder %v5451_v25, 0  ;;  %v5466_v31 = vld [vmem:[%s5388_s23 + $0x88] sm:$0xff] }
  0x29   : > { %v592_v23 = vsel %vm567_vm10, 1, %v5267_v0  ;;  %v591_v24 = vsel %vm566_vm11, 1, %v5267_v0  ;;  %vm570_vm13 = vcmp.eq.s32.totalorder %v5454_v26, 0  ;;  %vm569_vm14 = vcmp.eq.s32.totalorder %v5457_v27, 0  ;;  %v5469_v32 = vld [vmem:[%s5388_s23 + $0x80] sm:$0xff]  ;;  %v5472_v33 = vld [vmem:[%s5388_s23 + $0x78] sm:$0xff] }
  0x2a   : > { %v596_v28 = vsel %vm571_vm12, 1, %v5267_v0  ;;  %v595_v29 = vsel %vm570_vm13, 1, %v5267_v0  ;;  %v594_v30 = vsel %vm569_vm14, 1, %v5267_v0  ;;  %vm574_vm15 = vcmp.eq.s32.totalorder %v5466_v31, 0  ;;  %v5481_v37 = vld [vmem:[%s5388_s23 + $0xa0] sm:$0xff]  ;;  %v5484_v38 = vld [vmem:[%s5388_s23 + $0x98] sm:$0xff] }
  0x2b   : > { %vm573_vm0 = vcmp.eq.s32.totalorder %v5469_v32, 0  ;;  %vm572_vm1 = vcmp.eq.s32.totalorder %v5472_v33, 0  ;;  %v599_v34 = vsel %vm574_vm15, 1, %v5267_v0  ;;  %v5487_v39 = vld [vmem:[%s5388_s23 + $0x90] sm:$0xff]  ;;  %vm577_vm2 = vcmp.eq.s32.totalorder %v5481_v37, 0  ;;  %v5496_v43 = vld [vmem:[%s5388_s23 + $0xb8] sm:$0xff] }
  0x2c   : > { %v598_v35 = vsel %vm573_vm0, 1, %v5267_v0  ;;  %v597_v36 = vsel %vm572_vm1, 1, %v5267_v0  ;;  %vm576_vm3 = vcmp.eq.s32.totalorder %v5484_v38, 0  ;;  %vm575_vm4 = vcmp.eq.s32.totalorder %v5487_v39, 0  ;;  %v5499_v44 = vld [vmem:[%s5388_s23 + $0xb0] sm:$0xff]  ;;  %v5502_v45 = vld [vmem:[%s5388_s23 + $0xa8] sm:$0xff] }
  0x2d   : > { %623 = vperm.xlu2 %4779, %v587_v10   ;;  %617 = vperm.xlu1 %4778, %v585_v11   ;;  %v602_v40 = vsel %vm577_vm2, 1, %v5267_v0  ;;  %v601_v41 = vsel %vm576_vm3, 1, %v5267_v0  ;;  %v600_v42 = vsel %vm575_vm4, 1, %v5267_v0  ;;  %vm580_vm5 = vcmp.eq.s32.totalorder %v5496_v43, 0  ;;  %v5511_v49 = vld [vmem:[%s5388_s23 + $0xc0] sm:$0xff]  ;;  %s4706_s23 = smul.u32 200, %s5921_s21 }
  0x2e   : > { %611 = vperm.xlu0 %4777, %v583_v12   ;;  %vm579_vm6 = vcmp.eq.s32.totalorder %v5499_v44, 0  ;;  %vm578_vm7 = vcmp.eq.s32.totalorder %v5502_v45, 0  ;;  %v605_v46 = vsel %vm580_vm5, 1, %v5267_v0  ;;  %vm734_vm8 = vcmp.eq.s32.totalorder %v5412_v9, 1  ;;  %s4705_s0 = smul.u32 800, %s5921_s21 }
  0x2f   : > { %v604_v47 = vsel %vm579_vm6, 1, %v5267_v0  ;;  %v603_v48 = vsel %vm578_vm7, 1, %v5267_v0  ;;  %vm733_vm9 = vcmp.eq.s32.totalorder %v5399_v3, 1  ;;  %vm581_vm10 = vcmp.eq.s32.totalorder %v5511_v49, 0  ;;  %s4708_s20 = smul.u32 800, %s5257_s30 }
  0x30   : > { %v759_v50 = vsel %vm734_vm8, 1, %v5267_v0  ;;  %v758_v51 = vsel %vm733_vm9, 1, %v5267_v0  ;;  %v606_v52 = vsel %vm581_vm10, 1, %v5267_v0  ;;  %vm737_vm11 = vcmp.eq.s32.totalorder %v5391_v1, 1 }
  0x31   : > { %vm736_vm12 = vcmp.eq.s32.totalorder %v5408_v7, 1  ;;  %vm735_vm13 = vcmp.eq.s32.totalorder %v5394_v2, 1  ;;  %v762_v53 = vsel %vm737_vm11, 1, %v5267_v0  ;;  %vm740_vm14 = vcmp.eq.s32.totalorder %v5424_v14, 1  ;;  %s4111_s1 = scalar_lea.hbm %s8350_s5, %s4708_s20 }
  0x32   : > { %v761_v54 = vsel %vm736_vm12, 1, %v5267_v0  ;;  %v760_v55 = vsel %vm735_vm13, 1, %v5267_v0  ;;  %vm739_vm15 = vcmp.eq.s32.totalorder %v5427_v15, 1  ;;  %vm738_vm0 = vcmp.eq.s32.totalorder %v5405_v6, 1  ;;  %s4114_s25 = sshll.u32 %s4111_s1, 4  ;;  %s4115_s25 = int_to_ptr.hbm [resolvable:$true] %s4114_s25 }
  0x33   : > { %v765_v56 = vsel %vm740_vm14, 1, %v5267_v0  ;;  %v764_v57 = vsel %vm739_vm15, 1, %v5267_v0  ;;  %v763_v58 = vsel %vm738_vm0, 1, %v5267_v0  ;;  %vm743_vm1 = vcmp.eq.s32.totalorder %v5439_v20, 1  ;;  %s5169_s16 = sshra.s32 %s4115_s25, 4  ;;  %s5170_s16 = int_to_ptr.hbm [resolvable:$true] %s5169_s16 }
  0x34   : > { %vm742_vm2 = vcmp.eq.s32.totalorder %v5442_v21, 1  ;;  %vm741_vm3 = vcmp.eq.s32.totalorder %v5421_v13, 1  ;;  %v768_v59 = vsel %vm743_vm1, 1, %v5267_v0  ;;  %vm746_vm4 = vcmp.eq.s32.totalorder %v5454_v26, 1  ;;  %p5176_p1 = scmp.lt.s32.totalorder %s5170_s16, %s8350_s5 }
  0x35   : > { %632 = vperm.xlu2 %4779, %v590_v16   ;;  %629 = vperm.xlu1 %4778, %v589_v17   ;;  %v767_v60 = vsel %vm742_vm2, 1, %v5267_v0  ;;  %v766_v61 = vsel %vm741_vm3, 1, %v5267_v0  ;;  %vm745_vm5 = vcmp.eq.s32.totalorder %v5457_v27, 1  ;;  %vm744_vm6 = vcmp.eq.s32.totalorder %v5436_v19, 1 }
  0x36   : > { %626 = vperm.xlu0 %4777, %v588_v18   ;;  %v771_v63 = vsel %vm746_vm4, 1, %v5267_v0  ;;  %v770_v4 = vsel %vm745_vm5, 1, %v5267_v0  ;;  %v769_v5 = vsel %vm744_vm6, 1, %v5267_v0  ;;  %vm749_vm7 = vcmp.eq.s32.totalorder %v5469_v32, 1 }
  0x37   : > { %vm748_vm8 = vcmp.eq.s32.totalorder %v5472_v33, 1  ;;  %vm747_vm9 = vcmp.eq.s32.totalorder %v5451_v25, 1  ;;  %v774_v10 = vsel %vm749_vm7, 1, %v5267_v0  ;;  %vm752_vm10 = vcmp.eq.s32.totalorder %v5484_v38, 1 }
  0x38   : > { %v773_v11 = vsel %vm748_vm8, 1, %v5267_v0  ;;  %v772_v12 = vsel %vm747_vm9, 1, %v5267_v0  ;;  %vm751_vm11 = vcmp.eq.s32.totalorder %v5487_v39, 1  ;;  %vm750_vm12 = vcmp.eq.s32.totalorder %v5466_v31, 1 }
  0x39   : > { %v777_v17 = vsel %vm752_vm10, 1, %v5267_v0  ;;  %v776_v18 = vsel %vm751_vm11, 1, %v5267_v0  ;;  %vm755_vm13 = vcmp.eq.s32.totalorder %v5499_v44, 1  ;;  %vm754_vm14 = vcmp.eq.s32.totalorder %v5502_v45, 1 }
  0x3a   : > { %vm753_vm15 = vcmp.eq.s32.totalorder %v5481_v37, 1  ;;  %vm909_vm0 = vcmp.eq.s32.totalorder %v5399_v3, 2  ;;  %vm757_vm1 = vcmp.eq.s32.totalorder %v5511_v49, 1  ;;  %vm756_vm2 = vcmp.eq.s32.totalorder %v5496_v43, 1 }
  0x3b   : > { %vm912_vm3 = vcmp.eq.s32.totalorder %v5408_v7, 2  ;;  %vm911_vm4 = vcmp.eq.s32.totalorder %v5394_v2, 2  ;;  %vm910_vm5 = vcmp.eq.s32.totalorder %v5412_v9, 2  ;;  %vm915_vm6 = vcmp.eq.s32.totalorder %v5427_v15, 2 }
  0x3c   : > { %vm914_vm7 = vcmp.eq.s32.totalorder %v5405_v6, 2  ;;  %vm913_vm8 = vcmp.eq.s32.totalorder %v5391_v1, 2  ;;  %vm918_vm9 = vcmp.eq.s32.totalorder %v5442_v21, 2  ;;  %vm917_vm10 = vcmp.eq.s32.totalorder %v5421_v13, 2 }
  0x3d   : > { %641 = vperm.xlu2 %4779, %v593_v22   ;;  %638 = vperm.xlu1 %4778, %v592_v23   ;;  %v775_v22 = vsel %vm750_vm12, 1, %v5267_v0  ;;  %vm916_vm11 = vcmp.eq.s32.totalorder %v5424_v14, 2  ;;  %vm921_vm12 = vcmp.eq.s32.totalorder %v5457_v27, 2 }
  0x3e   : > { %635 = vperm.xlu0 %4777, %v591_v24  }
  0x45   : > { %650 = vperm.xlu2 %4779, %v596_v28   ;;  %647 = vperm.xlu1 %4778, %v595_v29   ;;  %v780_v29 = vsel %vm755_vm13, 1, %v5267_v0  ;;  %vm920_vm13 = vcmp.eq.s32.totalorder %v5436_v19, 2 }
  0x46   : > { %644 = vperm.xlu0 %4777, %v594_v30   ;;  %v779_v30 = vsel %vm754_vm14, 1, %v5267_v0  ;;  %vm919_vm14 = vcmp.eq.s32.totalorder %v5439_v20, 2 }
  0x4d   : > { %659 = vperm.xlu2 %4779, %v599_v34   ;;  %656 = vperm.xlu1 %4778, %v598_v35   ;;  %v778_v34 = vsel %vm753_vm15, 1, %v5267_v0  ;;  %vm924_vm15 = vcmp.eq.s32.totalorder %v5472_v33, 2 }
  0x4e   : > { %653 = vperm.xlu0 %4777, %v597_v36  }
  0x55   : > { %668 = vperm.xlu2 %4779, %v602_v40   ;;  %665 = vperm.xlu1 %4778, %v601_v41   ;;  %v934_v41 = vsel %vm909_vm0, 1, %v5267_v0  ;;  %vm923_vm0 = vcmp.eq.s32.totalorder %v5451_v25, 2 }
  0x56   : > { %662 = vperm.xlu0 %4777, %v600_v42   ;;  %v782_v42 = vsel %vm757_vm1, 1, %v5267_v0  ;;  %vm922_vm1 = vcmp.eq.s32.totalorder %v5454_v26, 2 }
  0x5d   : > { %677 = vperm.xlu2 %4779, %v605_v46   ;;  %674 = vperm.xlu1 %4778, %v604_v47   ;;  %v781_v46 = vsel %vm756_vm2, 1, %v5267_v0  ;;  %vm927_vm2 = vcmp.eq.s32.totalorder %v5487_v39, 2 }
  0x5e   : > { %671 = vperm.xlu0 %4777, %v603_v48  }
  0x65   : > { %787 = vperm.xlu2 %4779, %v759_v50   ;;  %784 = vperm.xlu1 %4778, %v758_v51   ;;  %v937_v51 = vsel %vm912_vm3, 1, %v5267_v0  ;;  %vm926_vm3 = vcmp.eq.s32.totalorder %v5466_v31, 2 }
  0x66   : > { %680 = vperm.xlu0 %4777, %v606_v52   ;;  %v936_v52 = vsel %vm911_vm4, 1, %v5267_v0  ;;  %vm925_vm4 = vcmp.eq.s32.totalorder %v5469_v32, 2 }
  0x6d   : > { %796 = vperm.xlu2 %4779, %v762_v53   ;;  %793 = vperm.xlu1 %4778, %v761_v54   ;;  %v935_v53 = vsel %vm910_vm5, 1, %v5267_v0  ;;  %vm930_vm5 = vcmp.eq.s32.totalorder %v5502_v45, 2 }
  0x6e   : > { %790 = vperm.xlu0 %4777, %v760_v55  }
  0x75   : > { %805 = vperm.xlu2 %4779, %v765_v56   ;;  %802 = vperm.xlu1 %4778, %v764_v57   ;;  %v940_v57 = vsel %vm915_vm6, 1, %v5267_v0  ;;  %vm929_vm6 = vcmp.eq.s32.totalorder %v5481_v37, 2 }
  0x76   : > { %799 = vperm.xlu0 %4777, %v763_v58   ;;  %v939_v58 = vsel %vm914_vm7, 1, %v5267_v0  ;;  %vm928_vm7 = vcmp.eq.s32.totalorder %v5484_v38, 2 }
  0x7d   : > { %814 = vperm.xlu2 %4779, %v768_v59   ;;  %811 = vperm.xlu1 %4778, %v767_v60   ;;  %v938_v59 = vsel %vm913_vm8, 1, %v5267_v0  ;;  %vm933_vm8 = vcmp.eq.s32.totalorder %v5511_v49, 2 }
  0x7e   : > { %808 = vperm.xlu0 %4777, %v766_v61  }
  0x7f   : > { %v5537_v62 = vpop.permute.xlu2 %620 }
  0x85   : > { %823 = vperm.xlu2 %4779, %v771_v63   ;;  %820 = vperm.xlu1 %4778, %v770_v4   ;;  %v943_v4 = vsel %vm918_vm9, 1, %v5267_v0  ;;  %vm932_vm9 = vcmp.eq.s32.totalorder %v5496_v43, 2 }
  0x86   : > { %817 = vperm.xlu0 %4777, %v769_v5   ;;  %v942_v5 = vsel %vm917_vm10, 1, %v5267_v0  ;;  %vm931_vm10 = vcmp.eq.s32.totalorder %v5499_v44, 2 }
  0x87   : > { %v5545_v8 = vpop.permute.xlu2 %623 }
  0x8d   : > { %832 = vperm.xlu2 %4779, %v774_v10   ;;  %829 = vperm.xlu1 %4778, %v773_v11   ;;  %v941_v10 = vsel %vm916_vm11, 1, %v5267_v0  ;;  %vm1087_vm11 = vcmp.eq.s32.totalorder %v5394_v2, 3 }
  0x8e   : > { %826 = vperm.xlu0 %4777, %v772_v12  }
  0x8f   : > { %v5553_v16 = vpop.permute.xlu2 %632 }
  0x95   : > { %841 = vperm.xlu2 %4779, %v777_v17   ;;  %838 = vperm.xlu1 %4778, %v776_v18   ;;  %v946_v18 = vsel %vm921_vm12, 1, %v5267_v0  ;;  %vm1086_vm12 = vcmp.eq.s32.totalorder %v5412_v9, 3 }
  0x96   : > { %835 = vperm.xlu0 %4777, %v775_v22   ;;  %v945_v22 = vsel %vm920_vm13, 1, %v5267_v0  ;;  %vm1085_vm13 = vcmp.eq.s32.totalorder %v5399_v3, 3 }
  0x97   : > { %v5561_v23 = vpop.permute.xlu2 %641  ;;  %v5563_v24 = vpop.permute.xlu1 %614 }
  0x98   : > { %v5567_v28 = vpop.permute.xlu0 %608 }
  0x9d   : > { %850 = vperm.xlu2 %4779, %v780_v29   ;;  %847 = vperm.xlu1 %4778, %v779_v30   ;;  %v944_v29 = vsel %vm919_vm14, 1, %v5267_v0  ;;  %vm1090_vm14 = vcmp.eq.s32.totalorder %v5405_v6, 3 }
  0x9e   : > { %844 = vperm.xlu0 %4777, %v778_v34   ;;  %v1115_v3 = vsel %vm1090_vm14, 1, %v5267_v0  ;;  %vm1104_vm14 = vcmp.eq.s32.totalorder %v5484_v38, 3 }
  0x9f   : > { %v5573_v35 = vpop.permute.xlu2 %650  ;;  %v5575_v36 = vpop.permute.xlu1 %617 }
  0xa0   : > { %v5579_v40 = vpop.permute.xlu0 %611 }
  0xa5   : > { %960 = vperm.xlu2 %4779, %v934_v41   ;;  %856 = vperm.xlu1 %4778, %v782_v42   ;;  %v949_v42 = vsel %vm924_vm15, 1, %v5267_v0  ;;  %vm1089_vm15 = vcmp.eq.s32.totalorder %v5391_v1, 3 }
  0xa6   : > { %853 = vperm.xlu0 %4777, %v781_v46   ;;  %v948_v46 = vsel %vm923_vm0, 1, %v5267_v0  ;;  %vm1088_vm0 = vcmp.eq.s32.totalorder %v5408_v7, 3  ;;  %v1114_v9 = vsel %vm1089_vm15, 1, %v5267_v0  ;;  %vm1103_vm15 = vcmp.eq.s32.totalorder %v5487_v39, 3 }
  0xa7   : > { %v5585_v47 = vpop.permute.xlu2 %659  ;;  %v5587_v48 = vpop.permute.xlu1 %629 }
  0xa8   : > { %v5591_v50 = vpop.permute.xlu0 %626 }
  0xad   : > { %969 = vperm.xlu2 %4779, %v937_v51   ;;  %966 = vperm.xlu1 %4778, %v936_v52   ;;  %v947_v51 = vsel %vm922_vm1, 1, %v5267_v0  ;;  %vm1093_vm1 = vcmp.eq.s32.totalorder %v5421_v13, 3 }
  0xae   : > { %963 = vperm.xlu0 %4777, %v935_v53   ;;  %v1118_v6 = vsel %vm1093_vm1, 1, %v5267_v0  ;;  %vm1107_vm1 = vcmp.eq.s32.totalorder %v5499_v44, 3 }
  0xaf   : > { %v5597_v54 = vpop.permute.xlu2 %668  ;;  %v5599_v55 = vpop.permute.xlu1 %638  ;;  %v1132_v39 = vsel %vm1107_vm1, 1, %v5267_v0  ;;  %vm682_vm1 = vcmp.eq.s32.totalorder %v5567_v28, 1 }
  0xb0   : > { %v5603_v56 = vpop.permute.xlu0 %635 }
  0xb5   : > { %978 = vperm.xlu2 %4779, %v940_v57   ;;  %975 = vperm.xlu1 %4778, %v939_v58   ;;  %v952_v58 = vsel %vm927_vm2, 1, %v5267_v0  ;;  %vm1092_vm2 = vcmp.eq.s32.totalorder %v5424_v14, 3 }
  0xb6   : > { %972 = vperm.xlu0 %4777, %v938_v59   ;;  %v951_v59 = vsel %vm926_vm3, 1, %v5267_v0  ;;  %vm1091_vm3 = vcmp.eq.s32.totalorder %v5427_v15, 3  ;;  %v1117_v7 = vsel %vm1092_vm2, 1, %v5267_v0  ;;  %vm1106_vm2 = vcmp.eq.s32.totalorder %v5502_v45, 3 }
  0xb7   : > { %v5609_v60 = vpop.permute.xlu2 %677  ;;  %v5611_v61 = vpop.permute.xlu1 %647 }
  0xb8   : > { %v5615_v63 = vpop.permute.xlu0 %644 }
  0xbd   : > { %987 = vperm.xlu2 %4779, %v943_v4   ;;  %984 = vperm.xlu1 %4778, %v942_v5   ;;  %v950_v4 = vsel %vm925_vm4, 1, %v5267_v0  ;;  %vm1096_vm4 = vcmp.eq.s32.totalorder %v5436_v19, 3 }
  0xbe   : > { %981 = vperm.xlu0 %4777, %v941_v10   ;;  %v1121_v14 = vsel %vm1096_vm4, 1, %v5267_v0  ;;  %vm684_vm4 = vcmp.eq.s32.totalorder %v5563_v24, 1 }
  0xbf   : > { %v5621_v11 = vpop.permute.xlu1 %656  ;;  %v5623_v12 = vpop.permute.xlu2 %787 }
  0xc0   : > { %8433 = vst [vmem:[#allocation13_spill] sm:$0xff] %v5621_v11  ;;  %v5627_v17 = vpop.permute.xlu0 %653  ;;  %v2111_v11 = vld [vmem:[%s5781_s26 + $0x48] sm:$0xff] }
  0xc1   : > { %8434 = vst [vmem:[#allocation14_spill] sm:$0xff] %v5627_v17  ;;  %v4616_v17 = vld [vmem:[%s8349_s4 + $0x6c] sm:$0xf0] }
  0xc5   : > { %996 = vperm.xlu2 %4779, %v946_v18   ;;  %993 = vperm.xlu1 %4778, %v945_v22   ;;  %v955_v22 = vsel %vm930_vm5, 1, %v5267_v0  ;;  %vm1095_vm5 = vcmp.eq.s32.totalorder %v5439_v20, 3 }
  0xc6   : > { %990 = vperm.xlu0 %4777, %v944_v29   ;;  %v954_v29 = vsel %vm929_vm6, 1, %v5267_v0  ;;  %vm1094_vm6 = vcmp.eq.s32.totalorder %v5442_v21, 3  ;;  %v1120_v15 = vsel %vm1095_vm5, 1, %v5267_v0 }
  0xc7   : > { %v5633_v30 = vpop.permute.xlu1 %665  ;;  %v5635_v34 = vpop.permute.xlu2 %796 }
  0xc8   : > { %8435 = vst [vmem:[#allocation15_spill] sm:$0xff] %v5633_v30  ;;  %v5639_v41 = vpop.permute.xlu0 %662  ;;  %v4629_v30 = vld [vmem:[%s8349_s4 + $0xd4] sm:$0xf0] }
  0xc9   : > { %8436 = vst [vmem:[#allocation16_spill] sm:$0xff] %v5639_v41  ;;  %v4531_v41 = vld [vmem:[%s8349_s4 + $0xc0] sm:$0xf] }
  0xcd   : > { %1005 = vperm.xlu2 %4779, %v949_v42   ;;  %1002 = vperm.xlu1 %4778, %v948_v46   ;;  %v953_v42 = vsel %vm928_vm7, 1, %v5267_v0  ;;  %vm1099_vm7 = vcmp.eq.s32.totalorder %v5451_v25, 3 }
  0xce   : > { %999 = vperm.xlu0 %4777, %v947_v51   ;;  %v1124_v20 = vsel %vm1099_vm7, 1, %v5267_v0 }
  0xcf   : > { %v5645_v52 = vpop.permute.xlu1 %674  ;;  %v5647_v53 = vpop.permute.xlu2 %805 }
  0xd0   : > { %8437 = vst [vmem:[#allocation17_spill] sm:$0xff] %v5645_v52  ;;  %v5651_v57 = vpop.permute.xlu0 %671  ;;  %v1111_v52 = vsel %vm1086_vm12, 1, %v5267_v0  ;;  %vm1100_vm12 = vcmp.eq.s32.totalorder %v5472_v33, 3  ;;  %v1129_v33 = vsel %vm1104_vm14, 1, %v5267_v0 }
  0xd1   : > { %8438 = vst [vmem:[#allocation18_spill] sm:$0xff] %v5651_v57  ;;  %v1112_v57 = vsel %vm1087_vm11, 1, %v5267_v0  ;;  %vm1101_vm11 = vcmp.eq.s32.totalorder %v5469_v32, 3 }
  0xd5   : > { %1014 = vperm.xlu2 %4779, %v952_v58   ;;  %1011 = vperm.xlu1 %4778, %v951_v59   ;;  %v958_v59 = vsel %vm933_vm8, 1, %v5267_v0  ;;  %vm1098_vm8 = vcmp.eq.s32.totalorder %v5454_v26, 3 }
  0xd6   : > { %1008 = vperm.xlu0 %4777, %v950_v4   ;;  %v957_v4 = vsel %vm932_vm9, 1, %v5267_v0  ;;  %vm1097_vm9 = vcmp.eq.s32.totalorder %v5457_v27, 3  ;;  %v1123_v21 = vsel %vm1098_vm8, 1, %v5267_v0  ;;  %v1126_v27 = vsel %vm1101_vm11, 1, %v5267_v0 }
  0xd7   : > { %v5657_v5 = vpop.permute.xlu2 %814  ;;  %v5659_v10 = vpop.permute.xlu1 %784  ;;  %vm687_vm8 = vcmp.eq.s32.totalorder %v5545_v8, 1 }
  0xd8   : > { %v5663_v18 = vpop.permute.xlu0 %680 }
  0xd9   : > { %8439 = vst [vmem:[#allocation19_spill] sm:$0xff] %v5663_v18 }
  0xdd   : > { %1023 = vperm.xlu2 %4779, %v955_v22   ;;  %1020 = vperm.xlu1 %4778, %v954_v29   ;;  %v956_v22 = vsel %vm931_vm10, 1, %v5267_v0  ;;  %vm1102_vm10 = vcmp.eq.s32.totalorder %v5466_v31, 3 }
  0xde   : > { %1017 = vperm.xlu0 %4777, %v953_v42   ;;  %v1127_v26 = vsel %vm1102_vm10, 1, %v5267_v0 }
  0xdf   : > { %v5669_v46 = vpop.permute.xlu2 %823  ;;  %v5671_v51 = vpop.permute.xlu1 %793 }
  0xe0   : > { %8440 = vst [vmem:[#allocation20_spill] sm:$0xff] %v5669_v46  ;;  %v5675_v58 = vpop.permute.xlu0 %790 }
  0xe1   : > { %vm860_vm5 = vcmp.eq.s32.totalorder %v5675_v58, 1  ;;  %v4609_v58 = vld [vmem:[%s8349_s4 + $0x34] sm:$0xf0] }
  0xe5   : > { %1032 = vperm.xlu2 %4779, %v958_v59   ;;  %1029 = vperm.xlu1 %4778, %v957_v4   ;;  %v1110_v59 = vsel %vm1085_vm13, 1, %v5267_v0  ;;  %vm1105_vm13 = vcmp.eq.s32.totalorder %v5481_v37, 3 }
  0xe6   : > { %1026 = vperm.xlu0 %4777, %v956_v22   ;;  %v1130_v32 = vsel %vm1105_vm13, 1, %v5267_v0 }
  0xe7   : > { %v5681_v29 = vpop.permute.xlu2 %832  ;;  %v5683_v42 = vpop.permute.xlu1 %802 }
  0xe8   : > { %8441 = vst [vmem:[#allocation21_spill] sm:$0xff] %v5681_v29  ;;  %v5687_v18 = vpop.permute.xlu0 %799 }
  0xed   : > { %1142 = vperm.xlu2 %4779, %v1112_v57   ;;  %1139 = vperm.xlu1 %4778, %v1111_v52   ;;  %v1113_v57 = vsel %vm1088_vm0, 1, %v5267_v0  ;;  %vm1108_vm0 = vcmp.eq.s32.totalorder %v5496_v43, 3 }
  0xee   : > { %1136 = vperm.xlu0 %4777, %v1110_v59   ;;  %v1133_v38 = vsel %vm1108_vm0, 1, %v5267_v0  ;;  %vm693_vm0 = vcmp.eq.s32.totalorder %v5561_v23, 1 }
  0xef   : > { %v5693_v4 = vpop.permute.xlu2 %841  ;;  %v5695_v22 = vpop.permute.xlu1 %811 }
  0xf0   : > { %8442 = vst [vmem:[#allocation22_spill] sm:$0xff] %v5693_v4  ;;  %v5699_v2 = vpop.permute.xlu0 %808 }
  0xf1   : > { %vm866_vm13 = vcmp.eq.s32.totalorder %v5699_v2, 1 }
  0xf5   : > { %1151 = vperm.xlu2 %4779, %v1115_v3   ;;  %1148 = vperm.xlu1 %4778, %v1114_v9   ;;  %v1116_v3 = vsel %vm1091_vm3, 1, %v5267_v0  ;;  %vm1109_vm3 = vcmp.eq.s32.totalorder %v5511_v49, 3 }
  0xf6   : > { %1145 = vperm.xlu0 %4777, %v1113_v57  }
  0xf7   : > { %v5705_v52 = vpop.permute.xlu2 %850  ;;  %v5707_v59 = vpop.permute.xlu1 %820 }
  0xf8   : > { %8443 = vst [vmem:[#allocation23_spill] sm:$0xff] %v5705_v52  ;;  %v5711_v1 = vpop.permute.xlu0 %817  ;;  %v4555_v52 = vld [vmem:[%s8349_s4 + $0xe8] sm:$0xf] }
  0xf9   : > { %8444 = vst [vmem:[#allocation24_spill] sm:$0xff] %v5707_v59 }
  0xfd   : > { %1160 = vperm.xlu2 %4779, %v1118_v6   ;;  %1157 = vperm.xlu1 %4778, %v1117_v7   ;;  %v1119_v6 = vsel %vm1094_vm6, 1, %v5267_v0 }
  0xfe   : > { %1154 = vperm.xlu0 %4777, %v1116_v3  }
  0xff   : > { %v5717_v9 = vpop.permute.xlu2 %960  ;;  %v5719_v57 = vpop.permute.xlu1 %829 }
 0x100   : > { %8445 = vst [vmem:[#allocation25_spill] sm:$0xff] %v5719_v57  ;;  %v5723_v13 = vpop.permute.xlu0 %826  ;;  %v4499_v57 = vld [vmem:[%s8349_s4 + $0x80] sm:$0xf] }
 0x105   : > { %1169 = vperm.xlu2 %4779, %v1121_v14   ;;  %1166 = vperm.xlu1 %4778, %v1120_v15   ;;  %v1122_v14 = vsel %vm1097_vm9, 1, %v5267_v0  ;;  %vm863_vm9 = vcmp.eq.s32.totalorder %v5687_v18, 1  ;;  %v2117_v18 = vld [vmem:[%s5781_s26 + $0x78] sm:$0xff] }
 0x106   : > { %1163 = vperm.xlu0 %4777, %v1119_v6  }
 0x107   : > { %v5729_v7 = vpop.permute.xlu2 %969  ;;  %v5731_v3 = vpop.permute.xlu1 %838 }
 0x108   : > { %8446 = vst [vmem:[#allocation26_spill] sm:$0xff] %v5731_v3  ;;  %v5735_v19 = vpop.permute.xlu0 %835  ;;  %v4633_v3 = vld [vmem:[%s8349_s4 + $0xf4] sm:$0xf0] }
 0x10d   : > { %1178 = vperm.xlu2 %4779, %v1124_v20   ;;  %1175 = vperm.xlu1 %4778, %v1123_v21   ;;  %v1125_v20 = vsel %vm1100_vm12, 1, %v5267_v0  ;;  %vm690_vm12 = vcmp.eq.s32.totalorder %v5553_v16, 1 }
 0x10e   : > { %1172 = vperm.xlu0 %4777, %v1122_v14  }
 0x10f   : > { %v5741_v15 = vpop.permute.xlu2 %978  ;;  %v5743_v6 = vpop.permute.xlu1 %847 }
 0x110   : > { %8447 = vst [vmem:[#allocation27_spill] sm:$0xff] %v5743_v6  ;;  %v5747_v25 = vpop.permute.xlu0 %844 }
 0x115   : > { %1187 = vperm.xlu2 %4779, %v1127_v26   ;;  %1184 = vperm.xlu1 %4778, %v1126_v27   ;;  %v1128_v26 = vsel %vm1103_vm15, 1, %v5267_v0 }
 0x116   : > { %1181 = vperm.xlu0 %4777, %v1125_v20  }
 0x117   : > { %v5753_v21 = vpop.permute.xlu2 %987  ;;  %v5755_v14 = vpop.permute.xlu1 %856 }
 0x118   : > { %8448 = vst [vmem:[#allocation28_spill] sm:$0xff] %v5755_v14  ;;  %v5759_v31 = vpop.permute.xlu0 %853  ;;  %v4630_v14 = vld [vmem:[%s8349_s4 + $0xe4] sm:$0xf] }
 0x119   : > { %8449 = vst [vmem:[#allocation29_spill] sm:$0xff] %v5759_v31  ;;  %v2110_v31 = vld [vmem:[%s5781_s26 + $0x40] sm:$0xff] }
 0x11d   : > { %1196 = vperm.xlu2 %4779, %v1130_v32   ;;  %1193 = vperm.xlu1 %4778, %v1129_v33   ;;  %v1131_v32 = vsel %vm1106_vm2, 1, %v5267_v0  ;;  %v2103_v33 = vld [vmem:[%s5781_s26 + $0x8] sm:$0xff]  ;;  %vm683_vm2 = vcmp.eq.s32.totalorder %v5579_v40, 1 }
 0x11e   : > { %1190 = vperm.xlu0 %4777, %v1128_v26   ;;  %v2102_v26 = vld [vmem:[%s5781_s26] sm:$0xff] }
 0x11f   : > { %v5765_v27 = vpop.permute.xlu2 %996  ;;  %v5767_v20 = vpop.permute.xlu1 %966 }
 0x120   : > { %8450 = vst [vmem:[#allocation30_spill] sm:$0xff] %v5765_v27  ;;  %v5771_v37 = vpop.permute.xlu0 %963  ;;  %vm1036_vm6 = vcmp.eq.s32.totalorder %v5767_v20, 1 }
 0x125   : > { %1205 = vperm.xlu2 %4779, %v1133_v38   ;;  %1202 = vperm.xlu1 %4778, %v1132_v39   ;;  %v1134_v38 = vsel %vm1109_vm3, 1, %v5267_v0  ;;  %v4547_v39 = vld [vmem:[%s8349_s4 + $0xe0] sm:$0xf]  ;;  %v4549_v0 = vld [vmem:[%s8349_s4 + $0xf0] sm:$0xf0]  ;;  %vm859_vm3 = vcmp.eq.s32.totalorder %v5623_v12, 1 }
 0x126   : > { %1199 = vperm.xlu0 %4777, %v1131_v32   ;;  %v4632_v32 = vld [vmem:[%s8349_s4 + $0xec] sm:$0xf0]  ;;  %v4552_v6 = vor.u32 %v4630_v14, %v4549_v0  ;;  %v4557_v14 = vld [vmem:[%s8349_s4 + $0xf8] sm:$0xf0]  ;;  %v2106_v0 = vld [vmem:[%s5781_s26 + $0x20] sm:$0xff] }
 0x127   : > { %v5783_v43 = vpop.permute.xlu2 %1005  ;;  %v5785_v44 = vpop.permute.xlu1 %975  ;;  %v4548_v49 = vor.u32 %v4632_v32, %v4547_v39 }
 0x128   : > { %8452 = vst [vmem:[#allocation31_spill] sm:$0xff] %v5783_v43  ;;  %v5787_v45 = vpop.permute.xlu0 %972  ;;  %1778 = vmatpush.bf16.msra.mxu1 %v4552_v6  ;;  %v4533_v6 = vld [vmem:[%s8349_s4 + $0xd0] sm:$0xf0]  ;;  %v4624_v43 = vld [vmem:[%s8349_s4 + $0xac] sm:$0xf0]  ;;  %vm1039_vm10 = vcmp.eq.s32.totalorder %v5785_v44, 1 }
 0x129   : > { %1705 = vmatpush.bf16.msra.mxu0 %v4548_v49  ;;  %v2105_v49 = vld [vmem:[%s5781_s26 + $0x18] sm:$0xff] }
 0x12d   : > { %2183 = vperm.xlu2 %4779, %v2103_v33   ;;  %2180 = vperm.xlu1 %4778, %v2102_v26   ;;  %v4631_v33 = vld [vmem:[%s8349_s4 + $0xec] sm:$0xf] }
 0x12e   : > { %1208 = vperm.xlu0 %4777, %v1134_v38   ;;  %v4556_v38 = vor.u32 %v4633_v3, %v4555_v52  ;;  %v4560_v4 = vor.u32 %v4631_v33, %v4557_v14  ;;  %v4626_v3 = vld [vmem:[%s8349_s4 + $0xc4] sm:$0xf]  ;;  %v4539_v14 = vld [vmem:[%s8349_s4 + $0xc8] sm:$0xf] }
 0x12f   : > { %v5814_v26 = vpop.permute.xlu2 %1014  ;;  %v5816_v39 = vpop.permute.xlu1 %984  ;;  %v4536_v33 = vor.u32 %v4626_v3, %v4533_v6  ;;  %v4515_v6 = vld [vmem:[%s8349_s4 + $0xa0] sm:$0xf] }
 0x130   : > { %8453 = vst [vmem:[#allocation32_spill] sm:$0xff] %v5814_v26  ;;  %v5821_v32 = vpop.permute.xlu0 %981  ;;  %v4628_v26 = vld [vmem:[%s8349_s4 + $0xcc] sm:$0xf0]  ;;  %1851 = vmatpush.bf16.msra.mxu2 %v4556_v38  ;;  %1924 = vmatpush.bf16.msra.mxu3 %v4560_v4  ;;  %v4540_v38 = vor.u32 %v4629_v30, %v4539_v14  ;;  %v4541_v4 = vld [vmem:[%s8349_s4 + $0xd8] sm:$0xf0]  ;;  %v4516_v30 = vor.u32 %v4624_v43, %v4515_v6  ;;  %vm1042_vm14 = vcmp.eq.s32.totalorder %v5816_v39, 1 }
 0x131   : > { %v4532_v52 = vor.u32 %v4628_v26, %v4531_v41  ;;  %v4627_v41 = vld [vmem:[%s8349_s4 + $0xcc] sm:$0xf]  ;;  %v2104_v26 = vld [vmem:[%s5781_s26 + $0x10] sm:$0xff]  ;;  %1779 = vmatpush.bf16.msra.mxu1 %v4536_v33 }
 0x132   : > { %v4544_v3 = vor.u32 %v4627_v41, %v4541_v4  ;;  %v4517_v33 = vld [vmem:[%s8349_s4 + $0xb0] sm:$0xf0]  ;;  %v4523_v41 = vld [vmem:[%s8349_s4 + $0xa8] sm:$0xf]  ;;  %v4625_v4 = vld [vmem:[%s8349_s4 + $0xb4] sm:$0xf0] }
 0x133   : > { %1706 = vmatpush.bf16.msra.mxu0 %v4532_v52  ;;  %v4622_v52 = vld [vmem:[%s8349_s4 + $0xa4] sm:$0xf]  ;;  %v4623_v43 = vld [vmem:[%s8349_s4 + $0xac] sm:$0xf] }
 0x134   : > { %1852 = vmatpush.bf16.msra.mxu2 %v4540_v38  ;;  %v4520_v14 = vor.u32 %v4622_v52, %v4517_v33  ;;  %1925 = vmatpush.bf16.msra.mxu3 %v4544_v3  ;;  %v4525_v38 = vld [vmem:[%s8349_s4 + $0xb8] sm:$0xf0]  ;;  %v4620_v3 = vld [vmem:[%s8349_s4 + $0x8c] sm:$0xf0] }
 0x135   : > { %2192 = vperm.xlu2 %4779, %v2106_v0   ;;  %2189 = vperm.xlu1 %4778, %v2105_v49   ;;  %v2109_v52 = vld [vmem:[%s5781_s26 + $0x38] sm:$0xff]  ;;  %v4528_v33 = vor.u32 %v4623_v43, %v4525_v38  ;;  %v4507_v43 = vld [vmem:[%s8349_s4 + $0x88] sm:$0xf]  ;;  %v4619_v38 = vld [vmem:[%s8349_s4 + $0x8c] sm:$0xf] }
 0x136   : > { %2186 = vperm.xlu0 %4777, %v2104_v26   ;;  %v4524_v26 = vor.u32 %v4625_v4, %v4523_v41  ;;  %1780 = vmatpush.bf16.msra.mxu1 %v4520_v14  ;;  %v4500_v41 = vor.u32 %v4620_v3, %v4499_v57  ;;  %v4618_v4 = vld [vmem:[%s8349_s4 + $0x84] sm:$0xf]  ;;  %v4621_v57 = vld [vmem:[%s8349_s4 + $0x94] sm:$0xf0]  ;;  %v2107_v3 = vld [vmem:[%s5781_s26 + $0x28] sm:$0xff] }
 0x137   : > { %v5872_v0 = vpop.permute.xlu2 %1023  ;;  %v5874_v49 = vpop.permute.xlu1 %993  ;;  %1707 = vmatpush.bf16.msra.mxu0 %v4516_v30  ;;  %v2108_v30 = vld [vmem:[%s5781_s26 + $0x30] sm:$0xff]  ;;  %v4508_v29 = vor.u32 %v4621_v57, %v4507_v43 }
 0x138   : > { %8454 = vst [vmem:[#allocation33_spill] sm:$0xff] %v5872_v0  ;;  %v5879_v6 = vpop.permute.xlu0 %990  ;;  %v4501_v0 = vld [vmem:[%s8349_s4 + $0x90] sm:$0xf0]  ;;  %1853 = vmatpush.bf16.msra.mxu2 %v4524_v26  ;;  %1926 = vmatpush.bf16.msra.mxu3 %v4528_v33  ;;  %v4614_v33 = vld [vmem:[%s8349_s4 + $0x64] sm:$0xf] }
 0x139   : > { %v4504_v14 = vor.u32 %v4618_v4, %v4501_v0  ;;  %v4509_v0 = vld [vmem:[%s8349_s4 + $0x98] sm:$0xf0]  ;;  %v4483_v4 = vld [vmem:[%s8349_s4 + $0x60] sm:$0xf] }
 0x13a   : > { %v4512_v26 = vor.u32 %v4619_v38, %v4509_v0  ;;  %v4484_v43 = vor.u32 %v4616_v17, %v4483_v4  ;;  %v4617_v17 = vld [vmem:[%s8349_s4 + $0x74] sm:$0xf0]  ;;  %v4493_v0 = vld [vmem:[%s8349_s4 + $0x78] sm:$0xf0] }
 0x13b   : > { %1708 = vmatpush.bf16.msra.mxu0 %v4500_v41  ;;  %1781 = vmatpush.bf16.msra.mxu1 %v4504_v14  ;;  %v556_v41 = vld [vmem:[%s480_s13] sm:$0xf]  ;;  %v4485_v14 = vld [vmem:[%s8349_s4 + $0x70] sm:$0xf0]  ;;  %s6037_s13 = scalar_lea.vmem [#allocation8], %s4706_s23 }
 0x13c   : > { %1854 = vmatpush.bf16.msra.mxu2 %v4508_v29  ;;  %v4488_v57 = vor.u32 %v4614_v33, %v4485_v14  ;;  %1927 = vmatpush.bf16.msra.mxu3 %v4512_v26  ;;  %v5948_v4 = vperm.slane %v556_v41, 0  ;;  %v2112_v14 = vld [vmem:[%s5781_s26 + $0x50] sm:$0xff]  ;;  %v4467_v26 = vld [vmem:[%s8349_s4 + $0x40] sm:$0xf]  ;;  %v5983_v46 = vperm.slane %v556_v41, 1  ;;  %s4131_s12 = sshll.u32 %s6037_s13, 4  ;;  %s7986_s12 = int_to_ptr.vmem [resolvable:$true] %s4131_s12 }
 0x13d   : > { %2201 = vperm.xlu2 %4779, %v2109_v52   ;;  %2198 = vperm.xlu1 %4778, %v2108_v30   ;;  %v4491_v52 = vld [vmem:[%s8349_s4 + $0x68] sm:$0xf]  ;;  %v4615_v30 = vld [vmem:[%s8349_s4 + $0x6c] sm:$0xf] }
 0x13e   : > { %2195 = vperm.xlu0 %4777, %v2107_v3   ;;  %v4492_v29 = vor.u32 %v4617_v17, %v4491_v52  ;;  %v4496_v27 = vor.u32 %v4615_v30, %v4493_v0  ;;  %v4610_v17 = vld [vmem:[%s8349_s4 + $0x44] sm:$0xf]  ;;  %v4475_v30 = vld [vmem:[%s8349_s4 + $0x48] sm:$0xf] }
 0x13f   : > { %v5941_v38 = vpop.permute.xlu2 %1032  ;;  %v5943_v3 = vpop.permute.xlu1 %1002  ;;  %1709 = vmatpush.bf16.msra.mxu0 %v4484_v43  ;;  %1782 = vmatpush.bf16.msra.mxu1 %v4488_v57  ;;  %v4612_v43 = vld [vmem:[%s8349_s4 + $0x4c] sm:$0xf0]  ;;  %v4469_v57 = vld [vmem:[%s8349_s4 + $0x50] sm:$0xf0] }
 0x140   : > { %8456 = vst [vmem:[#allocation34_spill] sm:$0xff] %v5941_v38  ;;  %v5951_v33 = vpop.permute.xlu0 %999  ;;  %v508_v38 = vld [vmem:[%s5930_s24 + $0x10] sm:$0xff]  ;;  %1855 = vmatpush.bf16.msra.mxu2 %v4492_v29  ;;  %v4468_v52 = vor.u32 %v4612_v43, %v4467_v26  ;;  %1928 = vmatpush.bf16.msra.mxu3 %v4496_v27  ;;  %v4472_v0 = vor.u32 %v4610_v17, %v4469_v57  ;;  %v4611_v29 = vld [vmem:[%s8349_s4 + $0x4c] sm:$0xf]  ;;  %v4477_v26 = vld [vmem:[%s8349_s4 + $0x58] sm:$0xf0] }
 0x141   : > { %8457 = vst [vmem:[#allocation35_spill] sm:$0xff] %v5951_v33  ;;  %v4613_v33 = vld [vmem:[%s8349_s4 + $0x54] sm:$0xf0]  ;;  %v4480_v59 = vor.u32 %v4611_v29, %v4477_v26  ;;  %v5985_v27 = vperm.slane %v556_v41, 2  ;;  %v5987_v17 = vperm.slane %v556_v41, 3  ;;  %v710_v57 = vsel %vm684_vm4, %v5948_v4, %v508_v38 }
 0x142   : > { %v4476_v43 = vor.u32 %v4613_v33, %v4475_v30  ;;  %v4451_v33 = vld [vmem:[%s8349_s4 + $0x20] sm:$0xf]  ;;  %v4606_v41 = vld [vmem:[%s8349_s4 + $0x24] sm:$0xf]  ;;  %v4459_v30 = vld [vmem:[%s8349_s4 + $0x28] sm:$0xf] }
 0x143   : > { %1710 = vmatpush.bf16.msra.mxu0 %v4468_v52  ;;  %1783 = vmatpush.bf16.msra.mxu1 %v4472_v0  ;;  %v4608_v52 = vld [vmem:[%s8349_s4 + $0x2c] sm:$0xf0]  ;;  %v4460_v26 = vor.u32 %v4609_v58, %v4459_v30  ;;  %v4602_v58 = vld [vmem:[%s8349_s4 + $0x4] sm:$0xf]  ;;  %vm858_vm4 = vcmp.eq.s32.totalorder %v5659_v10, 1 }
 0x144   : > { %1856 = vmatpush.bf16.msra.mxu2 %v4476_v43  ;;  %1929 = vmatpush.bf16.msra.mxu3 %v4480_v59  ;;  %v4452_v38 = vor.u32 %v4608_v52, %v4451_v33  ;;  %v4607_v43 = vld [vmem:[%s8349_s4 + $0x2c] sm:$0xf]  ;;  %v4604_v30 = vld [vmem:[%s8349_s4 + $0xc] sm:$0xf0] }
 0x145   : > { %2210 = vperm.xlu2 %4779, %v2112_v14   ;;  %2207 = vperm.xlu1 %4778, %v2111_v11   ;;  %v886_v11 = vsel %vm860_vm5, %v5983_v46, %v710_v57  ;;  %v4453_v14 = vld [vmem:[%s8349_s4 + $0x30] sm:$0xf0]  ;;  %v4461_v57 = vld [vmem:[%s8349_s4 + $0x38] sm:$0xf0]  ;;  %v511_v33 = vld [vmem:[%s5930_s24 + $0x28] sm:$0xff]  ;;  %vm869_vm5 = vcmp.eq.s32.totalorder %v5711_v1, 1 }
 0x146   : > { %2204 = vperm.xlu0 %4777, %v2110_v31   ;;  %v1062_v59 = vsel %vm1036_vm6, %v5985_v27, %v886_v11  ;;  %v4456_v29 = vor.u32 %v4606_v41, %v4453_v14  ;;  %v2115_v52 = vld [vmem:[%s5781_s26 + $0x68] sm:$0xff]  ;;  %v2114_v11 = vld [vmem:[%s5781_s26 + $0x60] sm:$0xff]  ;;  %v4464_v41 = vor.u32 %v4607_v43, %v4461_v57  ;;  %v4605_v57 = vld [vmem:[%s8349_s4 + $0x14] sm:$0xf0]  ;;  %vm1035_vm6 = vcmp.eq.s32.totalorder %v5771_v37, 1 }
 0x147   : > { %v1143_v24 = vpop.permute.xlu2 %1142  ;;  %v6005_v31 = vpop.permute.xlu1 %1011  ;;  %1711 = vmatpush.bf16.msra.mxu0 %v4452_v38  ;;  %v4435_v14 = vld [vmem:[%s8349_s4] sm:$0xf] }
 0x148   : > { %vm1212_vm7 = vcmp.eq.s32.totalorder %v1143_v24, 1  ;;  %v6019_v0 = vpop.permute.xlu0 %1008  ;;  %v2113_v24 = vld [vmem:[%s5781_s26 + $0x58] sm:$0xff]  ;;  %1784 = vmatpush.bf16.msra.mxu1 %v4456_v29  ;;  %1857 = vmatpush.bf16.msra.mxu2 %v4460_v26  ;;  %v4436_v38 = vor.u32 %v4604_v30, %v4435_v14  ;;  %v4443_v29 = vld [vmem:[%s8349_s4 + $0x8] sm:$0xf]  ;;  %v4603_v26 = vld [vmem:[%s8349_s4 + $0xc] sm:$0xf] }
 0x149   : > { %v6031_v20 = vsel %vm1212_vm7, %v5987_v17, %v1062_v59  ;;  %1930 = vmatpush.bf16.msra.mxu3 %v4464_v41  ;;  %v4437_v59 = vld [vmem:[%s8349_s4 + $0x10] sm:$0xf0]  ;;  %v4445_v41 = vld [vmem:[%s8349_s4 + $0x18] sm:$0xf0]  ;;  %v4444_v14 = vor.u32 %v4605_v57, %v4443_v29  ;;  %vm1045_vm7 = vcmp.eq.s32.totalorder %v5874_v49, 1 }
 0x14a   : > { %1263 = vst [vmem:[%s6037_s13 + $0x10] sm:$0xff] %v6031_v20  ;;  %v4440_v43 = vor.u32 %v4602_v58, %v4437_v59  ;;  %v4448_v30 = vor.u32 %v4603_v26, %v4445_v41  ;;  %v713_v58 = vsel %vm687_vm8, %v5948_v4, %v511_v33  ;;  %v2118_v33 = vld [vmem:[%s5781_s26 + $0x80] sm:$0xff]  ;;  %vm1034_vm8 = vcmp.eq.s32.totalorder %v5717_v9, 1 }
 0x14b   : > { %1712 = vmatpush.bf16.msra.mxu0 %v4436_v38  ;;  %v889_v59 = vsel %vm863_vm9, %v5983_v46, %v713_v58  ;;  %v2116_v38 = vld [vmem:[%s5781_s26 + $0x70] sm:$0xff] }
 0x14c   : > { %1785 = vmatpush.bf16.msra.mxu1 %v4440_v43  ;;  %1858 = vmatpush.bf16.msra.mxu2 %v4444_v14  ;;  %v517_v14 = vld [vmem:[%s5930_s24 + $0x58] sm:$0xff]  ;;  %v2120_v58 = vld [vmem:[%s5781_s26 + $0x90] sm:$0xff] }
 0x14d   : > { %2219 = vperm.xlu2 %4779, %v2115_v52   ;;  %2216 = vperm.xlu1 %4778, %v2114_v11   ;;  %v1065_v11 = vsel %vm1039_vm10, %v5985_v27, %v889_v59  ;;  %v506_v59 = vld [vmem:[%s5930_s24] sm:$0xff]  ;;  %v719_v23 = vsel %vm693_vm0, %v5948_v4, %v517_v14  ;;  %v2124_v14 = vld [vmem:[%s5781_s26 + $0xb0] sm:$0xff]  ;;  %vm861_vm0 = vcmp.eq.s32.totalorder %v5671_v51, 1 }
 0x14e   : > { %2213 = vperm.xlu0 %4777, %v2113_v24   ;;  %1931 = vmatpush.bf16.msra.mxu3 %v4448_v30  ;;  %v514_v24 = vld [vmem:[%s5930_s24 + $0x40] sm:$0xff]  ;;  %v2121_v30 = vld [vmem:[%s5781_s26 + $0x98] sm:$0xff]  ;;  %v708_v28 = vsel %vm682_vm1, %v5948_v4, %v506_v59  ;;  %v895_v1 = vsel %vm869_vm5, %v5983_v46, %v719_v23  ;;  %vm872_vm1 = vcmp.eq.s32.totalorder %v5723_v13, 1 }
 0x14f   : > { %v1152_v44 = vpop.permute.xlu2 %1151  ;;  %v6073_v52 = vpop.permute.xlu1 %1020  ;;  %v716_v43 = vsel %vm690_vm12, %v5948_v4, %v514_v24  ;;  %v884_v10 = vsel %vm858_vm4, %v5983_v46, %v708_v28  ;;  %v510_v24 = vld [vmem:[%s5930_s24 + $0x20] sm:$0xff]  ;;  %vm686_vm12 = vcmp.eq.s32.totalorder %v5537_v62, 1  ;;  %vm1037_vm4 = vcmp.eq.s32.totalorder %v5729_v7, 1 }
 0x150   : > { %vm1215_vm11 = vcmp.eq.s32.totalorder %v1152_v44, 1  ;;  %v6076_v29 = vpop.permute.xlu0 %1017  ;;  %v892_v57 = vsel %vm866_vm13, %v5983_v46, %v716_v43  ;;  %v507_v44 = vld [vmem:[%s5930_s24 + $0x8] sm:$0xff]  ;;  %vm696_vm13 = vcmp.eq.s32.totalorder %v5573_v35, 1 }
 0x151   : > { %v6079_v8 = vsel %vm1215_vm11, %v5987_v17, %v1065_v11  ;;  %v1068_v41 = vsel %vm1042_vm14, %v5985_v27, %v892_v57  ;;  %v2119_v11 = vld [vmem:[%s5781_s26 + $0x88] sm:$0xff]  ;;  %v709_v40 = vsel %vm683_vm2, %v5948_v4, %v507_v44  ;;  %vm685_vm14 = vcmp.eq.s32.totalorder %v5575_v36, 1  ;;  %v2122_v44 = vld [vmem:[%s5781_s26 + $0xa0] sm:$0xff] }
 0x152   : > { %1266 = vst [vmem:[%s6037_s13 + $0x28] sm:$0xff] %v6079_v8  ;;  %v885_v12 = vsel %vm859_vm3, %v5983_v46, %v709_v40  ;;  %vm1038_vm2 = vcmp.eq.s32.totalorder %v5787_v45, 1  ;;  %vm1048_vm3 = vcmp.eq.s32.totalorder %v5943_v3, 1  ;;  %v712_v36 = vsel %vm686_vm12, %v5948_v4, %v510_v24  ;;  %v2125_v24 = vld [vmem:[%s5781_s26 + $0xb8] sm:$0xff] }
 0x153   : > { %vm864_vm12 = vcmp.eq.s32.totalorder %v5683_v42, 1 }
 0x155   : > { %2228 = vperm.xlu2 %4779, %v2118_v33   ;;  %2225 = vperm.xlu1 %4778, %v2117_v18   ;;  %v1061_v33 = vsel %vm1035_vm6, %v5985_v27, %v885_v12  ;;  %v1071_v18 = vsel %vm1045_vm7, %v5985_v27, %v895_v1 }
 0x156   : > { %2222 = vperm.xlu0 %4777, %v2116_v38   ;;  %v1060_v38 = vsel %vm1034_vm8, %v5985_v27, %v884_v10  ;;  %v523_v10 = vld [vmem:[%s5930_s24 + $0x88] sm:$0xff]  ;;  %vm699_vm8 = vcmp.eq.s32.totalorder %v5585_v47, 1 }
 0x157   : > { %v1161_v26 = vpop.permute.xlu2 %1160  ;;  %v6092_v16 = vpop.permute.xlu1 %1029 }
 0x158   : > { %vm1218_vm15 = vcmp.eq.s32.totalorder %v1161_v26, 1  ;;  %v6095_v2 = vpop.permute.xlu0 %1026  ;;  %v520_v26 = vld [vmem:[%s5930_s24 + $0x70] sm:$0xff] }
 0x159   : > { %v6098_v39 = vsel %vm1218_vm15, %v5987_v17, %v1068_v41  ;;  %vm862_vm15 = vcmp.eq.s32.totalorder %v5635_v34, 1  ;;  %v722_v34 = vsel %vm696_vm13, %v5948_v4, %v520_v26  ;;  %vm875_vm13 = vcmp.eq.s32.totalorder %v5735_v19, 1 }
 0x15a   : > { %1269 = vst [vmem:[%s6037_s13 + $0x40] sm:$0xff] %v6098_v39  ;;  %v888_v13 = vsel %vm862_vm15, %v5983_v46, %v712_v36  ;;  %v898_v3 = vsel %vm872_vm1, %v5983_v46, %v722_v34  ;;  %vm1051_vm15 = vcmp.eq.s32.totalorder %v6005_v31, 1 }
 0x15b   : > { %v1064_v35 = vsel %vm1038_vm2, %v5985_v27, %v888_v13  ;;  %v1074_v23 = vsel %vm1048_vm3, %v5985_v27, %v898_v3  ;;  %v529_v3 = vld [vmem:[%s5930_s24 + $0xb8] sm:$0xff] }
 0x15d   : > { %2237 = vperm.xlu2 %4779, %v2121_v30   ;;  %2234 = vperm.xlu1 %4778, %v2120_v58   ;;  %v2123_v30 = vld [vmem:[%s5781_s26 + $0xa8] sm:$0xff]  ;;  %v509_v58 = vld [vmem:[%s5930_s24 + $0x18] sm:$0xff] }
 0x15e   : > { %2231 = vperm.xlu0 %4777, %v2119_v11   ;;  %v711_v51 = vsel %vm685_vm14, %v5948_v4, %v509_v58  ;;  %vm1041_vm14 = vcmp.eq.s32.totalorder %v5821_v32, 1  ;;  %v526_v58 = vld [vmem:[%s5930_s24 + $0xa0] sm:$0xff] }
 0x15f   : > { %v1170_v37 = vpop.permute.xlu2 %1169  ;;  %v1140_v49 = vpop.permute.xlu1 %1139  ;;  %v887_v45 = vsel %vm861_vm0, %v5983_v46, %v711_v51  ;;  %vm1040_vm0 = vcmp.eq.s32.totalorder %v5741_v15, 1 }
 0x160   : > { %vm1221_vm9 = vcmp.eq.s32.totalorder %v1170_v37, 1  ;;  %vm1211_vm10 = vcmp.eq.s32.totalorder %v1140_v49, 1  ;;  %v1137_v9 = vpop.permute.xlu0 %1136  ;;  %v1063_v28 = vsel %vm1037_vm4, %v5985_v27, %v887_v45  ;;  %v2126_v49 = vld [vmem:[%s5781_s26 + $0xc0] sm:$0xff]  ;;  %vm702_vm4 = vcmp.eq.s32.totalorder %v5597_v54, 1 }
 0x161   : > { %v6128_v43 = vsel %vm1221_vm9, %v5987_v17, %v1071_v18  ;;  %v1237_v57 = vsel %vm1211_vm10, %v5987_v17, %v1061_v33  ;;  %vm1210_vm11 = vcmp.eq.s32.totalorder %v1137_v9, 1  ;;  %v513_v33 = vld [vmem:[%s5930_s24 + $0x38] sm:$0xff]  ;;  %vm689_vm9 = vcmp.eq.s32.totalorder %v5587_v48, 1  ;;  %v512_v18 = vld [vmem:[%s5930_s24 + $0x30] sm:$0xff] }
 0x162   : > { %1272 = vst [vmem:[%s6037_s13 + $0x58] sm:$0xff] %v6128_v43  ;;  %v1236_v41 = vsel %vm1210_vm11, %v5987_v17, %v1060_v38  ;;  %vm688_vm10 = vcmp.eq.s32.totalorder %v5591_v50, 1  ;;  %vm865_vm11 = vcmp.eq.s32.totalorder %v5647_v53, 1  ;;  %v725_v38 = vsel %vm699_vm8, %v5948_v4, %v523_v10  ;;  %v8460_v10 = vld [vmem:[#allocation29_spill] sm:$0xff] }
 0x163   : > { %1262 = vst [vmem:[%s6037_s13 + $0x8] sm:$0xff] %v1237_v57  ;;  %v4637_v59 = vpack.c.bf16 %v1237_v57, %v1236_v41  ;;  %v715_v50 = vsel %vm689_vm9, %v5948_v4, %v513_v33  ;;  %v901_v48 = vsel %vm875_vm13, %v5983_v46, %v725_v38  ;;  %vm867_vm8 = vcmp.eq.s32.totalorder %v5695_v22, 1 }
 0x164   : > { %1261 = vst [vmem:[%s6037_s13] sm:$0xff] %v1236_v41  ;;  %v891_v47 = vsel %vm865_vm11, %v5983_v46, %v715_v50  ;;  %v1077_v42 = vsel %vm1051_vm15, %v5985_v27, %v901_v48  ;;  %vm878_vm9 = vcmp.eq.s32.totalorder %v5747_v25, 1  ;;  %vm1054_vm11 = vcmp.eq.s32.totalorder %v6073_v52, 1  ;;  %v8463_v48 = vld [vmem:[#allocation13_spill] sm:$0xff] }
 0x165   : > { %4638 = vst [vmem:[#allocation2] sm:$0xff] %v4637_v59   ;;  %2246 = vperm.xlu2 %4779, %v2124_v14   ;;  %2243 = vperm.xlu1 %4778, %v2123_v30   ;;  %v1067_v53 = vsel %vm1041_vm14, %v5985_v27, %v891_v47  ;;  %v516_v59 = vld [vmem:[%s5930_s24 + $0x50] sm:$0xff]  ;;  %v728_v54 = vsel %vm702_vm4, %v5948_v4, %v526_v58 }
 0x166   : > { %2240 = vperm.xlu0 %4777, %v2122_v44   ;;  %v515_v44 = vld [vmem:[%s5930_s24 + $0x48] sm:$0xff]  ;;  %v904_v25 = vsel %vm878_vm9, %v5983_v46, %v728_v54 }
 0x167   : > { %v1179_v11 = vpop.permute.xlu2 %1178  ;;  %v1149_v62 = vpop.permute.xlu1 %1148  ;;  %v1080_v34 = vsel %vm1054_vm11, %v5985_v27, %v904_v25  ;;  %v8468_v25 = vld [vmem:[#allocation15_spill] sm:$0xff] }
 0x168   : > { %vm1224_vm5 = vcmp.eq.s32.totalorder %v1179_v11, 1  ;;  %vm1214_vm6 = vcmp.eq.s32.totalorder %v1149_v62, 1  ;;  %v1146_v7 = vpop.permute.xlu0 %1145 }
 0x169   : > { %v6164_v40 = vsel %vm1224_vm5, %v5987_v17, %v1074_v23  ;;  %v1240_v12 = vsel %vm1214_vm6, %v5987_v17, %v1064_v35  ;;  %vm1213_vm7 = vcmp.eq.s32.totalorder %v1146_v7, 1  ;;  %vm692_vm5 = vcmp.eq.s32.totalorder %v5599_v55, 1  ;;  %v519_v35 = vld [vmem:[%s5930_s24 + $0x68] sm:$0xff]  ;;  %v518_v23 = vld [vmem:[%s5930_s24 + $0x60] sm:$0xff] }
 0x16a   : > { %1275 = vst [vmem:[%s6037_s13 + $0x70] sm:$0xff] %v6164_v40  ;;  %v4647_v1 = vpack.c.bf16 %v6079_v8, %v1240_v12  ;;  %v1239_v37 = vsel %vm1213_vm7, %v5987_v17, %v1063_v28  ;;  %vm691_vm6 = vcmp.eq.s32.totalorder %v5603_v56, 1  ;;  %vm868_vm7 = vcmp.eq.s32.totalorder %v5657_v5, 1  ;;  %v8458_v28 = vld [vmem:[#allocation20_spill] sm:$0xff] }
 0x16b   : > { %1265 = vst [vmem:[%s6037_s13 + $0x20] sm:$0xff] %v1240_v12  ;;  %v4642_v9 = vpack.c.bf16 %v1239_v37, %v6031_v20  ;;  %v714_v20 = vsel %vm688_vm10, %v5948_v4, %v512_v18  ;;  %vm1044_vm10 = vcmp.eq.s32.totalorder %v5879_v6, 1  ;;  %v718_v55 = vsel %vm692_vm5, %v5948_v4, %v516_v59  ;;  %v8459_v12 = vld [vmem:[#allocation24_spill] sm:$0xff] }
 0x16c   : > { %4695 = vst [vmem:[#allocation2 + $0x10] sm:$0xff] %v4647_v1   ;;  %v4590_v8 = vld [vmem:[#allocation2] sm:$0xff]  ;;  %v890_v57 = vsel %vm864_vm12, %v5983_v46, %v714_v20  ;;  %v717_v56 = vsel %vm691_vm6, %v5948_v4, %v515_v44  ;;  %vm1043_vm12 = vcmp.eq.s32.totalorder %v5753_v21, 1  ;;  %v894_v5 = vsel %vm868_vm7, %v5983_v46, %v718_v55 }
 0x16d   : > { %1264 = vst [vmem:[%s6037_s13 + $0x18] sm:$0xff] %v1239_v37  ;;  %2252 = vperm.xlu1 %4778, %v2126_v49   ;;  %1713 = vmatmul.bf16.vlgmr.msra.gmra.mxu0 %v4590_v8  ;;  %v1066_v14 = vsel %vm1040_vm0, %v5985_v27, %v890_v57  ;;  %v893_v22 = vsel %vm867_vm8, %v5983_v46, %v717_v56  ;;  %vm705_vm0 = vcmp.eq.s32.totalorder %v5609_v60, 1  ;;  %vm870_vm4 = vcmp.eq.s32.totalorder %v8459_v12, 1  ;;  %v8461_v1 = vld [vmem:[#allocation35_spill] sm:$0xff]  ;;  %v528_v12 = vld [vmem:[%s5930_s24 + $0xb0] sm:$0xff] }
 0x16e   : > { %4694 = vst [vmem:[#allocation2 + $0x8] sm:$0xff] %v4642_v9   ;;  %2249 = vperm.xlu0 %4777, %v2125_v24   ;;  %1786 = vmatmul.bf16.vlgmr.msra.gmra.mxu1 %v4590_v8  ;;  %v1070_v36 = vsel %vm1044_vm10, %v5985_v27, %v894_v5  ;;  %v1069_v21 = vsel %vm1043_vm12, %v5985_v27, %v893_v22  ;;  %vm881_vm5 = vcmp.eq.s32.totalorder %v8460_v10, 1  ;;  %vm1047_vm6 = vcmp.eq.s32.totalorder %v8461_v1, 1  ;;  %v522_v57 = vld [vmem:[%s5930_s24 + $0x80] sm:$0xff]  ;;  %v525_v22 = vld [vmem:[%s5930_s24 + $0x98] sm:$0xff]  ;;  %v8473_v10 = vld [vmem:[#allocation17_spill] sm:$0xff] }
 0x16f   : > { %1859 = vmatmul.bf16.vlgmr.msra.gmra.mxu2 %v4590_v8  ;;  %v1188_v26 = vpop.permute.xlu2 %1187  ;;  %v1158_v41 = vpop.permute.xlu1 %1157  ;;  %1932 = vmatmul.bf16.vlgmr.msra.gmra.mxu3 %v4590_v8  ;;  %vm1057_vm7 = vcmp.eq.s32.totalorder %v6092_v16, 1  ;;  %v731_v60 = vsel %vm705_vm0, %v5948_v4, %v529_v3  ;;  %vm698_vm12 = vcmp.eq.s32.totalorder %v8463_v48, 1  ;;  %vm1050_vm0 = vcmp.eq.s32.totalorder %v6019_v0, 1  ;;  %v527_v1 = vld [vmem:[%s5930_s24 + $0xa8] sm:$0xff]  ;;  %v8478_v48 = vld [vmem:[#allocation19_spill] sm:$0xff] }
 0x170   : > { %vm1227_vm1 = vcmp.eq.s32.totalorder %v1188_v26, 1  ;;  %vm1217_vm2 = vcmp.eq.s32.totalorder %v1158_v41, 1  ;;  %v1155_v19 = vpop.permute.xlu0 %1154  ;;  %v907_v33 = vsel %vm881_vm5, %v5983_v46, %v731_v60  ;;  %v521_v41 = vld [vmem:[%s5930_s24 + $0x78] sm:$0xff] }
 0x171   : > { %v6214_v30 = vsel %vm1227_vm1, %v5987_v17, %v1077_v42  ;;  %v1243_v32 = vsel %vm1217_vm2, %v5987_v17, %v1067_v53  ;;  %vm1216_vm3 = vcmp.eq.s32.totalorder %v1155_v19, 1  ;;  %vm695_vm1 = vcmp.eq.s32.totalorder %v5611_v61, 1  ;;  %v8464_v53 = vld [vmem:[#allocation14_spill] sm:$0xff]  ;;  %v8465_v42 = vld [vmem:[#allocation21_spill] sm:$0xff] }
 0x172   : > { %1278 = vst [vmem:[%s6037_s13 + $0x88] sm:$0xff] %v6214_v30  ;;  %v1242_v31 = vsel %vm1216_vm3, %v5987_v17, %v1066_v14  ;;  %vm694_vm2 = vcmp.eq.s32.totalorder %v5615_v63, 1  ;;  %vm871_vm3 = vcmp.eq.s32.totalorder %v8458_v28, 1  ;;  %v721_v61 = vsel %vm695_vm1, %v5948_v4, %v519_v35  ;;  %v8466_v19 = vld [vmem:[#allocation25_spill] sm:$0xff]  ;;  %v8474_v60 = vld [vmem:[#allocation18_spill] sm:$0xff] }
 0x173   : > { %1268 = vst [vmem:[%s6037_s13 + $0x38] sm:$0xff] %v1243_v32  ;;  %v4652_v15 = vpack.c.bf16 %v1243_v32, %v1242_v31  ;;  %v720_v63 = vsel %vm694_vm2, %v5948_v4, %v518_v23  ;;  %v897_v37 = vsel %vm871_vm3, %v5983_v46, %v721_v61  ;;  %v1083_v8 = vsel %vm1057_vm7, %v5985_v27, %v907_v33  ;;  %v8467_v32 = vld [vmem:[#allocation31_spill] sm:$0xff] }
 0x174   : > { %1267 = vst [vmem:[%s6037_s13 + $0x30] sm:$0xff] %v1242_v31  ;;  %v896_v49 = vsel %vm870_vm4, %v5983_v46, %v720_v63  ;;  %v1073_v24 = vsel %vm1047_vm6, %v5985_v27, %v897_v37  ;;  %v724_v14 = vsel %vm698_vm12, %v5948_v4, %v522_v57  ;;  %vm1049_vm1 = vcmp.eq.s32.totalorder %v8467_v32, 1  ;;  %v8475_v61 = vld [vmem:[#allocation23_spill] sm:$0xff]  ;;  %v8477_v37 = vld [vmem:[#allocation33_spill] sm:$0xff] }
 0x175   : > { %4696 = vst [vmem:[#allocation2 + $0x18] sm:$0xff] %v4652_v15   ;;  %vm701_vm4 = vcmp.eq.s32.totalorder %v8468_v25, 1  ;;  %vm704_vm12 = vcmp.eq.s32.totalorder %v8473_v10, 1  ;;  %v8476_v63 = vld [vmem:[#allocation27_spill] sm:$0xff] }
 0x176   : > { %v530_v57 = vld [vmem:[%s5930_s24 + $0xc0] sm:$0xff] }
 0x177   : > { %v1197_v6 = vpop.permute.xlu2 %1196  ;;  %v1167_v52 = vpop.permute.xlu1 %1166 }
 0x178   : > { %vm1230_vm13 = vcmp.eq.s32.totalorder %v1197_v6, 1  ;;  %vm1220_vm14 = vcmp.eq.s32.totalorder %v1167_v52, 1  ;;  %v1164_v51 = vpop.permute.xlu0 %1163  ;;  %v524_v52 = vld [vmem:[%s5930_s24 + $0x90] sm:$0xff]  ;;  %s6365_s24 = scalar_lea.vmem [#allocation6], %s4705_s0  ;;  %s5171_s0 = scalar_lea.hbm %s5170_s16, 800 }
 0x179   : > { %v6244_v13 = vsel %vm1230_vm13, %v5987_v17, %v1080_v34  ;;  %v1246_v45 = vsel %vm1220_vm14, %v5987_v17, %v1070_v36  ;;  %vm1219_vm15 = vcmp.eq.s32.totalorder %v1164_v51, 1  ;;  %vm697_vm13 = vcmp.eq.s32.totalorder %v8464_v53, 1  ;;  %v8469_v36 = vld [vmem:[#allocation16_spill] sm:$0xff]  ;;  %v8470_v34 = vld [vmem:[#allocation22_spill] sm:$0xff]  ;;  %s4112_s23 = sshll.u32 %s6365_s24, 4  ;;  %p5172_p12 = scmp.ne.s32.totalorder %s5170_s16, %s5171_s0  ;;  %s7949_s23 = int_to_ptr.vmem [resolvable:$true] %s4112_s23 }
 0x17a   : > { %1281 = vst [vmem:[%s6037_s13 + $0xa0] sm:$0xff] %v6244_v13  ;;  %v4662_v11 = vpack.c.bf16 %v6128_v43, %v1246_v45  ;;  %v1245_v62 = vsel %vm1219_vm15, %v5987_v17, %v1069_v21  ;;  %v4591_v43 = vld [vmem:[#allocation2 + $0x8] sm:$0xff]  ;;  %vm874_vm14 = vcmp.eq.s32.totalorder %v8465_v42, 1  ;;  %vm873_vm15 = vcmp.eq.s32.totalorder %v8466_v19, 1  ;;  %v4592_v51 = vld [vmem:[#allocation2 + $0x10] sm:$0xff]  ;;  %p5177_p2 = scmp.lt.s32.totalorder %s5175_s22, %s5171_s0 }
 0x17b   : > { %1271 = vst [vmem:[%s6037_s13 + $0x50] sm:$0xff] %v1246_v45  ;;  %v4657_v7 = vpack.c.bf16 %v1245_v62, %v6098_v39  ;;  %v8462_v39 = vld [vmem:[#allocation30_spill] sm:$0xff]  ;;  %v723_v58 = vsel %vm697_vm13, %v5948_v4, %v521_v41  ;;  %v900_v31 = vsel %vm874_vm14, %v5983_v46, %v724_v14  ;;  %vm700_vm5 = vcmp.eq.s32.totalorder %v8469_v36, 1  ;;  %v8472_v45 = vld [vmem:[#allocation32_spill] sm:$0xff]  ;;  %p5173_p13 = pnand %p5172_p12, %p5359_p4 }
 0x17c   : > { %4698 = vst [vmem:[#allocation2 + $0x28] sm:$0xff] %v4662_v11   ;;  %vm1046_vm8 = vcmp.eq.s32.totalorder %v8462_v39, 1  ;;  %v899_v44 = vsel %vm873_vm15, %v5983_v46, %v723_v58  ;;  %v1076_v15 = vsel %vm1050_vm0, %v5985_v27, %v900_v31  ;;  %vm877_vm6 = vcmp.eq.s32.totalorder %v8470_v34, 1  ;;  %v8471_v21 = vld [vmem:[#allocation26_spill] sm:$0xff]  ;;  %v8479_v41 = vld [vmem:[#allocation28_spill] sm:$0xff]  ;;  %p5178_p3 = por %p5177_p2, %p5176_p1 }
 0x17d   : > { %1270 = vst [vmem:[%s6037_s13 + $0x48] sm:$0xff] %v1245_v62  ;;  %1718 = vmatmul.bf16.gmra.mxu0 %v4591_v43  ;;  %v1072_v50 = vsel %vm1046_vm8, %v5985_v27, %v896_v49  ;;  %v1075_v0 = vsel %vm1049_vm1, %v5985_v27, %v899_v44  ;;  %vm876_vm7 = vcmp.eq.s32.totalorder %v8471_v21, 1  ;;  %vm1053_vm8 = vcmp.eq.s32.totalorder %v6076_v29, 1  ;;  %v8480_v53 = vld [vmem:[#allocation34_spill] sm:$0xff]  ;;  %p5174_p0 = pneg %p5173_p13 }
 0x17e   : > { %4697 = vst [vmem:[#allocation2 + $0x20] sm:$0xff] %v4657_v7   ;;  %1791 = vmatmul.bf16.gmra.mxu1 %v4591_v43  ;;  %vm703_vm13 = vcmp.eq.s32.totalorder %v8474_v60, 1  ;;  %vm880_vm14 = vcmp.eq.s32.totalorder %v8475_v61, 1  ;;  %vm879_vm15 = vcmp.eq.s32.totalorder %v8476_v63, 1  ;;  %vm1056_vm0 = vcmp.eq.s32.totalorder %v6095_v2, 1 }
 0x17f   : > { %1864 = vmatmul.bf16.gmra.mxu2 %v4591_v43  ;;  %v1206_v18 = vpop.permute.xlu2 %1205  ;;  %v1176_v9 = vpop.permute.xlu1 %1175  ;;  %1937 = vmatmul.bf16.gmra.mxu3 %v4591_v43  ;;  %v730_v39 = vsel %vm704_vm12, %v5948_v4, %v528_v12  ;;  %vm1055_vm1 = vcmp.eq.s32.totalorder %v8477_v37, 1  ;;  %v729_v49 = vsel %vm703_vm13, %v5948_v4, %v527_v1  ;;  %p5179_p5 = pnand %p5178_p3, %p5174_p0 }
 0x180   : > { %vm1233_vm9 = vcmp.eq.s32.totalorder %v1206_v18, 1  ;;  %vm1223_vm10 = vcmp.eq.s32.totalorder %v1176_v9, 1  ;;  %v1173_v38 = vpop.permute.xlu0 %1172  ;;  %v906_v33 = vsel %vm880_vm14, %v5983_v46, %v730_v39  ;;  %v905_v9 = vsel %vm879_vm15, %v5983_v46, %v729_v49 }
 0x181   : > { %v6282_v20 = vsel %vm1233_vm9, %v5987_v17, %v1083_v8  ;;  %v1249_v47 = vsel %vm1223_vm10, %v5987_v17, %v1073_v24  ;;  %vm1222_vm11 = vcmp.eq.s32.totalorder %v1173_v38, 1  ;;  %vm1052_vm9 = vcmp.eq.s32.totalorder %v8472_v45, 1 }
 0x182   : > { %1284 = vst [vmem:[%s6037_s13 + $0xb8] sm:$0xff] %v6282_v20  ;;  %v1248_v16 = vsel %vm1222_vm11, %v5987_v17, %v1072_v50  ;;  %v1082_v24 = vsel %vm1056_vm0, %v5985_v27, %v906_v33  ;;  %v1081_v2 = vsel %vm1055_vm1, %v5985_v27, %v905_v9 }
 0x183   : > { %1274 = vst [vmem:[%s6037_s13 + $0x68] sm:$0xff] %v1249_v47  ;;  %v4667_v26 = vpack.c.bf16 %v1249_v47, %v1248_v16 }
 0x184   : > { %1273 = vst [vmem:[%s6037_s13 + $0x60] sm:$0xff] %v1248_v16 }
 0x185   : > { %4699 = vst [vmem:[#allocation2 + $0x30] sm:$0xff] %v4667_v26   ;;  %v4593_v26 = vld [vmem:[#allocation2 + $0x18] sm:$0xff]  ;;  %v4594_v58 = vld [vmem:[#allocation2 + $0x20] sm:$0xff] }
 0x187   : > { %v1185_v59 = vpop.permute.xlu1 %1184 }
 0x188   : > { %vm1226_vm2 = vcmp.eq.s32.totalorder %v1185_v59, 1  ;;  %v1182_v54 = vpop.permute.xlu0 %1181 }
 0x189   : > { %v1252_v55 = vsel %vm1226_vm2, %v5987_v17, %v1076_v15  ;;  %vm1225_vm3 = vcmp.eq.s32.totalorder %v1182_v54, 1 }
 0x18a   : > { %1277 = vst [vmem:[%s6037_s13 + $0x80] sm:$0xff] %v1252_v55  ;;  %v4677_v56 = vpack.c.bf16 %v6214_v30, %v1252_v55  ;;  %v1251_v5 = vsel %vm1225_vm3, %v5987_v17, %v1075_v0  ;;  %v727_v30 = vsel %vm701_vm4, %v5948_v4, %v525_v22  ;;  %vm706_vm4 = vcmp.eq.s32.totalorder %v8478_v48, 1  ;;  %v2184_v22 = vpop.permute.xlu2 %2183 }
 0x18b   : > { %1276 = vst [vmem:[%s6037_s13 + $0x78] sm:$0xff] %v1251_v5  ;;  %v4672_v6 = vpack.c.bf16 %v1251_v5, %v6164_v40  ;;  %v726_v40 = vsel %vm700_vm5, %v5948_v4, %v524_v52  ;;  %v903_v3 = vsel %vm877_vm6, %v5983_v46, %v727_v30  ;;  %vm882_vm5 = vcmp.eq.s32.totalorder %v8479_v41, 1 }
 0x18c   : > { %4701 = vst [vmem:[#allocation2 + $0x40] sm:$0xff] %v4677_v56   ;;  %v902_v62 = vsel %vm876_vm7, %v5983_v46, %v726_v40  ;;  %v1079_v29 = vsel %vm1053_vm8, %v5985_v27, %v903_v3  ;;  %vm1058_vm6 = vcmp.eq.s32.totalorder %v8480_v53, 1  ;;  %v732_v42 = vsel %vm706_vm4, %v5948_v4, %v530_v57  ;;  %v4595_v4 = vld [vmem:[#allocation2 + $0x28] sm:$0xff] }
 0x18d   : > { %4700 = vst [vmem:[#allocation2 + $0x38] sm:$0xff] %v4672_v6   ;;  %1723 = vmatmul.bf16.gmra.mxu0 %v4592_v51  ;;  %v1078_v23 = vsel %vm1052_vm9, %v5985_v27, %v902_v62 }
 0x18e   : > { %1796 = vmatmul.bf16.gmra.mxu1 %v4592_v51 }
 0x18f   : > { %1869 = vmatmul.bf16.gmra.mxu2 %v4592_v51  ;;  %v1194_v11 = vpop.permute.xlu1 %1193  ;;  %1942 = vmatmul.bf16.gmra.mxu3 %v4592_v51 }
 0x190   : > { %vm1229_vm10 = vcmp.eq.s32.totalorder %v1194_v11, 1  ;;  %v1191_v35 = vpop.permute.xlu0 %1190 }
 0x191   : > { %v1255_v7 = vsel %vm1229_vm10, %v5987_v17, %v1079_v29  ;;  %vm1228_vm11 = vcmp.eq.s32.totalorder %v1191_v35, 1 }
 0x192   : > { %1280 = vst [vmem:[%s6037_s13 + $0x98] sm:$0xff] %v1255_v7  ;;  %v1254_v28 = vsel %vm1228_vm11, %v5987_v17, %v1078_v23 }
 0x193   : > { %1279 = vst [vmem:[%s6037_s13 + $0x90] sm:$0xff] %v1254_v28  ;;  %v4682_v43 = vpack.c.bf16 %v1255_v7, %v1254_v28  ;;  %v4598_v0 = vld [vmem:[#allocation2 + $0x40] sm:$0xff] }
 0x195   : > { %4702 = vst [vmem:[#allocation2 + $0x48] sm:$0xff] %v4682_v43  }
 0x197   : > { %v1203_v18 = vpop.permute.xlu1 %1202 }
 0x198   : > { %vm1232_vm2 = vcmp.eq.s32.totalorder %v1203_v18, 1  ;;  %v1200_v8 = vpop.permute.xlu0 %1199 }
 0x199   : > { %v1258_v38 = vsel %vm1232_vm2, %v5987_v17, %v1082_v24  ;;  %vm1231_vm3 = vcmp.eq.s32.totalorder %v1200_v8, 1 }
 0x19a   : > { %1283 = vst [vmem:[%s6037_s13 + $0xb0] sm:$0xff] %v1258_v38  ;;  %v4692_v50 = vpack.c.bf16 %v6282_v20, %v1258_v38  ;;  %v1257_v47 = vsel %vm1231_vm3, %v5987_v17, %v1081_v2  ;;  %v908_v20 = vsel %vm882_vm5, %v5983_v46, %v732_v42  ;;  %v4596_v46 = vld [vmem:[#allocation2 + $0x30] sm:$0xff] }
 0x19b   : > { %1282 = vst [vmem:[%s6037_s13 + $0xa8] sm:$0xff] %v1257_v47  ;;  %v4687_v16 = vpack.c.bf16 %v1257_v47, %v6244_v13  ;;  %v1084_v19 = vsel %vm1058_vm6, %v5985_v27, %v908_v20  ;;  %v4597_v27 = vld [vmem:[#allocation2 + $0x38] sm:$0xff] }
 0x19c   : > { %4704 = vst [vmem:[#allocation2 + $0x58] sm:$0xff] %v4692_v50   ;;  %v4599_v10 = vld [vmem:[#allocation2 + $0x48] sm:$0xff] }
 0x19d   : > { %4703 = vst [vmem:[#allocation2 + $0x50] sm:$0xff] %v4687_v16   ;;  %1728 = vmatmul.bf16.gmra.mxu0 %v4593_v26  ;;  %v2193_v16 = vpop.permute.xlu2 %2192 }
 0x19e   : > { %1801 = vmatmul.bf16.gmra.mxu1 %v4593_v26 }
 0x19f   : > { %1874 = vmatmul.bf16.gmra.mxu2 %v4593_v26  ;;  %1947 = vmatmul.bf16.gmra.mxu3 %v4593_v26  ;;  %v2181_v59 = vpop.permute.xlu1 %2180 }
 0x1a0   : > { %v1209_v13 = vpop.permute.xlu0 %1208 }
 0x1a1   : > { %vm1234_vm7 = vcmp.eq.s32.totalorder %v1209_v13, 1 }
 0x1a2   : > { %v1260_v14 = vsel %vm1234_vm7, %v5987_v17, %v1084_v19  ;;  %v2097_v17 = vlaneseq }
 0x1a3   : > { %1285 = vst [vmem:[%s6037_s13 + $0xc0] sm:$0xff] %v1260_v14  ;;  %v1310_v32 = vpack.c.bf16 %v1260_v14, %v1260_v14 }
 0x1a4   : > { %v6358_v31 = vand.u32 127, %v2097_v17  ;;  %v4600_v20 = vld [vmem:[#allocation2 + $0x50] sm:$0xff] }
 0x1a5   : > { %1335 = vst [vmem:[#allocation2 + $0x60] sm:$0xf] %v1310_v32 }
 0x1a6   : > { %v6363_v15 = vadd.s32 128, %v6358_v31  ;;  %vm2254_vm8 = vcmp.eq.s32.totalorder %v6358_v31, %v2181_v59  ;;  %v6378_v5 = vadd.s32 256, %v6358_v31  ;;  %v6383_v6 = vadd.s32 384, %v6358_v31 }
 0x1a7   : > { %vm2258_vm12 = vcmp.eq.s32.totalorder %v6358_v31, %v2184_v22  ;;  %v2190_v39 = vpop.permute.xlu1 %2189 }
 0x1a8   : > { %vm2255_vm9 = vcmp.eq.s32.totalorder %v6363_v15, %v2181_v59  ;;  %vm2256_vm10 = vcmp.eq.s32.totalorder %v6378_v5, %v2181_v59  ;;  %vm2257_vm11 = vcmp.eq.s32.totalorder %v6383_v6, %v2181_v59  ;;  %vm2259_vm13 = vcmp.eq.s32.totalorder %v6363_v15, %v2184_v22  ;;  %v2187_v62 = vpop.permute.xlu0 %2186 }
 0x1a9   : > { %vm2260_vm14 = vcmp.eq.s32.totalorder %v6378_v5, %v2184_v22  ;;  %vm2261_vm15 = vcmp.eq.s32.totalorder %v6383_v6, %v2184_v22  ;;  %vm2262_vm0 = vcmp.eq.s32.totalorder %v6358_v31, %v2187_v62  ;;  %vm2263_vm1 = vcmp.eq.s32.totalorder %v6363_v15, %v2187_v62 }
 0x1aa   : > { %vm2264_vm2 = vcmp.eq.s32.totalorder %v6378_v5, %v2187_v62  ;;  %vm2265_vm3 = vcmp.eq.s32.totalorder %v6383_v6, %v2187_v62  ;;  %vm2266_vm4 = vcmp.eq.s32.totalorder %v6358_v31, %v2190_v39  ;;  %vm2267_vm5 = vcmp.eq.s32.totalorder %v6363_v15, %v2190_v39 }
 0x1ab   : > { %vm2268_vm6 = vcmp.eq.s32.totalorder %v6378_v5, %v2190_v39  ;;  %vm2269_vm7 = vcmp.eq.s32.totalorder %v6383_v6, %v2190_v39  ;;  %v2202_v39 = vpop.permute.xlu2 %2201 }
 0x1ad   : > { %1733 = vmatmul.bf16.gmra.mxu0 %v4594_v58 }
 0x1ae   : > { %1806 = vmatmul.bf16.gmra.mxu1 %v4594_v58 }
 0x1af   : > { %1879 = vmatmul.bf16.gmra.mxu2 %v4594_v58  ;;  %1952 = vmatmul.bf16.gmra.mxu3 %v4594_v58 }
 0x1bd   : > { %1738 = vmatmul.bf16.gmra.mxu0 %v4595_v4 }
 0x1be   : > { %1811 = vmatmul.bf16.gmra.mxu1 %v4595_v4 }
 0x1bf   : > { %1884 = vmatmul.bf16.gmra.mxu2 %v4595_v4  ;;  %1957 = vmatmul.bf16.gmra.mxu3 %v4595_v4  ;;  %v2196_v4 = vpop.permute.xlu0 %2195 }
 0x1cd   : > { %1743 = vmatmul.bf16.gmra.mxu0 %v4596_v46 }
 0x1ce   : > { %1816 = vmatmul.bf16.gmra.mxu1 %v4596_v46 }
 0x1cf   : > { %1889 = vmatmul.bf16.gmra.mxu2 %v4596_v46  ;;  %1962 = vmatmul.bf16.gmra.mxu3 %v4596_v46 }
 0x1dd   : > { %1748 = vmatmul.bf16.gmra.mxu0 %v4597_v27 }
 0x1de   : > { %1821 = vmatmul.bf16.gmra.mxu1 %v4597_v27 }
 0x1df   : > { %1894 = vmatmul.bf16.gmra.mxu2 %v4597_v27  ;;  %1967 = vmatmul.bf16.gmra.mxu3 %v4597_v27 }
 0x1ea   : > { %v6360_v44 = vpop.f32.mrf.mxu0 }
 0x1eb   : > { %1997 = vst [vmem:[%s6365_s24] sm:$0xff] %v6360_v44  ;;  %v6369_v54 = vpop.f32.mrf.mxu1  ;;  %v2354_v55 = vsel %vm2254_vm8, %v6360_v44, 0.0  ;;  %vm2270_vm8 = vcmp.eq.s32.totalorder %v6358_v31, %v2193_v16 }
 0x1ec   : > { %1998 = vst [vmem:[%s6365_s24 + $0x8] sm:$0xff] %v6369_v54  ;;  %v2355_v56 = vsel %vm2255_vm9, %v6369_v54, 0.0  ;;  %vm2271_vm9 = vcmp.eq.s32.totalorder %v6363_v15, %v2193_v16 }
 0x1ed   : > { %1753 = vmatmul.bf16.gmra.mxu0 %v4598_v0  ;;  %v2454_v52 = vadd.f32 %v2355_v56, %v2354_v55 }
 0x1ee   : > { %1826 = vmatmul.bf16.gmra.mxu1 %v4598_v0 }
 0x1ef   : > { %1899 = vmatmul.bf16.gmra.mxu2 %v4598_v0  ;;  %1972 = vmatmul.bf16.gmra.mxu3 %v4598_v0 }
 0x1f2   : > { %v6380_v25 = vpop.f32.mrf.mxu2  ;;  %v6388_v36 = vpop.f32.mrf.mxu3 }
 0x1f3   : > { %1999 = vst [vmem:[%s6365_s24 + $0x10] sm:$0xff] %v6380_v25  ;;  %v6390_v34 = vpop.f32.mrf.mxu0  ;;  %v2356_v51 = vsel %vm2256_vm10, %v6380_v25, 0.0  ;;  %v6395_v21 = vpop.f32.mrf.mxu1  ;;  %v2357_v45 = vsel %vm2257_vm11, %v6388_v36, 0.0  ;;  %vm2272_vm10 = vcmp.eq.s32.totalorder %v6378_v5, %v2193_v16  ;;  %vm2273_vm11 = vcmp.eq.s32.totalorder %v6383_v6, %v2193_v16 }
 0x1f4   : > { %2000 = vst [vmem:[%s6365_s24 + $0x18] sm:$0xff] %v6388_v36  ;;  %v2455_v30 = vadd.f32 %v2454_v52, %v2356_v51  ;;  %v2358_v3 = vsel %vm2258_vm12, %v6390_v34, 0.0  ;;  %v2359_v11 = vsel %vm2259_vm13, %v6395_v21, 0.0  ;;  %vm2274_vm12 = vcmp.eq.s32.totalorder %v6358_v31, %v2196_v4 }
 0x1f5   : > { %2001 = vst [vmem:[%s6365_s24 + $0x20] sm:$0xff] %v6390_v34  ;;  %v2459_v35 = vadd.f32 %v2359_v11, %v2358_v3  ;;  %vm2275_vm13 = vcmp.eq.s32.totalorder %v6363_v15, %v2196_v4 }
 0x1f6   : > { %2002 = vst [vmem:[%s6365_s24 + $0x28] sm:$0xff] %v6395_v21  ;;  %v2456_v40 = vadd.f32 %v2455_v30, %v2357_v45  ;;  %v2199_v45 = vpop.permute.xlu1 %2198 }
 0x1f8   : > { %2457 = vadd.xlane.f32.xlu2 %v2456_v40 }
 0x1fa   : > { %v6407_v29 = vpop.f32.mrf.mxu2  ;;  %v6412_v23 = vpop.f32.mrf.mxu3 }
 0x1fb   : > { %2003 = vst [vmem:[%s6365_s24 + $0x30] sm:$0xff] %v6407_v29  ;;  %v6414_v7 = vpop.f32.mrf.mxu0  ;;  %v2360_v28 = vsel %vm2260_vm14, %v6407_v29, 0.0  ;;  %v6419_v12 = vpop.f32.mrf.mxu1  ;;  %v2361_v1 = vsel %vm2261_vm15, %v6412_v23, 0.0  ;;  %vm2276_vm14 = vcmp.eq.s32.totalorder %v6378_v5, %v2196_v4  ;;  %vm2277_vm15 = vcmp.eq.s32.totalorder %v6383_v6, %v2196_v4 }
 0x1fc   : > { %2004 = vst [vmem:[%s6365_s24 + $0x38] sm:$0xff] %v6412_v23  ;;  %v2460_v43 = vadd.f32 %v2459_v35, %v2360_v28  ;;  %v2362_v61 = vsel %vm2262_vm0, %v6414_v7, 0.0  ;;  %v2363_v63 = vsel %vm2263_vm1, %v6419_v12, 0.0  ;;  %vm2278_vm0 = vcmp.eq.s32.totalorder %v6358_v31, %v2199_v45 }
 0x1fd   : > { %2005 = vst [vmem:[%s6365_s24 + $0x40] sm:$0xff] %v6414_v7  ;;  %1758 = vmatmul.bf16.gmra.mxu0 %v4599_v10  ;;  %v2464_v49 = vadd.f32 %v2363_v63, %v2362_v61  ;;  %vm2279_vm1 = vcmp.eq.s32.totalorder %v6363_v15, %v2199_v45 }
 0x1fe   : > { %2006 = vst [vmem:[%s6365_s24 + $0x48] sm:$0xff] %v6419_v12  ;;  %v2461_v60 = vadd.f32 %v2460_v43, %v2361_v1  ;;  %1831 = vmatmul.bf16.gmra.mxu1 %v4599_v10 }
 0x1ff   : > { %1904 = vmatmul.bf16.gmra.mxu2 %v4599_v10  ;;  %1977 = vmatmul.bf16.gmra.mxu3 %v4599_v10  ;;  %v4601_v10 = vld [vmem:[#allocation2 + $0x58] sm:$0xff] }
 0x200   : > { %2462 = vadd.xlane.f32.xlu0 %v2461_v60 }
 0x202   : > { %v6431_v37 = vpop.f32.mrf.mxu2  ;;  %v6436_v33 = vpop.f32.mrf.mxu3 }
 0x203   : > { %2007 = vst [vmem:[%s6365_s24 + $0x50] sm:$0xff] %v6431_v37  ;;  %v6438_v18 = vpop.f32.mrf.mxu0  ;;  %v2364_v9 = vsel %vm2264_vm2, %v6431_v37, 0.0  ;;  %v6443_v24 = vpop.f32.mrf.mxu1  ;;  %v2365_v2 = vsel %vm2265_vm3, %v6436_v33, 0.0  ;;  %vm2280_vm2 = vcmp.eq.s32.totalorder %v6378_v5, %v2199_v45  ;;  %vm2281_vm3 = vcmp.eq.s32.totalorder %v6383_v6, %v2199_v45 }
 0x204   : > { %2008 = vst [vmem:[%s6365_s24 + $0x58] sm:$0xff] %v6436_v33  ;;  %v2465_v8 = vadd.f32 %v2464_v49, %v2364_v9  ;;  %v2366_v50 = vsel %vm2266_vm4, %v6438_v18, 0.0  ;;  %v2367_v47 = vsel %vm2267_vm5, %v6443_v24, 0.0  ;;  %vm2282_vm4 = vcmp.eq.s32.totalorder %v6358_v31, %v2202_v39 }
 0x205   : > { %2009 = vst [vmem:[%s6365_s24 + $0x60] sm:$0xff] %v6438_v18  ;;  %v2469_v48 = vadd.f32 %v2367_v47, %v2366_v50  ;;  %vm2283_vm5 = vcmp.eq.s32.totalorder %v6363_v15, %v2202_v39 }
 0x206   : > { %2010 = vst [vmem:[%s6365_s24 + $0x68] sm:$0xff] %v6443_v24  ;;  %v2466_v38 = vadd.f32 %v2465_v8, %v2365_v2 }
 0x208   : > { %2467 = vadd.xlane.f32.xlu1 %v2466_v38 }
 0x20a   : > { %v6455_v57 = vpop.f32.mrf.mxu2  ;;  %v6460_v26 = vpop.f32.mrf.mxu3 }
 0x20b   : > { %2011 = vst [vmem:[%s6365_s24 + $0x70] sm:$0xff] %v6455_v57  ;;  %v6462_v41 = vpop.f32.mrf.mxu0  ;;  %v2368_v53 = vsel %vm2268_vm6, %v6455_v57, 0.0  ;;  %v6467_v42 = vpop.f32.mrf.mxu1  ;;  %v2369_v19 = vsel %vm2269_vm7, %v6460_v26, 0.0  ;;  %vm2284_vm6 = vcmp.eq.s32.totalorder %v6378_v5, %v2202_v39  ;;  %vm2285_vm7 = vcmp.eq.s32.totalorder %v6383_v6, %v2202_v39 }
 0x20c   : > { %2012 = vst [vmem:[%s6365_s24 + $0x78] sm:$0xff] %v6460_v26  ;;  %v2470_v13 = vadd.f32 %v2469_v48, %v2368_v53  ;;  %v2370_v32 = vsel %vm2270_vm8, %v6462_v41, 0.0  ;;  %v2371_v58 = vsel %vm2271_vm9, %v6467_v42, 0.0  ;;  %v1436_v48 = vld [vmem:[#allocation2 + $0x60] sm:$0xf] }
 0x20d   : > { %2013 = vst [vmem:[%s6365_s24 + $0x80] sm:$0xff] %v6462_v41  ;;  %1763 = vmatmul.bf16.gmra.mxu0 %v4600_v20  ;;  %v2474_v27 = vadd.f32 %v2371_v58, %v2370_v32 }
 0x20e   : > { %2014 = vst [vmem:[%s6365_s24 + $0x88] sm:$0xff] %v6467_v42  ;;  %v2471_v14 = vadd.f32 %v2470_v13, %v2369_v19  ;;  %1836 = vmatmul.bf16.gmra.mxu1 %v4600_v20  ;;  %v1518_v19 = vunpack.c.l.b16 %v1436_v48 }
 0x20f   : > { %1909 = vmatmul.bf16.gmra.mxu2 %v4600_v20  ;;  %1982 = vmatmul.bf16.gmra.mxu3 %v4600_v20 }
 0x210   : > { %2472 = vadd.xlane.f32.xlu2 %v2471_v14  ;;  %v2205_v14 = vpop.permute.xlu0 %2204 }
 0x211   : > { %vm2286_vm8 = vcmp.eq.s32.totalorder %v6358_v31, %v2205_v14  ;;  %vm2287_vm9 = vcmp.eq.s32.totalorder %v6363_v15, %v2205_v14 }
 0x212   : > { %v6479_v46 = vpop.f32.mrf.mxu2  ;;  %v6484_v17 = vpop.f32.mrf.mxu3 }
 0x213   : > { %2015 = vst [vmem:[%s6365_s24 + $0x90] sm:$0xff] %v6479_v46  ;;  %v6486_v59 = vpop.f32.mrf.mxu0  ;;  %v2372_v0 = vsel %vm2272_vm10, %v6479_v46, 0.0  ;;  %v6491_v55 = vpop.f32.mrf.mxu1  ;;  %v2373_v22 = vsel %vm2273_vm11, %v6484_v17, 0.0  ;;  %vm2288_vm10 = vcmp.eq.s32.totalorder %v6378_v5, %v2205_v14  ;;  %vm2289_vm11 = vcmp.eq.s32.totalorder %v6383_v6, %v2205_v14 }
 0x214   : > { %2016 = vst [vmem:[%s6365_s24 + $0x98] sm:$0xff] %v6484_v17  ;;  %v2475_v56 = vadd.f32 %v2474_v27, %v2372_v0  ;;  %v2374_v51 = vsel %vm2274_vm12, %v6486_v59, 0.0  ;;  %v2375_v30 = vsel %vm2275_vm13, %v6491_v55, 0.0 }
 0x215   : > { %2017 = vst [vmem:[%s6365_s24 + $0xa0] sm:$0xff] %v6486_v59  ;;  %v2479_v3 = vadd.f32 %v2375_v30, %v2374_v51 }
 0x216   : > { %2018 = vst [vmem:[%s6365_s24 + $0xa8] sm:$0xff] %v6491_v55  ;;  %v2476_v52 = vadd.f32 %v2475_v56, %v2373_v22  ;;  %v1531_v22 = vpack.c.b16 %v1518_v19, %v1518_v19 }
 0x218   : > { %2477 = vadd.xlane.f32.xlu2 %v2476_v52 }
 0x21a   : > { %v6503_v40 = vpop.f32.mrf.mxu2  ;;  %v6508_v11 = vpop.f32.mrf.mxu3 }
 0x21b   : > { %2019 = vst [vmem:[%s6365_s24 + $0xb0] sm:$0xff] %v6503_v40  ;;  %v6510_v62 = vpop.f32.mrf.mxu0  ;;  %v2376_v35 = vsel %vm2276_vm14, %v6503_v40, 0.0  ;;  %v6515_v28 = vpop.f32.mrf.mxu1  ;;  %v2377_v1 = vsel %vm2277_vm15, %v6508_v11, 0.0 }
 0x21c   : > { %2020 = vst [vmem:[%s6365_s24 + $0xb8] sm:$0xff] %v6508_v11  ;;  %v2480_v43 = vadd.f32 %v2479_v3, %v2376_v35  ;;  %v2378_v61 = vsel %vm2278_vm0, %v6510_v62, 0.0  ;;  %v2379_v63 = vsel %vm2279_vm1, %v6515_v28, 0.0  ;;  %v2208_v35 = vpop.permute.xlu1 %2207 }
 0x21d   : > { %2021 = vst [vmem:[%s6365_s24 + $0xc0] sm:$0xff] %v6510_v62  ;;  %1768 = vmatmul.bf16.gmra.mxu0 %v4601_v10  ;;  %v2484_v9 = vadd.f32 %v2379_v63, %v2378_v61  ;;  %vm2290_vm12 = vcmp.eq.s32.totalorder %v6358_v31, %v2208_v35  ;;  %vm2291_vm13 = vcmp.eq.s32.totalorder %v6363_v15, %v2208_v35 }
 0x21e   : > { %2022 = vst [vmem:[%s6365_s24 + $0xc8] sm:$0xff] %v6515_v28  ;;  %v2481_v60 = vadd.f32 %v2480_v43, %v2377_v1  ;;  %1841 = vmatmul.bf16.gmra.mxu1 %v4601_v10  ;;  %vm2292_vm14 = vcmp.eq.s32.totalorder %v6378_v5, %v2208_v35  ;;  %vm2293_vm15 = vcmp.eq.s32.totalorder %v6383_v6, %v2208_v35 }
 0x21f   : > { %1914 = vmatmul.bf16.gmra.mxu2 %v4601_v10  ;;  %1987 = vmatmul.bf16.gmra.mxu3 %v4601_v10 }
 0x220   : > { %2482 = vadd.xlane.f32.xlu0 %v2481_v60 }
 0x222   : > { %v6527_v49 = vpop.f32.mrf.mxu2  ;;  %v6532_v8 = vpop.f32.mrf.mxu3 }
 0x223   : > { %2023 = vst [vmem:[%s6365_s24 + $0xd0] sm:$0xff] %v6527_v49  ;;  %v6534_v2 = vpop.f32.mrf.mxu0  ;;  %v2380_v38 = vsel %vm2280_vm2, %v6527_v49, 0.0  ;;  %v6539_v50 = vpop.f32.mrf.mxu1  ;;  %v2381_v16 = vsel %vm2281_vm3, %v6532_v8, 0.0 }
 0x224   : > { %2024 = vst [vmem:[%s6365_s24 + $0xd8] sm:$0xff] %v6532_v8  ;;  %v2485_v47 = vadd.f32 %v2484_v9, %v2380_v38  ;;  %v2382_v20 = vsel %vm2282_vm4, %v6534_v2, 0.0  ;;  %v2383_v13 = vsel %vm2283_vm5, %v6539_v50, 0.0  ;;  %vm1336_vm4 = vcmask 7168  }
 0x225   : > { %2025 = vst [vmem:[%s6365_s24 + $0xe0] sm:$0xff] %v6534_v2  ;;  %v2489_v58 = vadd.f32 %v2383_v13, %v2382_v20 }
 0x226   : > { %2026 = vst [vmem:[%s6365_s24 + $0xe8] sm:$0xff] %v6539_v50  ;;  %v2486_v53 = vadd.f32 %v2485_v47, %v2381_v16  ;;  %v2211_v47 = vpop.permute.xlu2 %2210 }
 0x227   : > { %vm2294_vm0 = vcmp.eq.s32.totalorder %v6358_v31, %v2211_v47  ;;  %vm2295_vm1 = vcmp.eq.s32.totalorder %v6363_v15, %v2211_v47  ;;  %vm2296_vm2 = vcmp.eq.s32.totalorder %v6378_v5, %v2211_v47  ;;  %vm2297_vm3 = vcmp.eq.s32.totalorder %v6383_v6, %v2211_v47 }
 0x228   : > { %2487 = vadd.xlane.f32.xlu1 %v2486_v53  ;;  %v8357_v47 = vmov 0.0  }
 0x229   : > { %1387 = vst.msk [vmem:[#allocation5] sm:$0xff] %vm1336_vm4, %v8357_v47 }
 0x22a   : > { %v6551_v32 = vpop.f32.mrf.mxu2  ;;  %v6556_v4 = vpop.f32.mrf.mxu3  ;;  %1362 = vst.msk [vmem:[#allocation4] sm:$0xff] %vm1336_vm4, %v8357_v47 }
 0x22b   : > { %2027 = vst [vmem:[%s6365_s24 + $0xf0] sm:$0xff] %v6551_v32  ;;  %v6558_v27 = vpop.f32.mrf.mxu0  ;;  %v2384_v0 = vsel %vm2284_vm6, %v6551_v32, 0.0  ;;  %v6563_v56 = vpop.f32.mrf.mxu1  ;;  %v2385_v51 = vsel %vm2285_vm7, %v6556_v4, 0.0 }
 0x22c   : > { %2028 = vst [vmem:[%s6365_s24 + $0xf8] sm:$0xff] %v6556_v4  ;;  %v2490_v52 = vadd.f32 %v2489_v58, %v2384_v0  ;;  %v2386_v45 = vsel %vm2286_vm8, %v6558_v27, 0.0  ;;  %v2387_v3 = vsel %vm2287_vm9, %v6563_v56, 0.0 }
 0x22d   : > { %2029 = vst [vmem:[%s6365_s24 + $0x100] sm:$0xff] %v6558_v27  ;;  %1773 = vmatmul.bf16.gmra.mxu0 %v1531_v22  ;;  %v2494_v43 = vadd.f32 %v2387_v3, %v2386_v45  ;;  %v2214_v3 = vpop.permute.xlu0 %2213 }
 0x22e   : > { %2030 = vst [vmem:[%s6365_s24 + $0x108] sm:$0xff] %v6563_v56  ;;  %v2491_v30 = vadd.f32 %v2490_v52, %v2385_v51  ;;  %1846 = vmatmul.bf16.gmra.mxu1 %v1531_v22  ;;  %v6623_v45 = vpop.permute.xlu2 %2219  ;;  %vm2298_vm5 = vcmp.eq.s32.totalorder %v6358_v31, %v2214_v3  ;;  %vm2299_vm6 = vcmp.eq.s32.totalorder %v6363_v15, %v2214_v3 }
 0x22f   : > { %1919 = vmatmul.bf16.gmra.mxu2 %v1531_v22  ;;  %1992 = vmatmul.bf16.gmra.mxu3 %v1531_v22  ;;  %1363 = vst.msk [vmem:[#allocation4 + $0x8] sm:$0xff] %vm1336_vm4, %v8357_v47  ;;  %vm2300_vm7 = vcmp.eq.s32.totalorder %v6378_v5, %v2214_v3  ;;  %vm2301_vm8 = vcmp.eq.s32.totalorder %v6383_v6, %v2214_v3 }
 0x230   : > { %2492 = vadd.xlane.f32.xlu2 %v2491_v30  ;;  %1364 = vst.msk [vmem:[#allocation4 + $0x10] sm:$0xff] %vm1336_vm4, %v8357_v47 }
 0x232   : > { %v6575_v10 = vpop.f32.mrf.mxu2  ;;  %v6580_v1 = vpop.f32.mrf.mxu3 }
 0x233   : > { %2031 = vst [vmem:[%s6365_s24 + $0x110] sm:$0xff] %v6575_v10  ;;  %v6582_v60 = vpop.f32.mrf.mxu0  ;;  %v2388_v61 = vsel %vm2288_vm10, %v6575_v10, 0.0  ;;  %v6587_v63 = vpop.f32.mrf.mxu1  ;;  %v2389_v9 = vsel %vm2289_vm11, %v6580_v1, 0.0 }
 0x234   : > { %8481 = vst [vmem:[#allocation20_spill] sm:$0xff] %v6582_v60  ;;  %v2495_v39 = vadd.f32 %v2494_v43, %v2388_v61  ;;  %v2390_v16 = vsel %vm2290_vm12, %v6582_v60, 0.0  ;;  %v2391_v48 = vsel %vm2291_vm13, %v6587_v63, 0.0  ;;  %vm2306_vm13 = vcmp.eq.s32.totalorder %v6358_v31, %v6623_v45 }
 0x235   : > { %2032 = vst [vmem:[%s6365_s24 + $0x118] sm:$0xff] %v6580_v1  ;;  %v2499_v20 = vadd.f32 %v2391_v48, %v2390_v16 }
 0x236   : > { %8482 = vst [vmem:[#allocation24_spill] sm:$0xff] %v6587_v63  ;;  %v2496_v38 = vadd.f32 %v2495_v39, %v2389_v9 }
 0x237   : > { %2033 = vst [vmem:[%s6365_s24 + $0x120] sm:$0xff] %v6582_v60 }
 0x238   : > { %2034 = vst [vmem:[%s6365_s24 + $0x128] sm:$0xff] %v6587_v63  ;;  %2497 = vadd.xlane.f32.xlu0 %v2496_v38 }
 0x23a   : > { %v6599_v53 = vpop.f32.mrf.mxu2  ;;  %v6604_v13 = vpop.f32.mrf.mxu3 }
 0x23b   : > { %8483 = vst [vmem:[#allocation29_spill] sm:$0xff] %v6599_v53  ;;  %v6606_v19 = vpop.f32.mrf.mxu0  ;;  %v2392_v14 = vsel %vm2292_vm14, %v6599_v53, 0.0  ;;  %v6611_v58 = vpop.f32.mrf.mxu1  ;;  %v2393_v22 = vsel %vm2293_vm15, %v6604_v13, 0.0  ;;  %vm2307_vm14 = vcmp.eq.s32.totalorder %v6363_v15, %v6623_v45  ;;  %vm2308_vm15 = vcmp.eq.s32.totalorder %v6378_v5, %v6623_v45 }
 0x23c   : > { %2035 = vst [vmem:[%s6365_s24 + $0x130] sm:$0xff] %v6599_v53  ;;  %v2500_v0 = vadd.f32 %v2499_v20, %v2392_v14  ;;  %v2394_v51 = vsel %vm2294_vm0, %v6606_v19, 0.0  ;;  %v2395_v30 = vsel %vm2295_vm1, %v6611_v58, 0.0  ;;  %vm2309_vm0 = vcmp.eq.s32.totalorder %v6383_v6, %v6623_v45 }
 0x23d   : > { %8484 = vst [vmem:[#allocation35_spill] sm:$0xff] %v6604_v13  ;;  %v2504_v43 = vadd.f32 %v2395_v30, %v2394_v51 }
 0x23e   : > { %2036 = vst [vmem:[%s6365_s24 + $0x138] sm:$0xff] %v6604_v13  ;;  %v2501_v52 = vadd.f32 %v2500_v0, %v2393_v22  ;;  %v2217_v22 = vpop.permute.xlu1 %2216 }
 0x23f   : > { %2037 = vst [vmem:[%s6365_s24 + $0x140] sm:$0xff] %v6606_v19  ;;  %vm2302_vm9 = vcmp.eq.s32.totalorder %v6358_v31, %v2217_v22  ;;  %vm2303_vm10 = vcmp.eq.s32.totalorder %v6363_v15, %v2217_v22  ;;  %vm2304_vm11 = vcmp.eq.s32.totalorder %v6378_v5, %v2217_v22  ;;  %vm2305_vm12 = vcmp.eq.s32.totalorder %v6383_v6, %v2217_v22 }
 0x240   : > { %2038 = vst [vmem:[%s6365_s24 + $0x148] sm:$0xff] %v6611_v58  ;;  %2502 = vadd.xlane.f32.xlu1 %v2501_v52 }
 0x242   : > { %v6625_v35 = vpop.f32.mrf.mxu2  ;;  %v6630_v61 = vpop.f32.mrf.mxu3 }
 0x243   : > { %2039 = vst [vmem:[%s6365_s24 + $0x150] sm:$0xff] %v6625_v35  ;;  %v6632_v39 = vpop.f32.mrf.mxu0  ;;  %v2396_v9 = vsel %vm2296_vm2, %v6625_v35, 0.0  ;;  %v6637_v38 = vpop.f32.mrf.mxu1  ;;  %v2397_v48 = vsel %vm2297_vm3, %v6630_v61, 0.0 }
 0x244   : > { %8485 = vst [vmem:[#allocation30_spill] sm:$0xff] %v6630_v61  ;;  %v2505_v16 = vadd.f32 %v2504_v43, %v2396_v9  ;;  %v2398_v14 = vsel %vm2298_vm5, %v6632_v39, 0.0  ;;  %v2399_v0 = vsel %vm2299_vm6, %v6637_v38, 0.0 }
 0x245   : > { %2040 = vst [vmem:[%s6365_s24 + $0x158] sm:$0xff] %v6630_v61  ;;  %v2509_v51 = vadd.f32 %v2399_v0, %v2398_v14 }
 0x246   : > { %2041 = vst [vmem:[%s6365_s24 + $0x160] sm:$0xff] %v6632_v39  ;;  %v2506_v20 = vadd.f32 %v2505_v16, %v2397_v48 }
 0x247   : > { %2042 = vst [vmem:[%s6365_s24 + $0x168] sm:$0xff] %v6637_v38 }
 0x248   : > { %2507 = vadd.xlane.f32.xlu2 %v2506_v20  ;;  %v6672_v20 = vpop.permute.xlu2 %2228 }
 0x24a   : > { %v6655_v52 = vpop.f32.mrf.mxu2  ;;  %v6662_v30 = vpop.f32.mrf.mxu3 }
 0x24b   : > { %2043 = vst [vmem:[%s6365_s24 + $0x170] sm:$0xff] %v6655_v52  ;;  %v6664_v43 = vpop.f32.mrf.mxu0  ;;  %v2400_v9 = vsel %vm2300_vm7, %v6655_v52, 0.0  ;;  %v6669_v16 = vpop.f32.mrf.mxu1  ;;  %v2401_v14 = vsel %vm2301_vm8, %v6662_v30, 0.0 }
 0x24c   : > { %8486 = vst [vmem:[#allocation13_spill] sm:$0xff] %v6662_v30  ;;  %v2510_v48 = vadd.f32 %v2509_v51, %v2400_v9  ;;  %v2402_v47 = vsel %vm2302_vm9, %v6664_v43, 0.0  ;;  %v2403_v3 = vsel %vm2303_vm10, %v6669_v16, 0.0  ;;  %v8489_v51 = vmov 0.0  }
 0x24d   : > { %8487 = vst [vmem:[#allocation14_spill] sm:$0xff] %v6664_v43  ;;  %vm2318_vm10 = vcmp.eq.s32.totalorder %v6358_v31, %v6672_v20 }
 0x24e   : > { %2044 = vst [vmem:[%s6365_s24 + $0x178] sm:$0xff] %v6662_v30  ;;  %v2511_v0 = vadd.f32 %v2510_v48, %v2401_v14  ;;  %v2514_v48 = vadd.f32 %v2403_v3, %v2402_v47 }
 0x24f   : > { %8488 = vst [vmem:[#allocation21_spill] sm:$0xff] %v6669_v16 }
 0x250   : > { %2045 = vst [vmem:[%s6365_s24 + $0x180] sm:$0xff] %v6664_v43  ;;  %2512 = vadd.xlane.f32.xlu0 %v2511_v0 }
 0x251   : > { %2046 = vst [vmem:[%s6365_s24 + $0x188] sm:$0xff] %v6669_v16 }
 0x252   : > { %1365 = vst.msk [vmem:[#allocation4 + $0x18] sm:$0xff] %vm1336_vm4, %v8489_v51  ;;  %v6689_v9 = vpop.f32.mrf.mxu2  ;;  %v6696_v14 = vpop.f32.mrf.mxu3 }
 0x253   : > { %1366 = vst.msk [vmem:[#allocation4 + $0x20] sm:$0xff] %vm1336_vm4, %v8489_v51  ;;  %v6698_v0 = vpop.f32.mrf.mxu0  ;;  %v2404_v43 = vsel %vm2304_vm11, %v6689_v9, 0.0  ;;  %v6703_v16 = vpop.f32.mrf.mxu1  ;;  %v2405_v47 = vsel %vm2305_vm12, %v6696_v14, 0.0  ;;  %vm2319_vm11 = vcmp.eq.s32.totalorder %v6363_v15, %v6672_v20  ;;  %vm2635_vm12 = vcmp.lt.s32.totalorder %v6383_v6, 500 }
 0x254   : > { %1367 = vst.msk [vmem:[#allocation4 + $0x28] sm:$0xff] %vm1336_vm4, %v8489_v51  ;;  %v2515_v13 = vadd.f32 %v2514_v48, %v2404_v43  ;;  %v2406_v22 = vsel %vm2306_vm13, %v6698_v0, 0.0  ;;  %v2407_v43 = vsel %vm2307_vm14, %v6703_v16, 0.0  ;;  %v2223_v48 = vpop.permute.xlu0 %2222  ;;  %vm2320_vm13 = vcmp.eq.s32.totalorder %v6378_v5, %v6672_v20 }
 0x255   : > { %8490 = vst [vmem:[#allocation25_spill] sm:$0xff] %v6689_v9  ;;  %vm2310_vm1 = vcmp.eq.s32.totalorder %v6358_v31, %v2223_v48  ;;  %vm2311_vm2 = vcmp.eq.s32.totalorder %v6363_v15, %v2223_v48  ;;  %vm2312_vm3 = vcmp.eq.s32.totalorder %v6378_v5, %v2223_v48  ;;  %vm2313_vm5 = vcmp.eq.s32.totalorder %v6383_v6, %v2223_v48  ;;  %v2154_v48 = vld [vmem:[#allocation5] sm:$0xff] }
 0x256   : > { %1368 = vst.msk [vmem:[#allocation4 + $0x30] sm:$0xff] %vm1336_vm4, %v8489_v51  ;;  %v2516_v3 = vadd.f32 %v2515_v13, %v2405_v47  ;;  %v2519_v47 = vadd.f32 %v2407_v43, %v2406_v22  ;;  %vm2321_vm14 = vcmp.eq.s32.totalorder %v6383_v6, %v6672_v20 }
 0x257   : > { %2047 = vst [vmem:[%s6365_s24 + $0x190] sm:$0xff] %v6689_v9  ;;  %v6715_v9 = vpop.permute.xlu2 %2237 }
 0x258   : > { %8491 = vst [vmem:[#allocation31_spill] sm:$0xff] %v6696_v14  ;;  %2517 = vadd.xlane.f32.xlu1 %v2516_v3 }
 0x259   : > { %8492 = vst [vmem:[#allocation15_spill] sm:$0xff] %v6698_v0 }
 0x25a   : > { %2048 = vst [vmem:[%s6365_s24 + $0x198] sm:$0xff] %v6696_v14  ;;  %v6725_v13 = vpop.f32.mrf.mxu2  ;;  %v6733_v3 = vpop.f32.mrf.mxu3 }
 0x25b   : > { %8493 = vst [vmem:[#allocation16_spill] sm:$0xff] %v6703_v16  ;;  %v6735_v14 = vpop.f32.mrf.mxu0  ;;  %v2409_v22 = vsel %vm2309_vm0, %v6733_v3, 0.0 }
 0x25c   : > { %2049 = vst [vmem:[%s6365_s24 + $0x1a0] sm:$0xff] %v6698_v0  ;;  %v2408_v0 = vsel %vm2308_vm15, %v6725_v13, 0.0  ;;  %v6810_v61 = vpop.permute.xlu0 %2231 }
 0x25d   : > { %2050 = vst [vmem:[%s6365_s24 + $0x1a8] sm:$0xff] %v6703_v16  ;;  %v6740_v16 = vpop.f32.mrf.mxu1  ;;  %v2520_v53 = vadd.f32 %v2519_v47, %v2408_v0  ;;  %v2226_v0 = vpop.permute.xlu1 %2225  ;;  %vm2322_vm15 = vcmp.eq.s32.totalorder %v6358_v31, %v6810_v61  ;;  %vm2323_vm0 = vcmp.eq.s32.totalorder %v6363_v15, %v6810_v61 }
 0x25e   : > { %1369 = vst.msk [vmem:[#allocation4 + $0x38] sm:$0xff] %vm1336_vm4, %v8489_v51  ;;  %v2411_v60 = vsel %vm2311_vm2, %v6740_v16, 0.0  ;;  %vm2314_vm6 = vcmp.eq.s32.totalorder %v6358_v31, %v2226_v0  ;;  %vm2315_vm7 = vcmp.eq.s32.totalorder %v6363_v15, %v2226_v0  ;;  %vm2316_vm8 = vcmp.eq.s32.totalorder %v6378_v5, %v2226_v0 }
 0x25f   : > { %1370 = vst.msk [vmem:[#allocation4 + $0x40] sm:$0xff] %vm1336_vm4, %v8489_v51  ;;  %v2521_v43 = vadd.f32 %v2520_v53, %v2409_v22  ;;  %v6757_v45 = vpop.permute.xlu2 %2246  ;;  %vm2317_vm9 = vcmp.eq.s32.totalorder %v6383_v6, %v2226_v0  ;;  %vm2325_vm2 = vcmp.eq.s32.totalorder %v6383_v6, %v6810_v61 }
 0x260   : > { %1371 = vst.msk [vmem:[#allocation4 + $0x48] sm:$0xff] %vm1336_vm4, %v8489_v51 }
 0x261   : > { %8494 = vst [vmem:[#allocation22_spill] sm:$0xff] %v6725_v13  ;;  %2522 = vadd.xlane.f32.xlu2 %v2521_v43 }
 0x262   : > { %1372 = vst.msk [vmem:[#allocation4 + $0x50] sm:$0xff] %vm1336_vm4, %v8489_v51  ;;  %v6761_v53 = vpop.f32.mrf.mxu2  ;;  %v6768_v22 = vpop.f32.mrf.mxu3 }
 0x263   : > { %2051 = vst [vmem:[%s6365_s24 + $0x1b0] sm:$0xff] %v6725_v13  ;;  %v2410_v13 = vsel %vm2310_vm1, %v6735_v14, 0.0  ;;  %v6770_v43 = vpop.f32.mrf.mxu0  ;;  %vm2324_vm1 = vcmp.eq.s32.totalorder %v6378_v5, %v6810_v61 }
 0x264   : > { %8495 = vst [vmem:[#allocation26_spill] sm:$0xff] %v6733_v3  ;;  %v2524_v47 = vadd.f32 %v2411_v60, %v2410_v13  ;;  %v2413_v60 = vsel %vm2313_vm5, %v6768_v22, 0.0 }
 0x265   : > { %8496 = vst [vmem:[#allocation32_spill] sm:$0xff] %v6735_v14  ;;  %v6775_v63 = vpop.f32.mrf.mxu1 }
 0x266   : > { %2052 = vst [vmem:[%s6365_s24 + $0x1b8] sm:$0xff] %v6733_v3  ;;  %v2412_v3 = vsel %vm2312_vm3, %v6761_v53, 0.0 }
 0x267   : > { %8497 = vst [vmem:[#allocation17_spill] sm:$0xff] %v6740_v16 }
 0x268   : > { %2053 = vst [vmem:[%s6365_s24 + $0x1c0] sm:$0xff] %v6735_v14  ;;  %v2525_v14 = vadd.f32 %v2524_v47, %v2412_v3 }
 0x269   : > { %2054 = vst [vmem:[%s6365_s24 + $0x1c8] sm:$0xff] %v6740_v16  ;;  %v2415_v16 = vsel %vm2315_vm7, %v6775_v63, 0.0 }
 0x26a   : > { %1373 = vst.msk [vmem:[#allocation4 + $0x58] sm:$0xff] %vm1336_vm4, %v8489_v51  ;;  %v2526_v13 = vadd.f32 %v2525_v14, %v2413_v60  ;;  %v6793_v3 = vpop.f32.mrf.mxu2  ;;  %v6800_v47 = vpop.f32.mrf.mxu3 }
 0x26b   : > { %1374 = vst.msk [vmem:[#allocation4 + $0x60] sm:$0xff] %vm1336_vm4, %v8489_v51  ;;  %v2458_v60 = vpop.xlane.xlu2 %2457 }
 0x26c   : > { %1375 = vst.msk [vmem:[#allocation4 + $0x68] sm:$0xff] %vm1336_vm4, %v8489_v51  ;;  %2527 = vadd.xlane.f32.xlu0 %v2526_v13  ;;  %v2416_v13 = vsel %vm2316_vm8, %v6793_v3, 0.0  ;;  %vm2330_vm8 = vcmp.eq.s32.totalorder %v6358_v31, %v6715_v9 }
 0x26d   : > { %8498 = vst [vmem:[#allocation18_spill] sm:$0xff] %v6761_v53 }
 0x26e   : > { %1376 = vst.msk [vmem:[#allocation4 + $0x70] sm:$0xff] %vm1336_vm4, %v8489_v51 }
 0x26f   : > { %2055 = vst [vmem:[%s6365_s24 + $0x1d0] sm:$0xff] %v6761_v53  ;;  %v2414_v53 = vsel %vm2314_vm6, %v6770_v43, 0.0 }
 0x270   : > { %8499 = vst [vmem:[#allocation23_spill] sm:$0xff] %v6768_v22  ;;  %v2529_v14 = vadd.f32 %v2415_v16, %v2414_v53  ;;  %v2417_v16 = vsel %vm2317_vm9, %v6800_v47, 0.0  ;;  %vm2331_vm9 = vcmp.eq.s32.totalorder %v6363_v15, %v6715_v9 }
 0x271   : > { %8500 = vst [vmem:[#allocation27_spill] sm:$0xff] %v6770_v43 }
 0x272   : > { %2056 = vst [vmem:[%s6365_s24 + $0x1d8] sm:$0xff] %v6768_v22  ;;  %v6807_v22 = vpop.f32.mrf.mxu1  ;;  %v2530_v30 = vadd.f32 %v2529_v14, %v2416_v13  ;;  %v2771_v14 = vmax.f32 %v6414_v7, %v6419_v12  ;;  %v6842_v7 = vpop.f32.mrf.mxu3  ;;  %v6847_v12 = vsel %vm2635_vm12, %v6436_v33, -inf }
 0x273   : > { %8501 = vst [vmem:[#allocation33_spill] sm:$0xff] %v6775_v63 }
 0x274   : > { %2057 = vst [vmem:[%s6365_s24 + $0x1e0] sm:$0xff] %v6770_v43  ;;  %v2579_v43 = vadd.f32 %v2458_v60, %v2154_v48  ;;  %v2531_v53 = vadd.f32 %v2530_v30, %v2417_v16  ;;  %v2419_v48 = vsel %vm2319_vm11, %v6807_v22, 0.0  ;;  %v6828_v60 = vpop.permute.xlu1 %2234  ;;  %v6835_v30 = vpop.f32.mrf.mxu2  ;;  %vm2333_vm11 = vcmp.eq.s32.totalorder %v6383_v6, %v6715_v9 }
 0x275   : > { %2058 = vst [vmem:[%s6365_s24 + $0x1e8] sm:$0xff] %v6775_v63  ;;  %v6805_v63 = vpop.f32.mrf.mxu0  ;;  %v2420_v16 = vsel %vm2320_vm13, %v6835_v30, 0.0  ;;  %vm2326_vm3 = vcmp.eq.s32.totalorder %v6358_v31, %v6828_v60  ;;  %vm2327_vm5 = vcmp.eq.s32.totalorder %v6363_v15, %v6828_v60  ;;  %vm2328_vm6 = vcmp.eq.s32.totalorder %v6378_v5, %v6828_v60 }
 0x276   : > { %1377 = vst.msk [vmem:[#allocation4 + $0x78] sm:$0xff] %vm1336_vm4, %v8489_v51  ;;  %v2418_v0 = vsel %vm2318_vm10, %v6805_v63, 0.0  ;;  %2532 = vadd.xlane.f32.xlu1 %v2531_v53  ;;  %vm2329_vm7 = vcmp.eq.s32.totalorder %v6383_v6, %v6828_v60  ;;  %vm2332_vm10 = vcmp.eq.s32.totalorder %v6378_v5, %v6715_v9 }
 0x277   : > { %1378 = vst.msk [vmem:[#allocation4 + $0x80] sm:$0xff] %vm1336_vm4, %v8489_v51  ;;  %v2534_v13 = vadd.f32 %v2419_v48, %v2418_v0  ;;  %v2421_v48 = vsel %vm2321_vm14, %v6842_v7, 0.0 }
 0x278   : > { %1379 = vst.msk [vmem:[#allocation4 + $0x88] sm:$0xff] %vm1336_vm4, %v8489_v51 }
 0x279   : > { %8502 = vst [vmem:[#allocation19_spill] sm:$0xff] %v6793_v3  ;;  %v2535_v0 = vadd.f32 %v2534_v13, %v2420_v16  ;;  %v2761_v16 = vmax.f32 %v6360_v44, %v6369_v54  ;;  %v6896_v54 = vsel %vm2635_vm12, %v6388_v36, -inf }
 0x27a   : > { %1380 = vst.msk [vmem:[#allocation4 + $0x90] sm:$0xff] %vm1336_vm4, %v8489_v51  ;;  %v6854_v53 = vpop.f32.mrf.mxu1  ;;  %v6891_v44 = vpop.f32.mrf.mxu3 }
 0x27b   : > { %2059 = vst [vmem:[%s6365_s24 + $0x1f0] sm:$0xff] %v6793_v3  ;;  %v2423_v13 = vsel %vm2323_vm0, %v6854_v53, 0.0 }
 0x27c   : > { %8503 = vst [vmem:[#allocation28_spill] sm:$0xff] %v6800_v47 }
 0x27d   : > { %2060 = vst [vmem:[%s6365_s24 + $0x1f8] sm:$0xff] %v6800_v47  ;;  %v6868_v47 = vpop.permute.xlu0 %2240 }
 0x27e   : > { %1381 = vst.msk [vmem:[#allocation4 + $0x98] sm:$0xff] %vm1336_vm4, %v8489_v51  ;;  %vm2334_vm13 = vcmp.eq.s32.totalorder %v6358_v31, %v6868_v47  ;;  %vm2335_vm14 = vcmp.eq.s32.totalorder %v6363_v15, %v6868_v47  ;;  %vm2337_vm0 = vcmp.eq.s32.totalorder %v6383_v6, %v6868_v47 }
 0x27f   : > { %2605 = vst.msk [vmem:[#allocation5] sm:$0xff] %vm1336_vm4, %v2579_v43  ;;  %v2772_v43 = vmax.f32 %v2771_v14, %v6431_v37  ;;  %v6852_v37 = vpop.f32.mrf.mxu0  ;;  %v2536_v14 = vadd.f32 %v2535_v0, %v2421_v48  ;;  %v2762_v0 = vmax.f32 %v2761_v16, %v6380_v25 }
 0x280   : > { %1382 = vst.msk [vmem:[#allocation4 + $0xa0] sm:$0xff] %vm1336_vm4, %v8489_v51  ;;  %v2422_v20 = vsel %vm2322_vm15, %v6852_v37, 0.0  ;;  %vm2336_vm15 = vcmp.eq.s32.totalorder %v6378_v5, %v6868_v47 }
 0x281   : > { %1383 = vst.msk [vmem:[#allocation4 + $0xa8] sm:$0xff] %vm1336_vm4, %v8489_v51  ;;  %v2773_v33 = vmax.f32 %v2772_v43, %v6847_v12  ;;  %2537 = vadd.xlane.f32.xlu2 %v2536_v14  ;;  %v6882_v43 = vpop.f32.mrf.mxu2  ;;  %v2539_v48 = vadd.f32 %v2423_v13, %v2422_v20  ;;  %v2425_v13 = vsel %vm2325_vm2, %v6891_v44, 0.0  ;;  %v2763_v36 = vmax.f32 %v2762_v0, %v6896_v54 }
 0x282   : > { %1384 = vst.msk [vmem:[#allocation4 + $0xb0] sm:$0xff] %vm1336_vm4, %v8489_v51  ;;  %v6903_v14 = vpop.f32.mrf.mxu1 }
 0x283   : > { %1385 = vst.msk [vmem:[#allocation4 + $0xb8] sm:$0xff] %vm1336_vm4, %v8489_v51  ;;  %2774 = vmax.xlane.f32.xlu1 %v2773_v33  ;;  %v2424_v33 = vsel %vm2324_vm1, %v6882_v43, 0.0 }
 0x284   : > { %1386 = vst.msk [vmem:[#allocation4 + $0xc0] sm:$0xff] %vm1336_vm4, %v8489_v51  ;;  %v2540_v20 = vadd.f32 %v2539_v48, %v2424_v33  ;;  %v2427_v48 = vsel %vm2327_vm5, %v6903_v14, 0.0  ;;  %v2766_v33 = vmax.f32 %v6390_v34, %v6395_v21  ;;  %v6938_v34 = vpop.f32.mrf.mxu3  ;;  %v6943_v21 = vsel %vm2635_vm12, %v6412_v23, -inf }
 0x285   : > { %8504 = vst [vmem:[#allocation34_spill] sm:$0xff] %v6847_v12  ;;  %v6887_v12 = vpop.permute.xlu1 %2243  ;;  %v6925_v3 = vpop.permute.xlu0 %2249 }
 0x286   : > { %1388 = vst.msk [vmem:[#allocation5 + $0x8] sm:$0xff] %vm1336_vm4, %v8489_v51  ;;  %v2541_v16 = vadd.f32 %v2540_v20, %v2425_v13  ;;  %v2767_v20 = vmax.f32 %v2766_v33, %v6407_v29  ;;  %vm2338_vm1 = vcmp.eq.s32.totalorder %v6358_v31, %v6887_v12  ;;  %vm2339_vm2 = vcmp.eq.s32.totalorder %v6363_v15, %v6887_v12 }
 0x287   : > { %1389 = vst.msk [vmem:[#allocation5 + $0x10] sm:$0xff] %vm1336_vm4, %v8489_v51  ;;  %v6901_v25 = vpop.f32.mrf.mxu0  ;;  %vm2341_vm5 = vcmp.eq.s32.totalorder %v6383_v6, %v6887_v12 }
 0x288   : > { %1390 = vst.msk [vmem:[#allocation5 + $0x18] sm:$0xff] %vm1336_vm4, %v8489_v51  ;;  %v2426_v61 = vsel %vm2326_vm3, %v6901_v25, 0.0  ;;  %2542 = vadd.xlane.f32.xlu0 %v2541_v16  ;;  %v2768_v33 = vmax.f32 %v2767_v20, %v6943_v21  ;;  %vm2340_vm3 = vcmp.eq.s32.totalorder %v6378_v5, %v6887_v12 }
 0x289   : > { %1391 = vst.msk [vmem:[#allocation5 + $0x20] sm:$0xff] %vm1336_vm4, %v8489_v51  ;;  %2764 = vmax.xlane.f32.xlu2 %v2763_v36  ;;  %v6931_v0 = vpop.f32.mrf.mxu2  ;;  %v2544_v13 = vadd.f32 %v2427_v48, %v2426_v61  ;;  %v2429_v48 = vsel %vm2329_vm7, %v6938_v34, 0.0  ;;  %vm2343_vm7 = vcmp.eq.s32.totalorder %v6363_v15, %v6757_v45 }
 0x28a   : > { %1392 = vst.msk [vmem:[#allocation5 + $0x28] sm:$0xff] %vm1336_vm4, %v8489_v51  ;;  %v2428_v36 = vsel %vm2328_vm6, %v6931_v0, 0.0  ;;  %v6950_v16 = vpop.f32.mrf.mxu1  ;;  %vm2342_vm6 = vcmp.eq.s32.totalorder %v6358_v31, %v6757_v45 }
 0x28b   : > { %1393 = vst.msk [vmem:[#allocation5 + $0x30] sm:$0xff] %vm1336_vm4, %v8489_v51  ;;  %v2545_v61 = vadd.f32 %v2544_v13, %v2428_v36  ;;  %v2431_v36 = vsel %vm2331_vm9, %v6950_v16, 0.0  ;;  %vm2345_vm9 = vcmp.eq.s32.totalorder %v6383_v6, %v6757_v45 }
 0x28c   : > { %1394 = vst.msk [vmem:[#allocation5 + $0x38] sm:$0xff] %vm1336_vm4, %v8489_v51 }
 0x28d   : > { %1395 = vst.msk [vmem:[#allocation5 + $0x40] sm:$0xff] %vm1336_vm4, %v8489_v51  ;;  %v6961_v23 = vpop.permute.xlu1 %2252  ;;  %v2546_v60 = vadd.f32 %v2545_v61, %v2429_v48  ;;  %v2155_v20 = vld [vmem:[#allocation5 + $0x8] sm:$0xff]  ;;  %v2463_v61 = vpop.xlane.xlu0 %2462 }
 0x28e   : > { %8505 = vst [vmem:[#allocation36_spill] sm:$0xff] %v6896_v54  ;;  %v2781_v54 = vmax.f32 %v6462_v41, %v6467_v42 }
 0x28f   : > { %1396 = vst.msk [vmem:[#allocation5 + $0x48] sm:$0xff] %vm1336_vm4, %v8489_v51  ;;  %v6948_v29 = vpop.f32.mrf.mxu0  ;;  %2547 = vadd.xlane.f32.xlu1 %v2546_v60 }
 0x290   : > { %1397 = vst.msk [vmem:[#allocation5 + $0x50] sm:$0xff] %vm1336_vm4, %v8489_v51  ;;  %v2430_v13 = vsel %vm2330_vm8, %v6948_v29, 0.0  ;;  %2769 = vmax.xlane.f32.xlu0 %v2768_v33  ;;  %v2782_v48 = vmax.f32 %v2781_v54, %v6479_v46  ;;  %v6994_v33 = vsel %vm2635_vm12, %v6508_v11, -inf  ;;  %vm2344_vm8 = vcmp.eq.s32.totalorder %v6378_v5, %v6757_v45 }
 0x291   : > { %1398 = vst.msk [vmem:[#allocation5 + $0x58] sm:$0xff] %vm1336_vm4, %v8489_v51  ;;  %v2549_v42 = vadd.f32 %v2431_v36, %v2430_v13  ;;  %v2156_v13 = vld [vmem:[#allocation5 + $0x10] sm:$0xff]  ;;  %v2473_v36 = vpop.xlane.xlu2 %2472 }
 0x292   : > { %1399 = vst.msk [vmem:[#allocation5 + $0x60] sm:$0xff] %vm1336_vm4, %v8489_v51  ;;  %v7007_v54 = vpop.f32.mrf.mxu1 }
 0x293   : > { %1400 = vst.msk [vmem:[#allocation5 + $0x68] sm:$0xff] %vm1336_vm4, %v8489_v51 }
 0x294   : > { %8506 = vst [vmem:[#allocation37_spill] sm:$0xff] %v6925_v3  ;;  %v2786_v3 = vmax.f32 %v6486_v59, %v6491_v55  ;;  %v6984_v59 = vpop.f32.mrf.mxu2  ;;  %v6989_v55 = vsel %vm2635_vm12, %v6484_v17, -inf }
 0x295   : > { %1401 = vst.msk [vmem:[#allocation5 + $0x70] sm:$0xff] %vm1336_vm4, %v8489_v51  ;;  %v2432_v46 = vsel %vm2332_vm10, %v6984_v59, 0.0  ;;  %v2468_v9 = vpop.xlane.xlu1 %2467 }
 0x296   : > { %1402 = vst.msk [vmem:[#allocation5 + $0x78] sm:$0xff] %vm1336_vm4, %v8489_v51  ;;  %v2787_v41 = vmax.f32 %v2786_v3, %v6503_v40  ;;  %v6999_v40 = vpop.f32.mrf.mxu3  ;;  %v2580_v3 = vadd.f32 %v2463_v61, %v2155_v20  ;;  %v2550_v11 = vadd.f32 %v2549_v42, %v2432_v46  ;;  %v2783_v20 = vmax.f32 %v2782_v48, %v6989_v55 }
 0x297   : > { %1403 = vst.msk [vmem:[#allocation5 + $0x80] sm:$0xff] %vm1336_vm4, %v8489_v51  ;;  %v7005_v17 = vpop.f32.mrf.mxu0  ;;  %v2433_v60 = vsel %vm2333_vm11, %v6999_v40, 0.0  ;;  %v2776_v48 = vmax.f32 %v6438_v18, %v6443_v24  ;;  %v7042_v18 = vsel %vm2635_vm12, %v6580_v1, -inf  ;;  %v2157_v24 = vld [vmem:[#allocation5 + $0x18] sm:$0xff] }
 0x298   : > { %8507 = vst [vmem:[#allocation38_spill] sm:$0xff] %v6943_v21  ;;  %v2788_v61 = vmax.f32 %v2787_v41, %v6994_v33  ;;  %v2551_v42 = vadd.f32 %v2550_v11, %v2433_v60  ;;  %v2434_v46 = vsel %vm2334_vm13, %v7005_v17, 0.0  ;;  %v2801_v21 = vmax.f32 %v6558_v27, %v6563_v56  ;;  %2784 = vmax.xlane.f32.xlu0 %v2783_v20 }
 0x299   : > { %1404 = vst.msk [vmem:[#allocation5 + $0x88] sm:$0xff] %vm1336_vm4, %v8489_v51  ;;  %v2581_v41 = vadd.f32 %v2468_v9, %v2156_v13 }
 0x29a   : > { %1405 = vst.msk [vmem:[#allocation5 + $0x90] sm:$0xff] %vm1336_vm4, %v8489_v51  ;;  %2789 = vmax.xlane.f32.xlu1 %v2788_v61  ;;  %2552 = vadd.xlane.f32.xlu2 %v2551_v42  ;;  %v2802_v11 = vmax.f32 %v2801_v21, %v6575_v10  ;;  %v7060_v1 = vpop.f32.mrf.mxu1 }
 0x29b   : > { %1406 = vst.msk [vmem:[#allocation5 + $0x98] sm:$0xff] %vm1336_vm4, %v8489_v51  ;;  %v2439_v61 = vsel %vm2339_vm2, %v7060_v1, 0.0  ;;  %vm2353_vm2 = vcmp.eq.s32.totalorder %v6383_v6, %v6961_v23 }
 0x29c   : > { %1407 = vst.msk [vmem:[#allocation5 + $0xa0] sm:$0xff] %vm1336_vm4, %v8489_v51  ;;  %v7036_v56 = vpop.f32.mrf.mxu2  ;;  %v2803_v47 = vmax.f32 %v2802_v11, %v7042_v18 }
 0x29d   : > { %1408 = vst.msk [vmem:[#allocation5 + $0xa8] sm:$0xff] %vm1336_vm4, %v8489_v51  ;;  %v2436_v60 = vsel %vm2336_vm15, %v7036_v56, 0.0  ;;  %vm2350_vm15 = vcmp.eq.s32.totalorder %v6358_v31, %v6961_v23 }
 0x29e   : > { %1409 = vst.msk [vmem:[#allocation5 + $0xb0] sm:$0xff] %vm1336_vm4, %v8489_v51  ;;  %v7047_v10 = vpop.f32.mrf.mxu3 }
 0x29f   : > { %1410 = vst.msk [vmem:[#allocation5 + $0xb8] sm:$0xff] %vm1336_vm4, %v8489_v51  ;;  %v2437_v13 = vsel %vm2337_vm0, %v7047_v10, 0.0  ;;  %vm2351_vm0 = vcmp.eq.s32.totalorder %v6363_v15, %v6961_v23 }
 0x2a0   : > { %1411 = vst.msk [vmem:[#allocation5 + $0xc0] sm:$0xff] %vm1336_vm4, %v8489_v51  ;;  %v2435_v51 = vsel %vm2335_vm14, %v7007_v54, 0.0 }
 0x2a1   : > { %2061 = vst [vmem:[%s6365_s24 + $0x200] sm:$0xff] %v6805_v63  ;;  %v2554_v27 = vadd.f32 %v2435_v51, %v2434_v46  ;;  %v7052_v51 = vsel %vm2635_vm12, %v6460_v26, -inf  ;;  %v2582_v26 = vadd.f32 %v2473_v36, %v2157_v24  ;;  %v2796_v46 = vmax.f32 %v6534_v2, %v6539_v50 }
 0x2a2   : > { %2062 = vst [vmem:[%s6365_s24 + $0x208] sm:$0xff] %v6807_v22  ;;  %2804 = vmax.xlane.f32.xlu1 %v2803_v47  ;;  %v2791_v36 = vmax.f32 %v6510_v62, %v6515_v28  ;;  %v7094_v62 = vsel %vm2635_vm12, %v6556_v4, -inf  ;;  %v7104_v24 = vsel %vm2635_vm12, %v6532_v8, -inf  ;;  %v7112_v4 = vpop.f32.mrf.mxu1 }
 0x2a3   : > { %2063 = vst [vmem:[%s6365_s24 + $0x210] sm:$0xff] %v6835_v30  ;;  %v2555_v21 = vadd.f32 %v2554_v27, %v2436_v60  ;;  %v2797_v11 = vmax.f32 %v2796_v46, %v6551_v32 }
 0x2a4   : > { %2064 = vst [vmem:[%s6365_s24 + $0x218] sm:$0xff] %v6842_v7  ;;  %v7088_v50 = vpop.f32.mrf.mxu2  ;;  %v2792_v27 = vmax.f32 %v2791_v36, %v6527_v49  ;;  %v8508_v36 = vld [vmem:[#allocation30_spill] sm:$0xff] }
 0x2a5   : > { %2606 = vst.msk [vmem:[#allocation5 + $0x8] sm:$0xff] %vm1336_vm4, %v2580_v3  ;;  %v2777_v3 = vmax.f32 %v2776_v48, %v6455_v57  ;;  %v7058_v57 = vpop.f32.mrf.mxu0  ;;  %v2556_v9 = vadd.f32 %v2555_v21, %v2437_v13  ;;  %v2158_v48 = vld [vmem:[#allocation5 + $0x20] sm:$0xff]  ;;  %v2159_v21 = vld [vmem:[#allocation5 + $0x28] sm:$0xff]  ;;  %v2483_v13 = vpop.xlane.xlu0 %2482  ;;  %v2798_v8 = vmax.f32 %v2797_v11, %v7094_v62  ;;  %v7147_v11 = vsel %vm2635_vm12, %v8508_v36, -inf }
 0x2a6   : > { %2065 = vst [vmem:[%s6365_s24 + $0x220] sm:$0xff] %v6852_v37  ;;  %v2438_v20 = vsel %vm2338_vm1, %v7058_v57, 0.0  ;;  %v7099_v32 = vpop.f32.mrf.mxu3  ;;  %v2584_v46 = vadd.f32 %v2483_v13, %v2159_v21  ;;  %v8510_v21 = vld [vmem:[#allocation37_spill] sm:$0xff]  ;;  %vm2352_vm1 = vcmp.eq.s32.totalorder %v6378_v5, %v6961_v23  ;;  %v2841_v23 = vmax.f32 %v6805_v63, %v6807_v22 }
 0x2a7   : > { %2066 = vst [vmem:[%s6365_s24 + $0x228] sm:$0xff] %v6854_v53  ;;  %v2778_v42 = vmax.f32 %v2777_v3, %v7052_v51  ;;  %2557 = vadd.xlane.f32.xlu0 %v2556_v9  ;;  %v2559_v2 = vadd.f32 %v2439_v61, %v2438_v20  ;;  %v2440_v3 = vsel %vm2340_vm3, %v7088_v50, 0.0  ;;  %v2443_v9 = vsel %vm2343_vm7, %v7112_v4, 0.0 }
 0x2a8   : > { %2067 = vst [vmem:[%s6365_s24 + $0x230] sm:$0xff] %v6882_v43  ;;  %v2793_v20 = vmax.f32 %v2792_v27, %v7104_v24  ;;  %v2811_v61 = vmax.f32 %v6606_v19, %v6611_v58  ;;  %v2160_v19 = vld [vmem:[#allocation5 + $0x30] sm:$0xff]  ;;  %v2488_v58 = vpop.xlane.xlu1 %2487  ;;  %vm2346_vm10 = vcmp.eq.s32.totalorder %v6358_v31, %v8510_v21  ;;  %vm2347_vm11 = vcmp.eq.s32.totalorder %v6363_v15, %v8510_v21  ;;  %v8520_v31 = vld [vmem:[#allocation15_spill] sm:$0xff]  ;;  %v8521_v15 = vld [vmem:[#allocation21_spill] sm:$0xff] }
 0x2a9   : > { %2068 = vst [vmem:[%s6365_s24 + $0x238] sm:$0xff] %v6891_v44  ;;  %2779 = vmax.xlane.f32.xlu2 %v2778_v42  ;;  %v2560_v60 = vadd.f32 %v2559_v2, %v2440_v3  ;;  %v2816_v42 = vmax.f32 %v6632_v39, %v6637_v38  ;;  %v8509_v2 = vld [vmem:[#allocation13_spill] sm:$0xff]  ;;  %v2585_v13 = vadd.f32 %v2488_v58, %v2160_v19  ;;  %v7289_v63 = vsel %vm2635_vm12, %v6842_v7, -inf }
 0x2aa   : > { %2607 = vst.msk [vmem:[#allocation5 + $0x10] sm:$0xff] %vm1336_vm4, %v2581_v41  ;;  %v2478_v41 = vpop.xlane.xlu2 %2477  ;;  %v7164_v3 = vpop.f32.mrf.mxu1  ;;  %vm2348_vm13 = vcmp.eq.s32.totalorder %v6378_v5, %v8510_v21  ;;  %vm2349_vm14 = vcmp.eq.s32.totalorder %v6383_v6, %v8510_v21  ;;  %v7294_v22 = vsel %vm2635_vm12, %v6891_v44, -inf  ;;  %v2856_v44 = vmax.f32 %v6948_v29, %v6950_v16 }
 0x2ab   : > { %2069 = vst [vmem:[%s6365_s24 + $0x240] sm:$0xff] %v6901_v25  ;;  %v2583_v28 = vadd.f32 %v2478_v41, %v2158_v48  ;;  %v2812_v48 = vmax.f32 %v2811_v61, %v6625_v35  ;;  %v2817_v41 = vmax.f32 %v2816_v42, %v6655_v52  ;;  %v7152_v35 = vsel %vm2635_vm12, %v8509_v2, -inf  ;;  %v8511_v42 = vld [vmem:[#allocation17_spill] sm:$0xff] }
 0x2ac   : > { %2070 = vst [vmem:[%s6365_s24 + $0x248] sm:$0xff] %v6903_v14  ;;  %v7142_v38 = vpop.f32.mrf.mxu2  ;;  %v2447_v61 = vsel %vm2347_vm11, %v7164_v3, 0.0 }
 0x2ad   : > { %2071 = vst [vmem:[%s6365_s24 + $0x250] sm:$0xff] %v6931_v0  ;;  %v7110_v49 = vpop.f32.mrf.mxu0  ;;  %v2444_v52 = vsel %vm2344_vm8, %v7142_v38, 0.0  ;;  %v2813_v45 = vmax.f32 %v2812_v48, %v7147_v11  ;;  %v8513_v48 = vld [vmem:[#allocation24_spill] sm:$0xff] }
 0x2ae   : > { %2072 = vst [vmem:[%s6365_s24 + $0x258] sm:$0xff] %v6938_v34  ;;  %v2442_v47 = vsel %vm2342_vm6, %v7110_v49, 0.0  ;;  %v7157_v27 = vpop.f32.mrf.mxu3 }
 0x2af   : > { %2608 = vst.msk [vmem:[#allocation5 + $0x18] sm:$0xff] %vm1336_vm4, %v2582_v26  ;;  %v2441_v26 = vsel %vm2341_vm5, %v7099_v32, 0.0  ;;  %2799 = vmax.xlane.f32.xlu0 %v2798_v8  ;;  %v2564_v39 = vadd.f32 %v2443_v9, %v2442_v47  ;;  %v2818_v8 = vmax.f32 %v2817_v41, %v7152_v35  ;;  %v2161_v47 = vld [vmem:[#allocation5 + $0x38] sm:$0xff]  ;;  %v8514_v41 = vld [vmem:[#allocation20_spill] sm:$0xff] }
 0x2b0   : > { %2073 = vst [vmem:[%s6365_s24 + $0x260] sm:$0xff] %v6948_v29  ;;  %v2561_v12 = vadd.f32 %v2560_v60, %v2441_v26  ;;  %v2445_v26 = vsel %vm2345_vm9, %v7157_v27, 0.0  ;;  %v2806_v58 = vmax.f32 %v8514_v41, %v8513_v48  ;;  %v7317_v29 = vsel %vm2635_vm12, %v6999_v40, -inf }
 0x2b1   : > { %2074 = vst [vmem:[%s6365_s24 + $0x268] sm:$0xff] %v6950_v16  ;;  %2794 = vmax.xlane.f32.xlu2 %v2793_v20  ;;  %v2565_v60 = vadd.f32 %v2564_v39, %v2444_v52  ;;  %v8515_v39 = vld [vmem:[#allocation18_spill] sm:$0xff]  ;;  %v7322_v16 = vsel %vm2635_vm12, %v7047_v10, -inf }
 0x2b2   : > { %2075 = vst [vmem:[%s6365_s24 + $0x270] sm:$0xff] %v6984_v59  ;;  %2562 = vadd.xlane.f32.xlu1 %v2561_v12  ;;  %v2493_v9 = vpop.xlane.xlu2 %2492 }
 0x2b3   : > { %2076 = vst [vmem:[%s6365_s24 + $0x278] sm:$0xff] %v6999_v40  ;;  %v2566_v12 = vadd.f32 %v2565_v60, %v2445_v26  ;;  %v2586_v2 = vadd.f32 %v2493_v9, %v2161_v47  ;;  %v8516_v26 = vld [vmem:[#allocation29_spill] sm:$0xff]  ;;  %v8518_v47 = vld [vmem:[#allocation35_spill] sm:$0xff] }
 0x2b4   : > { %2609 = vst.msk [vmem:[#allocation5 + $0x20] sm:$0xff] %vm1336_vm4, %v2583_v28  ;;  %v7193_v60 = vpop.f32.mrf.mxu2  ;;  %v7209_v9 = vsel %vm2635_vm12, %v8518_v47, -inf }
 0x2b5   : > { %2077 = vst [vmem:[%s6365_s24 + $0x280] sm:$0xff] %v7005_v17  ;;  %v7162_v28 = vpop.f32.mrf.mxu0 }
 0x2b6   : > { %2078 = vst [vmem:[%s6365_s24 + $0x288] sm:$0xff] %v7007_v54  ;;  %v2446_v20 = vsel %vm2346_vm10, %v7162_v28, 0.0 }
 0x2b7   : > { %2079 = vst [vmem:[%s6365_s24 + $0x290] sm:$0xff] %v7036_v56  ;;  %2814 = vmax.xlane.f32.xlu0 %v2813_v45  ;;  %v2569_v52 = vadd.f32 %v2447_v61, %v2446_v20  ;;  %v2807_v45 = vmax.f32 %v2806_v58, %v8516_v26  ;;  %v2162_v20 = vld [vmem:[#allocation5 + $0x40] sm:$0xff] }
 0x2b8   : > { %2080 = vst [vmem:[%s6365_s24 + $0x298] sm:$0xff] %v7047_v10  ;;  %v2166_v10 = vld [vmem:[#allocation5 + $0x60] sm:$0xff] }
 0x2b9   : > { %2610 = vst.msk [vmem:[#allocation5 + $0x28] sm:$0xff] %vm1336_vm4, %v2584_v46  ;;  %v8512_v46 = vld [vmem:[#allocation32_spill] sm:$0xff]  ;;  %2567 = vadd.xlane.f32.xlu2 %v2566_v12  ;;  %v7204_v12 = vpop.f32.mrf.mxu3 }
 0x2ba   : > { %2081 = vst [vmem:[%s6365_s24 + $0x2a0] sm:$0xff] %v7058_v57  ;;  %v2831_v19 = vmax.f32 %v8512_v46, %v8511_v42  ;;  %2819 = vmax.xlane.f32.xlu1 %v2818_v8  ;;  %v8517_v8 = vld [vmem:[#allocation23_spill] sm:$0xff]  ;;  %v2498_v46 = vpop.xlane.xlu0 %2497  ;;  %v2449_v41 = vsel %vm2349_vm14, %v7204_v12, 0.0 }
 0x2bb   : > { %2082 = vst [vmem:[%s6365_s24 + $0x2a8] sm:$0xff] %v7060_v1  ;;  %v7199_v42 = vsel %vm2635_vm12, %v8517_v8, -inf  ;;  %v2808_v8 = vmax.f32 %v2807_v45, %v7209_v9 }
 0x2bc   : > { %2083 = vst [vmem:[%s6365_s24 + $0x2b0] sm:$0xff] %v7088_v50  ;;  %v2832_v36 = vmax.f32 %v2831_v19, %v8515_v39  ;;  %v7217_v19 = vpop.f32.mrf.mxu1  ;;  %v2587_v39 = vadd.f32 %v2498_v46, %v2162_v20  ;;  %v2163_v46 = vld [vmem:[#allocation5 + $0x48] sm:$0xff]  ;;  %v8523_v20 = vld [vmem:[#allocation22_spill] sm:$0xff] }
 0x2bd   : > { %2084 = vst [vmem:[%s6365_s24 + $0x2b8] sm:$0xff] %v7099_v32  ;;  %v7215_v61 = vpop.f32.mrf.mxu0  ;;  %v2451_v26 = vsel %vm2351_vm0, %v7217_v19, 0.0 }
 0x2be   : > { %2611 = vst.msk [vmem:[#allocation5 + $0x30] sm:$0xff] %vm1336_vm4, %v2585_v13  ;;  %v2448_v13 = vsel %vm2348_vm13, %v7193_v60, 0.0  ;;  %v2833_v21 = vmax.f32 %v2832_v36, %v7199_v42  ;;  %v8522_v36 = vld [vmem:[#allocation14_spill] sm:$0xff] }
 0x2bf   : > { %2085 = vst [vmem:[%s6365_s24 + $0x2c0] sm:$0xff] %v7110_v49  ;;  %v2570_v48 = vadd.f32 %v2569_v52, %v2448_v13  ;;  %v2450_v52 = vsel %vm2350_vm15, %v7215_v61, 0.0  ;;  %v8519_v13 = vld [vmem:[#allocation16_spill] sm:$0xff] }
 0x2c0   : > { %2086 = vst [vmem:[%s6365_s24 + $0x2c8] sm:$0xff] %v7112_v4  ;;  %v2826_v47 = vmax.f32 %v8520_v31, %v8519_v13  ;;  %v8525_v13 = vld [vmem:[#allocation26_spill] sm:$0xff] }
 0x2c1   : > { %2087 = vst [vmem:[%s6365_s24 + $0x2d0] sm:$0xff] %v7142_v38  ;;  %v2571_v58 = vadd.f32 %v2570_v48, %v2449_v41  ;;  %2809 = vmax.xlane.f32.xlu2 %v2808_v8  ;;  %v2574_v48 = vadd.f32 %v2451_v26, %v2450_v52  ;;  %v7246_v41 = vpop.f32.mrf.mxu2  ;;  %v7252_v31 = vsel %vm2635_vm12, %v8525_v13, -inf  ;;  %v7256_v8 = vpop.f32.mrf.mxu3 }
 0x2c2   : > { %2088 = vst [vmem:[%s6365_s24 + $0x2d8] sm:$0xff] %v7157_v27  ;;  %2834 = vmax.xlane.f32.xlu1 %v2833_v21  ;;  %v2827_v45 = vmax.f32 %v2826_v47, %v8523_v20  ;;  %v8524_v21 = vld [vmem:[#allocation25_spill] sm:$0xff]  ;;  %v2452_v5 = vsel %vm2352_vm1, %v7246_v41, 0.0  ;;  %v2503_v47 = vpop.xlane.xlu1 %2502  ;;  %v2453_v20 = vsel %vm2353_vm2, %v7256_v8, 0.0 }
 0x2c3   : > { %2612 = vst.msk [vmem:[#allocation5 + $0x38] sm:$0xff] %vm1336_vm4, %v2586_v2  ;;  %2572 = vadd.xlane.f32.xlu0 %v2571_v58  ;;  %v2821_v2 = vmax.f32 %v8522_v36, %v8521_v15  ;;  %v8526_v15 = vld [vmem:[#allocation31_spill] sm:$0xff]  ;;  %v2588_v26 = vadd.f32 %v2503_v47, %v2163_v46  ;;  %v2846_v46 = vmax.f32 %v6852_v37, %v6854_v53  ;;  %v2508_v53 = vpop.xlane.xlu2 %2507 }
 0x2c4   : > { %2089 = vst [vmem:[%s6365_s24 + $0x2e0] sm:$0xff] %v7162_v28  ;;  %v7261_v52 = vsel %vm2635_vm12, %v8526_v15, -inf }
 0x2c5   : > { %2090 = vst [vmem:[%s6365_s24 + $0x2e8] sm:$0xff] %v7164_v3  ;;  %v2822_v58 = vmax.f32 %v2821_v2, %v8524_v21  ;;  %v1776_v36 = vpop.f32.mrf.mxu0  ;;  %v1849_v2 = vpop.f32.mrf.mxu1  ;;  %v2828_v21 = vmax.f32 %v2827_v45, %v7252_v31  ;;  %v2164_v45 = vld [vmem:[#allocation5 + $0x50] sm:$0xff] }
 0x2c6   : > { %2091 = vst [vmem:[%s6365_s24 + $0x2f0] sm:$0xff] %v7193_v60  ;;  %v2842_v36 = vmax.f32 %v2841_v23, %v6835_v30  ;;  %v2847_v2 = vmax.f32 %v2846_v46, %v6882_v43  ;;  %v2589_v43 = vadd.f32 %v2508_v53, %v2164_v45  ;;  %v2851_v23 = vmax.f32 %v6901_v25, %v6903_v14  ;;  %v2165_v46 = vld [vmem:[#allocation5 + $0x58] sm:$0xff] }
 0x2c7   : > { %2092 = vst [vmem:[%s6365_s24 + $0x2f8] sm:$0xff] %v7204_v12  ;;  %v2823_v15 = vmax.f32 %v2822_v58, %v7261_v52  ;;  %v7327_v25 = vsel %vm2635_vm12, %v6938_v34, -inf  ;;  %v2866_v34 = vmax.f32 %v7058_v57, %v7060_v1  ;;  %v7355_v57 = vsel %vm2635_vm12, %v7099_v32, -inf }
 0x2c8   : > { %2613 = vst.msk [vmem:[#allocation5 + $0x40] sm:$0xff] %vm1336_vm4, %v2587_v39  ;;  %v2575_v39 = vadd.f32 %v2574_v48, %v2452_v5  ;;  %v8527_v48 = vld [vmem:[#allocation33_spill] sm:$0xff]  ;;  %v8528_v5 = vld [vmem:[#allocation27_spill] sm:$0xff]  ;;  %v2848_v7 = vmax.f32 %v2847_v2, %v7294_v22  ;;  %v2881_v32 = vmax.f32 %v7215_v61, %v7217_v19 }
 0x2c9   : > { %2093 = vst [vmem:[%s6365_s24 + $0x300] sm:$0xff] %v7215_v61  ;;  %v2836_v47 = vmax.f32 %v8528_v5, %v8527_v48  ;;  %2824 = vmax.xlane.f32.xlu2 %v2823_v15  ;;  %v1922_v58 = vpop.f32.mrf.mxu2  ;;  %v1995_v37 = vpop.f32.mrf.mxu3  ;;  %v2861_v15 = vmax.f32 %v7005_v17, %v7007_v54  ;;  %v2857_v48 = vmax.f32 %v2856_v44, %v6984_v59 }
 0x2ca   : > { %2094 = vst [vmem:[%s6365_s24 + $0x308] sm:$0xff] %v7217_v19  ;;  %v2576_v13 = vadd.f32 %v2575_v39, %v2453_v20  ;;  %v8529_v39 = vld [vmem:[#allocation19_spill] sm:$0xff]  ;;  %v2513_v17 = vpop.xlane.xlu0 %2512  ;;  %v2871_v54 = vmax.f32 %v7110_v49, %v7112_v4  ;;  %v2867_v2 = vmax.f32 %v2866_v34, %v7088_v50  ;;  %v7345_v49 = vsel %vm2635_vm12, %v7157_v27, -inf  ;;  %v2168_v19 = vld [vmem:[#allocation5 + $0x70] sm:$0xff] }
 0x2cb   : > { %2095 = vst [vmem:[%s6365_s24 + $0x310] sm:$0xff] %v7246_v41  ;;  %2829 = vmax.xlane.f32.xlu0 %v2828_v21  ;;  %v2837_v20 = vmax.f32 %v2836_v47, %v8529_v39  ;;  %v2843_v21 = vmax.f32 %v2842_v36, %v7289_v63  ;;  %v2862_v5 = vmax.f32 %v2861_v15, %v7036_v56  ;;  %v7350_v4 = vsel %vm2635_vm12, %v7204_v12, -inf }
 0x2cc   : > { %2096 = vst [vmem:[%s6365_s24 + $0x318] sm:$0xff] %v7256_v8  ;;  %2577 = vadd.xlane.f32.xlu1 %v2576_v13  ;;  %v2852_v47 = vmax.f32 %v2851_v23, %v6931_v0  ;;  %v2590_v14 = vadd.f32 %v2513_v17, %v2165_v46  ;;  %v2858_v0 = vmax.f32 %v2857_v48, %v7317_v29  ;;  %v7372_v39 = vsel %vm2635_vm12, %v7256_v8, -inf  ;;  %v2169_v8 = vld [vmem:[#allocation5 + $0x78] sm:$0xff]  ;;  %v2171_v46 = vld [vmem:[#allocation5 + $0x88] sm:$0xff] }
 0x2cd   : > { %2614 = vst.msk [vmem:[#allocation5 + $0x48] sm:$0xff] %vm1336_vm4, %v2588_v26  ;;  %v8530_v26 = vld [vmem:[#allocation28_spill] sm:$0xff]  ;;  %v2863_v59 = vmax.f32 %v2862_v5, %v7322_v16  ;;  %v2876_v56 = vmax.f32 %v7162_v28, %v7164_v3  ;;  %v2872_v45 = vmax.f32 %v2871_v54, %v7142_v38  ;;  %v2518_v28 = vpop.xlane.xlu1 %2517  ;;  %v2868_v27 = vmax.f32 %v2867_v2, %v7355_v57  ;;  %v2173_v2 = vld [vmem:[#allocation5 + $0x98] sm:$0xff] }
 0x2ce   : > { %v7299_v30 = vsel %vm2635_vm12, %v8530_v26, -inf  ;;  %2615 = vst.msk [vmem:[#allocation5 + $0x50] sm:$0xff] %vm1336_vm4, %v2589_v43  ;;  %v2853_v40 = vmax.f32 %v2852_v47, %v7327_v25  ;;  %v2591_v1 = vadd.f32 %v2518_v28, %v2166_v10  ;;  %v5269_v3 = vmov -inf   ;;  %v2170_v43 = vld [vmem:[#allocation5 + $0x80] sm:$0xff] }
 0x2cf   : > { %v2838_v13 = vmax.f32 %v2837_v20, %v7299_v30  ;;  %2616 = vst.msk [vmem:[#allocation5 + $0x58] sm:$0xff] %vm1336_vm4, %v2590_v14  ;;  %v2877_v36 = vmax.f32 %v2876_v56, %v7193_v60  ;;  %v2873_v50 = vmax.f32 %v2872_v45, %v7345_v49  ;;  %v2167_v60 = vld [vmem:[#allocation5 + $0x68] sm:$0xff]  ;;  %v2882_v12 = vmax.f32 %v2881_v32, %v7246_v41 }
 0x2d0   : > { %2617 = vst.msk [vmem:[#allocation5 + $0x60] sm:$0xff] %vm1336_vm4, %v2591_v1 }
 0x2d1   : > { %2839 = vmax.xlane.f32.xlu2 %v2838_v13  ;;  %v2878_v38 = vmax.f32 %v2877_v36, %v7350_v4  ;;  %1339 = vst.msk [vmem:[#allocation3 + $0x10] sm:$0xff] %vm1336_vm4, %v5269_v3  ;;  %v2883_v61 = vmax.f32 %v2882_v12, %v7372_v39 }
 0x2d2   : > { %1337 = vst.msk [vmem:[#allocation3] sm:$0xff] %vm1336_vm4, %v5269_v3 }
 0x2d3   : > { %2844 = vmax.xlane.f32.xlu0 %v2843_v21  ;;  %1338 = vst.msk [vmem:[#allocation3 + $0x8] sm:$0xff] %vm1336_vm4, %v5269_v3 }
 0x2d4   : > { %2849 = vmax.xlane.f32.xlu1 %v2848_v7  ;;  %1340 = vst.msk [vmem:[#allocation3 + $0x18] sm:$0xff] %vm1336_vm4, %v5269_v3  ;;  %v2523_v58 = vpop.xlane.xlu2 %2522 }
 0x2d5   : > { %1341 = vst.msk [vmem:[#allocation3 + $0x20] sm:$0xff] %vm1336_vm4, %v5269_v3  ;;  %v2592_v20 = vadd.f32 %v2523_v58, %v2167_v60  ;;  %v2174_v58 = vld [vmem:[#allocation5 + $0xa0] sm:$0xff] }
 0x2d6   : > { %1342 = vst.msk [vmem:[#allocation3 + $0x28] sm:$0xff] %vm1336_vm4, %v5269_v3 }
 0x2d7   : > { %1343 = vst.msk [vmem:[#allocation3 + $0x30] sm:$0xff] %vm1336_vm4, %v5269_v3 }
 0x2d8   : > { %2618 = vst.msk [vmem:[#allocation5 + $0x68] sm:$0xff] %vm1336_vm4, %v2592_v20  ;;  %v7396_v26 = vld [vmem:[#allocation3 + $0x10] sm:$0xff] }
 0x2d9   : > { %2854 = vmax.xlane.f32.xlu2 %v2853_v40  ;;  %1344 = vst.msk [vmem:[#allocation3 + $0x38] sm:$0xff] %vm1336_vm4, %v5269_v3  ;;  %v7409_v23 = vld [vmem:[#allocation3] sm:$0xff] }
 0x2da   : > { %1345 = vst.msk [vmem:[#allocation3 + $0x40] sm:$0xff] %vm1336_vm4, %v5269_v3 }
 0x2db   : > { %2859 = vmax.xlane.f32.xlu0 %v2858_v0  ;;  %1346 = vst.msk [vmem:[#allocation3 + $0x48] sm:$0xff] %vm1336_vm4, %v5269_v3  ;;  %v7420_v0 = vld [vmem:[#allocation3 + $0x8] sm:$0xff]  ;;  %v7453_v20 = vld [vmem:[#allocation3 + $0x18] sm:$0xff] }
 0x2dc   : > { %2864 = vmax.xlane.f32.xlu1 %v2863_v59  ;;  %1347 = vst.msk [vmem:[#allocation3 + $0x50] sm:$0xff] %vm1336_vm4, %v5269_v3  ;;  %v2172_v59 = vld [vmem:[#allocation5 + $0x90] sm:$0xff] }
 0x2dd   : > { %1348 = vst.msk [vmem:[#allocation3 + $0x58] sm:$0xff] %vm1336_vm4, %v5269_v3  ;;  %v7431_v45 = vld [vmem:[#allocation3 + $0x20] sm:$0xff]  ;;  %v7433_v36 = vld [vmem:[#allocation3 + $0x28] sm:$0xff] }
 0x2de   : > { %1349 = vst.msk [vmem:[#allocation3 + $0x60] sm:$0xff] %vm1336_vm4, %v5269_v3 }
 0x2df   : > { %v2528_v6 = vpop.xlane.xlu0 %2527  ;;  %1350 = vst.msk [vmem:[#allocation3 + $0x68] sm:$0xff] %vm1336_vm4, %v5269_v3 }
 0x2e0   : > { %v2593_v41 = vadd.f32 %v2528_v6, %v2168_v19  ;;  %1351 = vst.msk [vmem:[#allocation3 + $0x70] sm:$0xff] %vm1336_vm4, %v5269_v3 }
 0x2e1   : > { %2869 = vmax.xlane.f32.xlu2 %v2868_v27  ;;  %1352 = vst.msk [vmem:[#allocation3 + $0x78] sm:$0xff] %vm1336_vm4, %v5269_v3  ;;  %v7451_v12 = vld [vmem:[#allocation3 + $0x40] sm:$0xff] }
 0x2e2   : > { %2619 = vst.msk [vmem:[#allocation5 + $0x70] sm:$0xff] %vm1336_vm4, %v2593_v41 }
 0x2e3   : > { %2874 = vmax.xlane.f32.xlu0 %v2873_v50  ;;  %1353 = vst.msk [vmem:[#allocation3 + $0x80] sm:$0xff] %vm1336_vm4, %v5269_v3 }
 0x2e4   : > { %2879 = vmax.xlane.f32.xlu1 %v2878_v38  ;;  %1354 = vst.msk [vmem:[#allocation3 + $0x88] sm:$0xff] %vm1336_vm4, %v5269_v3 }
 0x2e5   : > { %1355 = vst.msk [vmem:[#allocation3 + $0x90] sm:$0xff] %vm1336_vm4, %v5269_v3 }
 0x2e6   : > { %1356 = vst.msk [vmem:[#allocation3 + $0x98] sm:$0xff] %vm1336_vm4, %v5269_v3 }
 0x2e7   : > { %1357 = vst.msk [vmem:[#allocation3 + $0xa0] sm:$0xff] %vm1336_vm4, %v5269_v3 }
 0x2e8   : > { %1358 = vst.msk [vmem:[#allocation3 + $0xa8] sm:$0xff] %vm1336_vm4, %v5269_v3 }
 0x2e9   : > { %2884 = vmax.xlane.f32.xlu2 %v2883_v61  ;;  %v2533_v37 = vpop.xlane.xlu1 %2532  ;;  %1359 = vst.msk [vmem:[#allocation3 + $0xb0] sm:$0xff] %vm1336_vm4, %v5269_v3 }
 0x2ea   : > { %v2594_v53 = vadd.f32 %v2533_v37, %v2169_v8  ;;  %1360 = vst.msk [vmem:[#allocation3 + $0xb8] sm:$0xff] %vm1336_vm4, %v5269_v3 }
 0x2eb   : > { %1361 = vst.msk [vmem:[#allocation3 + $0xc0] sm:$0xff] %vm1336_vm4, %v5269_v3 }
 0x2ec   : > { %2620 = vst.msk [vmem:[#allocation5 + $0x78] sm:$0xff] %vm1336_vm4, %v2594_v53  ;;  %v7591_v14 = vld [vmem:[#allocation3 + $0x90] sm:$0xff] }
 0x2ed   : > { %8531 = vst [vmem:[#allocation30_spill] sm:$0xff] %v7433_v36 }
 0x2ee   : > { %8533 = vst [vmem:[#allocation37_spill] sm:$0xff] %v7451_v12 }
 0x2ef   : > { %8559 = vst [vmem:[#allocation44_spill] sm:$0xff] %v7591_v14 }
 0x2f4   : > { %v2538_v7 = vpop.xlane.xlu2 %2537 }
 0x2f5   : > { %v2595_v44 = vadd.f32 %v2538_v7, %v2170_v43  ;;  %v2175_v7 = vld [vmem:[#allocation5 + $0xa8] sm:$0xff] }
 0x2f6   : > { %v2775_v21 = vpop.xlane.xlu1 %2774 }
 0x2f7   : > { %v7401_v13 = vmax.f32 %v7396_v26, %v2775_v21  ;;  %2621 = vst.msk [vmem:[#allocation5 + $0x80] sm:$0xff] %vm1336_vm4, %v2595_v44  ;;  %v7471_v21 = vld [vmem:[#allocation3 + $0x38] sm:$0xff]  ;;  %v7473_v44 = vld [vmem:[#allocation3 + $0x30] sm:$0xff] }
 0x2f8   : > { %8535 = vst [vmem:[#allocation32_spill] sm:$0xff] %v7471_v21 }
 0x2f9   : > { %3638 = vst.msk [vmem:[#allocation3 + $0x10] sm:$0xff] %vm1336_vm4, %v7401_v13 }
 0x2fa   : > { %8536 = vst [vmem:[#allocation24_spill] sm:$0xff] %v7473_v44 }
 0x2fb   : > { %v2543_v5 = vpop.xlane.xlu0 %2542 }
 0x2fc   : > { %v2765_v48 = vpop.xlane.xlu2 %2764  ;;  %v2596_v17 = vadd.f32 %v2543_v5, %v2171_v46 }
 0x2fd   : > { %v7412_v47 = vmax.f32 %v7409_v23, %v2765_v48 }
 0x2fe   : > { %2622 = vst.msk [vmem:[#allocation5 + $0x88] sm:$0xff] %vm1336_vm4, %v2596_v17 }
 0x2ff   : > { %3636 = vst.msk [vmem:[#allocation3] sm:$0xff] %vm1336_vm4, %v7412_v47  ;;  %3038 = vperm.xlu0 %4777, %v7412_v47  }
 0x301   : > { %3048 = vperm.xlu2 %4779, %v7401_v13  }
 0x302   : > { %v2548_v54 = vpop.xlane.xlu1 %2547 }
 0x303   : > { %v2770_v40 = vpop.xlane.xlu0 %2769  ;;  %v2597_v34 = vadd.f32 %v2548_v54, %v2172_v59 }
 0x304   : > { %v7423_v56 = vmax.f32 %v7420_v0, %v2770_v40 }
 0x305   : > { %2623 = vst.msk [vmem:[#allocation5 + $0x90] sm:$0xff] %vm1336_vm4, %v2597_v34 }
 0x306   : > { %3637 = vst.msk [vmem:[#allocation3 + $0x8] sm:$0xff] %vm1336_vm4, %v7423_v56  ;;  %3043 = vperm.xlu1 %4778, %v7423_v56  }
 0x30b   : > { %v2785_v28 = vpop.xlane.xlu0 %2784 }
 0x30c   : > { %v7436_v50 = vmax.f32 %v7431_v45, %v2785_v28  ;;  %v7495_v28 = vld [vmem:[#allocation3 + $0x58] sm:$0xff] }
 0x30d   : > { %v2790_v1 = vpop.xlane.xlu1 %2789  ;;  %v2553_v27 = vpop.xlane.xlu2 %2552  ;;  %8540 = vst [vmem:[#allocation23_spill] sm:$0xff] %v7495_v28 }
 0x30e   : > { %v7439_v38 = vmax.f32 %v7433_v36, %v2790_v1  ;;  %v2598_v3 = vadd.f32 %v2553_v27, %v2173_v2  ;;  %3640 = vst.msk [vmem:[#allocation3 + $0x20] sm:$0xff] %vm1336_vm4, %v7436_v50  ;;  %3058 = vperm.xlu1 %4778, %v7436_v50   ;;  %v7493_v2 = vld [vmem:[#allocation3 + $0x50] sm:$0xff]  ;;  %v2176_v1 = vld [vmem:[#allocation5 + $0xb0] sm:$0xff] }
 0x30f   : > { %8539 = vst [vmem:[#allocation29_spill] sm:$0xff] %v7493_v2 }
 0x310   : > { %8532 = vst [vmem:[#allocation13_spill] sm:$0xff] %v7439_v38 }
 0x311   : > { %3641 = vst.msk [vmem:[#allocation3 + $0x28] sm:$0xff] %vm1336_vm4, %v7439_v38 }
 0x312   : > { %2624 = vst.msk [vmem:[#allocation5 + $0x98] sm:$0xff] %vm1336_vm4, %v2598_v3 }
 0x315   : > { %v2805_v61 = vpop.xlane.xlu1 %2804 }
 0x316   : > { %v7456_v6 = vmax.f32 %v7451_v12, %v2805_v61 }
 0x318   : > { %8534 = vst [vmem:[#allocation17_spill] sm:$0xff] %v7456_v6 }
 0x319   : > { %3644 = vst.msk [vmem:[#allocation3 + $0x40] sm:$0xff] %vm1336_vm4, %v7456_v6 }
 0x31a   : > { %v2558_v19 = vpop.xlane.xlu0 %2557 }
 0x31b   : > { %v2599_v8 = vadd.f32 %v2558_v19, %v2174_v58 }
 0x31c   : > { %v2780_v41 = vpop.xlane.xlu2 %2779 }
 0x31d   : > { %v7459_v37 = vmax.f32 %v7453_v20, %v2780_v41  ;;  %2625 = vst.msk [vmem:[#allocation5 + $0xa0] sm:$0xff] %vm1336_vm4, %v2599_v8 }
 0x31f   : > { %3639 = vst.msk [vmem:[#allocation3 + $0x18] sm:$0xff] %vm1336_vm4, %v7459_v37  ;;  %3053 = vperm.xlu0 %4777, %v7459_v37  }
 0x322   : > { %v2800_v46 = vpop.xlane.xlu0 %2799 }
 0x323   : > { %v7476_v17 = vmax.f32 %v7471_v21, %v2800_v46  ;;  %v7514_v46 = vld [vmem:[#allocation3 + $0x70] sm:$0xff] }
 0x324   : > { %v2795_v5 = vpop.xlane.xlu2 %2794  ;;  %8543 = vst [vmem:[#allocation15_spill] sm:$0xff] %v7514_v46 }
 0x325   : > { %v2563_v48 = vpop.xlane.xlu1 %2562  ;;  %8537 = vst [vmem:[#allocation20_spill] sm:$0xff] %v7476_v17  ;;  %v7479_v40 = vmax.f32 %v7473_v44, %v2795_v5  ;;  %3073 = vperm.xlu1 %4778, %v7476_v17   ;;  %v7516_v5 = vld [vmem:[#allocation3 + $0x48] sm:$0xff] }
 0x326   : > { %v2600_v59 = vadd.f32 %v2563_v48, %v2175_v7  ;;  %3643 = vst.msk [vmem:[#allocation3 + $0x38] sm:$0xff] %vm1336_vm4, %v7476_v17  ;;  %v2177_v48 = vld [vmem:[#allocation5 + $0xb8] sm:$0xff] }
 0x327   : > { %8538 = vst [vmem:[#allocation18_spill] sm:$0xff] %v7479_v40  ;;  %3063 = vperm.xlu0 %4777, %v7439_v38   ;;  %3068 = vperm.xlu2 %4779, %v7479_v40  }
 0x328   : > { %3642 = vst.msk [vmem:[#allocation3 + $0x30] sm:$0xff] %vm1336_vm4, %v7479_v40  ;;  %v5094_v40 = vld [vmem:[%s6365_s24 + $0x90] sm:$0xff] }
 0x329   : > { %2626 = vst.msk [vmem:[#allocation5 + $0xa8] sm:$0xff] %vm1336_vm4, %v2600_v59 }
 0x32a   : > { %v2815_v27 = vpop.xlane.xlu0 %2814  ;;  %8544 = vst [vmem:[#allocation21_spill] sm:$0xff] %v7516_v5 }
 0x32b   : > { %v7498_v58 = vmax.f32 %v7493_v2, %v2815_v27  ;;  %v5091_v2 = vld [vmem:[%s6365_s24 + $0xd0] sm:$0xff] }
 0x32c   : > { %v2568_v19 = vpop.xlane.xlu2 %2567 }
 0x32d   : > { %v2820_v3 = vpop.xlane.xlu1 %2819  ;;  %8541 = vst [vmem:[#allocation35_spill] sm:$0xff] %v7498_v58  ;;  %v2601_v41 = vadd.f32 %v2568_v19, %v2176_v1  ;;  %3088 = vperm.xlu1 %4778, %v7498_v58  }
 0x32e   : > { %v7501_v61 = vmax.f32 %v7495_v28, %v2820_v3  ;;  %3646 = vst.msk [vmem:[#allocation3 + $0x50] sm:$0xff] %vm1336_vm4, %v7498_v58 }
 0x32f   : > { %3078 = vperm.xlu0 %4777, %v7456_v6   ;;  %2627 = vst.msk [vmem:[#allocation5 + $0xb0] sm:$0xff] %vm1336_vm4, %v2601_v41 }
 0x330   : > { %8542 = vst [vmem:[#allocation16_spill] sm:$0xff] %v7501_v61 }
 0x331   : > { %3647 = vst.msk [vmem:[#allocation3 + $0x58] sm:$0xff] %vm1336_vm4, %v7501_v61 }
 0x334   : > { %v2810_v3 = vpop.xlane.xlu2 %2809 }
 0x335   : > { %v2835_v59 = vpop.xlane.xlu1 %2834  ;;  %v7522_v7 = vmax.f32 %v7516_v5, %v2810_v3  ;;  %v5085_v5 = vld [vmem:[%s6365_s24 + $0x10] sm:$0xff] }
 0x336   : > { %v2573_v1 = vpop.xlane.xlu0 %2572  ;;  %v7519_v27 = vmax.f32 %v7514_v46, %v2835_v59  ;;  %v2178_v59 = vld [vmem:[#allocation5 + $0xc0] sm:$0xff] }
 0x337   : > { %v2602_v19 = vadd.f32 %v2573_v1, %v2177_v48  ;;  %8546 = vst [vmem:[#allocation22_spill] sm:$0xff] %v7522_v7  ;;  %3093 = vperm.xlu0 %4777, %v7501_v61   ;;  %3083 = vperm.xlu2 %4779, %v7522_v7   ;;  %v7535_v48 = vld [vmem:[#allocation3 + $0x68] sm:$0xff]  ;;  %v7537_v1 = vld [vmem:[#allocation3 + $0x60] sm:$0xff] }
 0x338   : > { %8545 = vst [vmem:[#allocation14_spill] sm:$0xff] %v7519_v27 }
 0x339   : > { %3650 = vst.msk [vmem:[#allocation3 + $0x70] sm:$0xff] %vm1336_vm4, %v7519_v27 }
 0x33a   : > { %3645 = vst.msk [vmem:[#allocation3 + $0x48] sm:$0xff] %vm1336_vm4, %v7522_v7 }
 0x33b   : > { %2628 = vst.msk [vmem:[#allocation5 + $0xb8] sm:$0xff] %vm1336_vm4, %v2602_v19 }
 0x33c   : > { %8547 = vst [vmem:[#allocation25_spill] sm:$0xff] %v7535_v48  ;;  %v2825_v53 = vpop.xlane.xlu2 %2824 }
 0x33d   : > { %8548 = vst [vmem:[#allocation26_spill] sm:$0xff] %v7537_v1  ;;  %v7543_v54 = vmax.f32 %v7537_v1, %v2825_v53  ;;  %v7557_v53 = vld [vmem:[#allocation3 + $0x80] sm:$0xff] }
 0x33e   : > { %v2830_v3 = vpop.xlane.xlu0 %2829  ;;  %8551 = vst [vmem:[#allocation27_spill] sm:$0xff] %v7557_v53 }
 0x33f   : > { %v2578_v8 = vpop.xlane.xlu1 %2577  ;;  %v7540_v34 = vmax.f32 %v7535_v48, %v2830_v3  ;;  %8550 = vst [vmem:[#allocation33_spill] sm:$0xff] %v7543_v54  ;;  %3108 = vperm.xlu0 %4777, %v7519_v27   ;;  %3098 = vperm.xlu2 %4779, %v7543_v54  }
 0x340   : > { %v2603_v41 = vadd.f32 %v2578_v8, %v2178_v59  ;;  %3648 = vst.msk [vmem:[#allocation3 + $0x60] sm:$0xff] %vm1336_vm4, %v7543_v54  ;;  %v7559_v8 = vld [vmem:[#allocation3 + $0x88] sm:$0xff]  ;;  %v7561_v59 = vld [vmem:[#allocation3 + $0x78] sm:$0xff] }
 0x341   : > { %8549 = vst [vmem:[#allocation31_spill] sm:$0xff] %v7540_v34  ;;  %3103 = vperm.xlu1 %4778, %v7540_v34   ;;  %v5083_v54 = vld [vmem:[%s6365_s24] sm:$0xff] }
 0x342   : > { %3649 = vst.msk [vmem:[#allocation3 + $0x68] sm:$0xff] %vm1336_vm4, %v7540_v34 }
 0x343   : > { %2629 = vst.msk [vmem:[#allocation5 + $0xc0] sm:$0xff] %vm1336_vm4, %v2603_v41 }
 0x344   : > { %8552 = vst [vmem:[#allocation19_spill] sm:$0xff] %v7559_v8  ;;  %v2840_v43 = vpop.xlane.xlu2 %2839 }
 0x345   : > { %8553 = vst [vmem:[#allocation28_spill] sm:$0xff] %v7561_v59  ;;  %v7570_v10 = vmax.f32 %v7561_v59, %v2840_v43  ;;  %v7589_v43 = vld [vmem:[#allocation3 + $0xa0] sm:$0xff] }
 0x346   : > { %v2845_v3 = vpop.xlane.xlu0 %2844  ;;  %8558 = vst [vmem:[#allocation43_spill] sm:$0xff] %v7589_v43 }
 0x347   : > { %v2850_v60 = vpop.xlane.xlu1 %2849  ;;  %v7564_v19 = vmax.f32 %v7557_v53, %v2845_v3  ;;  %8556 = vst [vmem:[#allocation41_spill] sm:$0xff] %v7570_v10  ;;  %3113 = vperm.xlu2 %4779, %v7570_v10  }
 0x348   : > { %v7567_v32 = vmax.f32 %v7559_v8, %v2850_v60  ;;  %3651 = vst.msk [vmem:[#allocation3 + $0x78] sm:$0xff] %vm1336_vm4, %v7570_v10  ;;  %v7587_v60 = vld [vmem:[#allocation3 + $0x98] sm:$0xff] }
 0x349   : > { %8554 = vst [vmem:[#allocation39_spill] sm:$0xff] %v7564_v19  ;;  %3118 = vperm.xlu1 %4778, %v7564_v19  }
 0x34a   : > { %8555 = vst [vmem:[#allocation40_spill] sm:$0xff] %v7567_v32  ;;  %3123 = vperm.xlu0 %4777, %v7567_v32  }
 0x34b   : > { %3652 = vst.msk [vmem:[#allocation3 + $0x80] sm:$0xff] %vm1336_vm4, %v7564_v19  ;;  %v7621_v19 = vld [vmem:[#allocation3 + $0xa8] sm:$0xff] }
 0x34c   : > { %3653 = vst.msk [vmem:[#allocation3 + $0x88] sm:$0xff] %vm1336_vm4, %v7567_v32  ;;  %v2855_v8 = vpop.xlane.xlu2 %2854 }
 0x34d   : > { %8557 = vst [vmem:[#allocation42_spill] sm:$0xff] %v7587_v60  ;;  %v7600_v10 = vmax.f32 %v7591_v14, %v2855_v8  ;;  %v7619_v8 = vld [vmem:[#allocation3 + $0xb8] sm:$0xff] }
 0x34e   : > { %v2860_v41 = vpop.xlane.xlu0 %2859  ;;  %8564 = vst [vmem:[#allocation49_spill] sm:$0xff] %v7619_v8 }
 0x34f   : > { %v2865_v15 = vpop.xlane.xlu1 %2864  ;;  %v7594_v3 = vmax.f32 %v7587_v60, %v2860_v41  ;;  %8562 = vst [vmem:[#allocation47_spill] sm:$0xff] %v7600_v10  ;;  %3128 = vperm.xlu2 %4779, %v7600_v10  }
 0x350   : > { %v7597_v59 = vmax.f32 %v7589_v43, %v2865_v15  ;;  %3654 = vst.msk [vmem:[#allocation3 + $0x90] sm:$0xff] %vm1336_vm4, %v7600_v10  ;;  %v7617_v15 = vld [vmem:[#allocation3 + $0xb0] sm:$0xff] }
 0x351   : > { %8560 = vst [vmem:[#allocation45_spill] sm:$0xff] %v7594_v3  ;;  %3133 = vperm.xlu1 %4778, %v7594_v3  }
 0x352   : > { %8561 = vst [vmem:[#allocation46_spill] sm:$0xff] %v7597_v59  ;;  %3138 = vperm.xlu0 %4777, %v7597_v59  }
 0x353   : > { %3655 = vst.msk [vmem:[#allocation3 + $0x98] sm:$0xff] %vm1336_vm4, %v7594_v3 }
 0x354   : > { %3656 = vst.msk [vmem:[#allocation3 + $0xa0] sm:$0xff] %vm1336_vm4, %v7597_v59  ;;  %v2870_v3 = vpop.xlane.xlu2 %2869 }
 0x355   : > { %8563 = vst [vmem:[#allocation48_spill] sm:$0xff] %v7617_v15  ;;  %v7630_v10 = vmax.f32 %v7621_v19, %v2870_v3  ;;  %v7647_v3 = vld [vmem:[#allocation3 + $0xc0] sm:$0xff] }
 0x356   : > { %8565 = vst [vmem:[#allocation50_spill] sm:$0xff] %v7621_v19  ;;  %v2875_v32 = vpop.xlane.xlu0 %2874 }
 0x357   : > { %v2880_v43 = vpop.xlane.xlu1 %2879  ;;  %v7624_v41 = vmax.f32 %v7617_v15, %v2875_v32  ;;  %8568 = vst [vmem:[#allocation53_spill] sm:$0xff] %v7630_v10  ;;  %3143 = vperm.xlu2 %4779, %v7630_v10   ;;  %v8571_v32 = vld [vmem:[#allocation34_spill] sm:$0xff] }
 0x358   : > { %v7627_v14 = vmax.f32 %v7619_v8, %v2880_v43  ;;  %3657 = vst.msk [vmem:[#allocation3 + $0xa8] sm:$0xff] %vm1336_vm4, %v7630_v10  ;;  %v5080_v8 = vld [vmem:[%s6365_s24 + $0x40] sm:$0xff] }
 0x359   : > { %8566 = vst [vmem:[#allocation51_spill] sm:$0xff] %v7624_v41  ;;  %3148 = vperm.xlu1 %4778, %v7624_v41  }
 0x35a   : > { %8567 = vst [vmem:[#allocation52_spill] sm:$0xff] %v7627_v14  ;;  %3153 = vperm.xlu0 %4777, %v7627_v14  }
 0x35b   : > { %3658 = vst.msk [vmem:[#allocation3 + $0xb0] sm:$0xff] %vm1336_vm4, %v7624_v41 }
 0x35c   : > { %3659 = vst.msk [vmem:[#allocation3 + $0xb8] sm:$0xff] %vm1336_vm4, %v7627_v14  ;;  %v2885_v43 = vpop.xlane.xlu2 %2884  ;;  %v5081_v14 = vld [vmem:[%s6365_s24 + $0x48] sm:$0xff] }
 0x35d   : > { %8569 = vst [vmem:[#allocation54_spill] sm:$0xff] %v7647_v3  ;;  %v7650_v60 = vmax.f32 %v7647_v3, %v2885_v43  ;;  %v5082_v43 = vld [vmem:[%s6365_s24 + $0x50] sm:$0xff] }
 0x35f   : > { %8570 = vst [vmem:[#allocation55_spill] sm:$0xff] %v7650_v60  ;;  %3158 = vperm.xlu2 %4779, %v7650_v60  }
 0x360   : > { %3660 = vst.msk [vmem:[#allocation3 + $0xc0] sm:$0xff] %vm1336_vm4, %v7650_v60  ;;  %v5084_v60 = vld [vmem:[%s6365_s24 + $0x8] sm:$0xff] }
 0x364   : > { %v3049_v59 = vpop.permute.xlu2 %3048 }
 0x365   : > { %v3169_v10 = vsub.f32 %v5080_v8, %v3049_v59  ;;  %v3170_v19 = vsub.f32 %v5081_v14, %v3049_v59  ;;  %v3171_v53 = vsub.f32 %v5082_v43, %v3049_v59  ;;  %v3172_v3 = vsub.f32 %v8571_v32, %v3049_v59  ;;  %v5087_v43 = vld [vmem:[%s6365_s24 + $0xc0] sm:$0xff] }
 0x367   : > { %v3277_v41 = vmul.f32 1.442695, %v3169_v10  ;;  %v3279_v15 = vmul.f32 1.442695, %v3170_v19  ;;  %v3281_v34 = vmul.f32 1.442695, %v3171_v53 }
 0x368   : > { %v3283_v46 = vmul.f32 1.442695, %v3172_v3  ;;  %v8572_v10 = vld [vmem:[#allocation36_spill] sm:$0xff]  ;;  %v5086_v3 = vld [vmem:[%s6365_s24 + $0x20] sm:$0xff] }
 0x369   : > { %4780 = vpow2.f32 %v3277_v41 }
 0x36a   : > { %4782 = vpow2.f32 %v3279_v15 }
 0x36b   : > { %4784 = vpow2.f32 %v3281_v34 }
 0x36f   : > { %v4781_v8 = vpop.eup %4780 }
 0x370   : > { %v4783_v14 = vpop.eup %4782 }
 0x371   : > { %v3039_v48 = vpop.permute.xlu0 %3038  ;;  %v3471_v53 = vadd.f32 %v4783_v14, %v4781_v8 }
 0x372   : > { %v3161_v1 = vsub.f32 %v5083_v54, %v3039_v48  ;;  %v3162_v7 = vsub.f32 %v5084_v60, %v3039_v48  ;;  %v3163_v27 = vsub.f32 %v5085_v5, %v3039_v48  ;;  %v3164_v19 = vsub.f32 %v8572_v10, %v3039_v48  ;;  %v4785_v60 = vpop.eup %4784  ;;  %v5088_v48 = vld [vmem:[%s6365_s24 + $0x28] sm:$0xff] }
 0x373   : > { %v3472_v10 = vadd.f32 %v4785_v60, %v3471_v53  ;;  %v8573_v53 = vld [vmem:[#allocation38_spill] sm:$0xff] }
 0x374   : > { %v3261_v41 = vmul.f32 1.442695, %v3161_v1  ;;  %v3263_v15 = vmul.f32 1.442695, %v3162_v7  ;;  %v3265_v59 = vmul.f32 1.442695, %v3163_v27 }
 0x375   : > { %v3267_v54 = vmul.f32 1.442695, %v3164_v19  ;;  %v5089_v27 = vld [vmem:[%s6365_s24 + $0xc8] sm:$0xff] }
 0x376   : > { %4786 = vpow2.f32 %v3261_v41 }
 0x377   : > { %4788 = vpow2.f32 %v3263_v15 }
 0x378   : > { %4790 = vpow2.f32 %v3283_v46  ;;  %v3044_v5 = vpop.permute.xlu1 %3043  ;;  %v5090_v46 = vld [vmem:[%s6365_s24 + $0x30] sm:$0xff] }
 0x379   : > { %4792 = vpow2.f32 %v3265_v59  ;;  %v3165_v34 = vsub.f32 %v5086_v3, %v3044_v5  ;;  %v3166_v1 = vsub.f32 %v5088_v48, %v3044_v5  ;;  %v3167_v19 = vsub.f32 %v5090_v46, %v3044_v5 }
 0x37a   : > { %4794 = vpow2.f32 %v3267_v54  ;;  %v3168_v60 = vsub.f32 %v8573_v53, %v3044_v5 }
 0x37b   : > { %v3269_v41 = vmul.f32 1.442695, %v3165_v34  ;;  %v3271_v3 = vmul.f32 1.442695, %v3166_v1 }
 0x37c   : > { %v4787_v7 = vpop.eup %4786 }
 0x37d   : > { %v4789_v14 = vpop.eup %4788  ;;  %4796 = vpow2.f32 %v3269_v41 }
 0x37e   : > { %v4791_v15 = vpop.eup %4790  ;;  %v3461_v28 = vadd.f32 %v4789_v14, %v4787_v7  ;;  %v5093_v7 = vld [vmem:[%s6365_s24 + $0x88] sm:$0xff] }
 0x37f   : > { %v4793_v58 = vpop.eup %4792 }
 0x380   : > { %v3462_v54 = vadd.f32 %v4793_v58, %v3461_v28  ;;  %v3059_v46 = vpop.permute.xlu1 %3058  ;;  %v4795_v34 = vpop.eup %4794  ;;  %v3275_v28 = vmul.f32 1.442695, %v3168_v60  ;;  %v5096_v60 = vld [vmem:[%s6365_s24 + $0x68] sm:$0xff] }
 0x381   : > { %v3069_v32 = vpop.permute.xlu2 %3068  ;;  %v3178_v14 = vsub.f32 %v5093_v7, %v3059_v46  ;;  %v3179_v1 = vsub.f32 %v5094_v40, %v3059_v46  ;;  %v5098_v7 = vld [vmem:[%s6365_s24 + $0x120] sm:$0xff] }
 0x382   : > { %v3185_v61 = vsub.f32 %v5087_v43, %v3069_v32  ;;  %v3186_v8 = vsub.f32 %v5089_v27, %v3069_v32  ;;  %v3473_v43 = vadd.f32 %v4791_v15, %v3472_v10  ;;  %v3187_v6 = vsub.f32 %v5091_v2, %v3069_v32 }
 0x383   : > { %v3273_v27 = vmul.f32 1.442695, %v3167_v19  ;;  %v3188_v10 = vsub.f32 %v7104_v24, %v3069_v32  ;;  %v3295_v2 = vmul.f32 1.442695, %v3178_v14  ;;  %v3180_v19 = vsub.f32 %v6989_v55, %v3059_v46  ;;  %v4797_v15 = vpop.eup %4796 }
 0x384   : > { %v3309_v59 = vmul.f32 1.442695, %v3185_v61  ;;  %v3311_v48 = vmul.f32 1.442695, %v3186_v8  ;;  %v5092_v61 = vld [vmem:[%s6365_s24 + $0x80] sm:$0xff]  ;;  %v3463_v8 = vadd.f32 %v4795_v34, %v3462_v54 }
 0x385   : > { %v3177_v12 = vsub.f32 %v5092_v61, %v3059_v46  ;;  %v3313_v5 = vmul.f32 1.442695, %v3187_v6  ;;  %v3297_v41 = vmul.f32 1.442695, %v3179_v1  ;;  %v3315_v24 = vmul.f32 1.442695, %v3188_v10 }
 0x386   : > { %4798 = vpow2.f32 %v3309_v59  ;;  %3464 = vadd.xlane.f32.xlu1 %v3463_v8  ;;  %v3299_v6 = vmul.f32 1.442695, %v3180_v19  ;;  %v5099_v1 = vld [vmem:[%s6365_s24 + $0x128] sm:$0xff]  ;;  %v5100_v8 = vld [vmem:[%s6365_s24 + $0x130] sm:$0xff] }
 0x387   : > { %4800 = vpow2.f32 %v3271_v3  ;;  %v3293_v58 = vmul.f32 1.442695, %v3177_v12 }
 0x388   : > { %3474 = vadd.xlane.f32.xlu2 %v3473_v43  ;;  %4802 = vpow2.f32 %v3311_v48  ;;  %v5095_v48 = vld [vmem:[%s6365_s24 + $0x60] sm:$0xff] }
 0x389   : > { %4804 = vpow2.f32 %v3273_v27  ;;  %v5097_v27 = vld [vmem:[%s6365_s24 + $0x70] sm:$0xff] }
 0x38a   : > { %4806 = vpow2.f32 %v3293_v58 }
 0x38b   : > { %4808 = vpow2.f32 %v3295_v2 }
 0x38c   : > { %v7677_v40 = vpop.eup %4798  ;;  %4810 = vpow2.f32 %v3275_v28 }
 0x38d   : > { %v4801_v32 = vpop.eup %4800  ;;  %4812 = vpow2.f32 %v3313_v5 }
 0x38e   : > { %v7679_v12 = vpop.eup %4802  ;;  %4814 = vpow2.f32 %v3297_v41  ;;  %v3466_v3 = vadd.f32 %v4801_v32, %v4797_v15 }
 0x38f   : > { %v4805_v43 = vpop.eup %4804  ;;  %4816 = vpow2.f32 %v3315_v24 }
 0x390   : > { %v4807_v61 = vpop.eup %4806  ;;  %v3467_v41 = vadd.f32 %v4805_v43, %v3466_v3  ;;  %4818 = vpow2.f32 %v3299_v6 }
 0x391   : > { %v3054_v55 = vpop.permute.xlu0 %3053  ;;  %v3084_v59 = vpop.permute.xlu2 %3083 }
 0x392   : > { %v3173_v53 = vsub.f32 %v5095_v48, %v3054_v55  ;;  %v3174_v54 = vsub.f32 %v5096_v60, %v3054_v55  ;;  %v3175_v46 = vsub.f32 %v5097_v27, %v3054_v55  ;;  %v3176_v34 = vsub.f32 %v7052_v51, %v3054_v55  ;;  %v4809_v58 = vpop.eup %4808 }
 0x393   : > { %v3197_v14 = vsub.f32 %v5098_v7, %v3084_v59  ;;  %v3198_v10 = vsub.f32 %v5099_v1, %v3084_v59  ;;  %v3199_v28 = vsub.f32 %v5100_v8, %v3084_v59  ;;  %v4811_v15 = vpop.eup %4810  ;;  %v3200_v48 = vsub.f32 %v7209_v9, %v3084_v59 }
 0x394   : > { %v3285_v2 = vmul.f32 1.442695, %v3173_v53  ;;  %v3287_v5 = vmul.f32 1.442695, %v3174_v54  ;;  %v3289_v19 = vmul.f32 1.442695, %v3175_v46  ;;  %v3481_v60 = vadd.f32 %v4809_v58, %v4807_v61  ;;  %v7689_v51 = vpop.eup %4812 }
 0x395   : > { %v3291_v32 = vmul.f32 1.442695, %v3176_v34  ;;  %v3333_v24 = vmul.f32 1.442695, %v3197_v14  ;;  %v3468_v55 = vadd.f32 %v4811_v15, %v3467_v41  ;;  %v4815_v27 = vpop.eup %4814  ;;  %v3335_v53 = vmul.f32 1.442695, %v3198_v10 }
 0x396   : > { %4820 = vpow2.f32 %v3285_v2  ;;  %v3337_v54 = vmul.f32 1.442695, %v3199_v28  ;;  %v7691_v3 = vpop.eup %4816  ;;  %v3339_v9 = vmul.f32 1.442695, %v3200_v48  ;;  %v3482_v43 = vadd.f32 %v4815_v27, %v3481_v60  ;;  %v5101_v46 = vld [vmem:[%s6365_s24 + $0xa0] sm:$0xff]  ;;  %v5102_v61 = vld [vmem:[%s6365_s24 + $0xa8] sm:$0xff] }
 0x397   : > { %4822 = vpow2.f32 %v3287_v5  ;;  %3469 = vadd.xlane.f32.xlu0 %v3468_v55  ;;  %v5103_v14 = vld [vmem:[%s6365_s24 + $0xb0] sm:$0xff]  ;;  %v4819_v10 = vpop.eup %4818  ;;  %v5104_v28 = vld [vmem:[%s6365_s24 + $0x180] sm:$0xff]  ;;  %v5105_v2 = vld [vmem:[%s6365_s24 + $0x188] sm:$0xff] }
 0x398   : > { %4824 = vpow2.f32 %v3289_v19  ;;  %v3074_v19 = vpop.permute.xlu1 %3073  ;;  %v5106_v55 = vld [vmem:[%s6365_s24 + $0x190] sm:$0xff] }
 0x399   : > { %4826 = vpow2.f32 %v3291_v32  ;;  %v3064_v6 = vpop.permute.xlu0 %3063  ;;  %v3099_v59 = vpop.permute.xlu2 %3098 }
 0x39a   : > { %4828 = vpow2.f32 %v3333_v24  ;;  %v3181_v34 = vsub.f32 %v5101_v46, %v3064_v6  ;;  %v3182_v7 = vsub.f32 %v5102_v61, %v3064_v6  ;;  %v3183_v1 = vsub.f32 %v5103_v14, %v3064_v6  ;;  %v5107_v46 = vld [vmem:[%s6365_s24 + $0xe0] sm:$0xff] }
 0x39b   : > { %4830 = vpow2.f32 %v3335_v53  ;;  %v3184_v8 = vsub.f32 %v6994_v33, %v3064_v6  ;;  %v3209_v58 = vsub.f32 %v5104_v28, %v3099_v59  ;;  %v3210_v5 = vsub.f32 %v5105_v2, %v3099_v59 }
 0x39c   : > { %v7699_v41 = vpop.eup %4820  ;;  %4832 = vpow2.f32 %v3337_v54  ;;  %v3301_v15 = vmul.f32 1.442695, %v3181_v34  ;;  %v3303_v32 = vmul.f32 1.442695, %v3182_v7  ;;  %v3305_v48 = vmul.f32 1.442695, %v3183_v1 }
 0x39d   : > { %v7701_v60 = vpop.eup %4822  ;;  %4834 = vpow2.f32 %v3339_v9  ;;  %v3307_v24 = vmul.f32 1.442695, %v3184_v8  ;;  %v3211_v33 = vsub.f32 %v5106_v55, %v3099_v59  ;;  %v3212_v27 = vsub.f32 %v7261_v52, %v3099_v59  ;;  %v5108_v7 = vld [vmem:[%s6365_s24 + $0xe8] sm:$0xff]  ;;  %v5109_v8 = vld [vmem:[%s6365_s24 + $0xf0] sm:$0xff] }
 0x39e   : > { %v7705_v53 = vpop.eup %4824  ;;  %4836 = vpow2.f32 %v3301_v15  ;;  %v3357_v6 = vmul.f32 1.442695, %v3209_v58  ;;  %v3189_v61 = vsub.f32 %v5107_v46, %v3074_v19  ;;  %v3359_v34 = vmul.f32 1.442695, %v3210_v5 }
 0x39f   : > { %v7708_v54 = vpop.eup %4826  ;;  %4838 = vpow2.f32 %v3303_v32  ;;  %v3190_v14 = vsub.f32 %v5108_v7, %v3074_v19  ;;  %v3361_v1 = vmul.f32 1.442695, %v3211_v33  ;;  %v3191_v28 = vsub.f32 %v5109_v8, %v3074_v19 }
 0x3a0   : > { %v7711_v9 = vpop.eup %4828  ;;  %4840 = vpow2.f32 %v3305_v48  ;;  %v3363_v59 = vmul.f32 1.442695, %v3212_v27  ;;  %v3192_v58 = vsub.f32 %v7094_v62, %v3074_v19  ;;  %v3483_v2 = vadd.f32 %v4819_v10, %v3482_v43  ;;  %v5110_v48 = vld [vmem:[%s6365_s24 + $0x100] sm:$0xff]  ;;  %v5112_v10 = vld [vmem:[%s6365_s24 + $0x110] sm:$0xff] }
 0x3a1   : > { %v7714_v52 = vpop.eup %4830  ;;  %4842 = vpow2.f32 %v3307_v24  ;;  %v3079_v15 = vpop.permute.xlu0 %3078  ;;  %v3317_v55 = vmul.f32 1.442695, %v3189_v61  ;;  %v3319_v7 = vmul.f32 1.442695, %v3190_v14  ;;  %v5111_v24 = vld [vmem:[%s6365_s24 + $0x108] sm:$0xff]  ;;  %v5113_v14 = vld [vmem:[%s6365_s24 + $0x1e0] sm:$0xff] }
 0x3a2   : > { %v7717_v5 = vpop.permute.xlu2 %3113  ;;  %v7719_v32 = vpop.eup %4832  ;;  %4844 = vpow2.f32 %v3357_v6  ;;  %v3193_v33 = vsub.f32 %v5110_v48, %v3079_v15  ;;  %3484 = vadd.xlane.f32.xlu0 %v3483_v2  ;;  %v3194_v27 = vsub.f32 %v5111_v24, %v3079_v15  ;;  %v3321_v43 = vmul.f32 1.442695, %v3191_v28  ;;  %v5114_v24 = vld [vmem:[%s6365_s24 + $0x1e8] sm:$0xff] }
 0x3a3   : > { %v7722_v46 = vpop.eup %4834  ;;  %4846 = vpow2.f32 %v3359_v34  ;;  %v3195_v19 = vsub.f32 %v5112_v10, %v3079_v15  ;;  %v3323_v6 = vmul.f32 1.442695, %v3192_v58  ;;  %v3196_v61 = vsub.f32 %v7042_v18, %v3079_v15  ;;  %v3089_v10 = vpop.permute.xlu1 %3088  ;;  %v5115_v58 = vld [vmem:[%s6365_s24 + $0x1f0] sm:$0xff] }
 0x3a4   : > { %v4837_v62 = vpop.eup %4836  ;;  %4848 = vpow2.f32 %v3361_v1  ;;  %v3325_v34 = vmul.f32 1.442695, %v3193_v33  ;;  %v3221_v2 = vsub.f32 %v5113_v14, %v7717_v5  ;;  %v3327_v1 = vmul.f32 1.442695, %v3194_v27 }
 0x3a5   : > { %v4839_v8 = vpop.eup %4838  ;;  %4850 = vpow2.f32 %v3363_v59  ;;  %v3222_v28 = vsub.f32 %v5114_v24, %v7717_v5  ;;  %v3329_v18 = vmul.f32 1.442695, %v3195_v19  ;;  %v3223_v15 = vsub.f32 %v5115_v58, %v7717_v5  ;;  %v5116_v58 = vld [vmem:[%s6365_s24 + $0x140] sm:$0xff] }
 0x3a6   : > { %v4841_v48 = vpop.eup %4840  ;;  %4852 = vpow2.f32 %v3317_v55  ;;  %v3491_v55 = vadd.f32 %v7679_v12, %v7677_v40  ;;  %v3224_v27 = vsub.f32 %v7299_v30, %v7717_v5  ;;  %v3476_v14 = vadd.f32 %v7701_v60, %v7699_v41  ;;  %v5117_v40 = vld [vmem:[%s6365_s24 + $0x148] sm:$0xff] }
 0x3a7   : > { %v7729_v44 = vpop.eup %4842  ;;  %4854 = vpow2.f32 %v3319_v7  ;;  %v3331_v7 = vmul.f32 1.442695, %v3196_v61  ;;  %v3381_v19 = vmul.f32 1.442695, %v3221_v2  ;;  %v3201_v17 = vsub.f32 %v5116_v58, %v3089_v10 }
 0x3a8   : > { %v7733_v59 = vpop.eup %4844  ;;  %4856 = vpow2.f32 %v3321_v43  ;;  %v3202_v12 = vsub.f32 %v5117_v40, %v3089_v10  ;;  %v3383_v30 = vmul.f32 1.442695, %v3222_v28  ;;  %v3477_v5 = vadd.f32 %v7705_v53, %v3476_v14 }
 0x3a9   : > { %v7739_v33 = vpop.eup %4846  ;;  %4858 = vpow2.f32 %v3323_v6  ;;  %v7745_v24 = vpop.permute.xlu0 %3093  ;;  %v3486_v41 = vadd.f32 %v4839_v8, %v4837_v62  ;;  %v3385_v61 = vmul.f32 1.442695, %v3223_v15  ;;  %v3204_v58 = vsub.f32 %v7147_v11, %v3089_v10  ;;  %v5119_v62 = vld [vmem:[%s6365_s24 + $0x160] sm:$0xff] }
 0x3aa   : > { %v7747_v43 = vpop.eup %4848  ;;  %4860 = vpow2.f32 %v3325_v34  ;;  %v7751_v21 = vpop.permute.xlu2 %3128  ;;  %v5118_v34 = vld [vmem:[%s6365_s24 + $0x150] sm:$0xff]  ;;  %v3387_v40 = vmul.f32 1.442695, %v3224_v27  ;;  %v3478_v36 = vadd.f32 %v7708_v54, %v3477_v5  ;;  %v3341_v53 = vmul.f32 1.442695, %v3201_v17 }
 0x3ab   : > { %v7753_v6 = vpop.eup %4850  ;;  %4862 = vpow2.f32 %v3327_v1  ;;  %v3203_v2 = vsub.f32 %v5118_v34, %v3089_v10  ;;  %v3492_v1 = vadd.f32 %v7689_v51, %v3491_v55  ;;  %v3205_v8 = vsub.f32 %v5119_v62, %v7745_v24  ;;  %v5121_v27 = vld [vmem:[%s6365_s24 + $0x170] sm:$0xff] }
 0x3ac   : > { %v4853_v60 = vpop.eup %4852  ;;  %4864 = vpow2.f32 %v3329_v18  ;;  %v5120_v18 = vld [vmem:[%s6365_s24 + $0x168] sm:$0xff]  ;;  %v3343_v11 = vmul.f32 1.442695, %v3202_v12  ;;  %3479 = vadd.xlane.f32.xlu1 %v3478_v36  ;;  %v3487_v10 = vadd.f32 %v4841_v48, %v3486_v41  ;;  %v3347_v55 = vmul.f32 1.442695, %v3204_v58  ;;  %v5122_v41 = vld [vmem:[%s6365_s24 + $0x240] sm:$0xff] }
 0x3ad   : > { %v4855_v38 = vpop.eup %4854  ;;  %4866 = vpow2.f32 %v3331_v7  ;;  %v3206_v15 = vsub.f32 %v5120_v18, %v7745_v24  ;;  %v3345_v51 = vmul.f32 1.442695, %v3203_v2  ;;  %v3207_v17 = vsub.f32 %v5121_v27, %v7745_v24  ;;  %v5123_v2 = vld [vmem:[%s6365_s24 + $0x248] sm:$0xff] }
 0x3ae   : > { %v4857_v28 = vpop.eup %4856  ;;  %4868 = vpow2.f32 %v3381_v19  ;;  %v3496_v7 = vadd.f32 %v4855_v38, %v4853_v60  ;;  %v3488_v36 = vadd.f32 %v7729_v44, %v3487_v10  ;;  %v3349_v12 = vmul.f32 1.442695, %v3205_v8 }
 0x3af   : > { %v4859_v14 = vpop.eup %4858  ;;  %4870 = vpow2.f32 %v3383_v30  ;;  %v3208_v30 = vsub.f32 %v7152_v35, %v7745_v24  ;;  %v3351_v5 = vmul.f32 1.442695, %v3206_v15  ;;  %v3233_v60 = vsub.f32 %v5122_v41, %v7751_v21  ;;  %v5124_v35 = vld [vmem:[%s6365_s24 + $0x250] sm:$0xff]  ;;  %v5128_v41 = vld [vmem:[%s6365_s24 + $0x1a0] sm:$0xff] }
 0x3b0   : > { %v7764_v54 = vpop.eup %4860  ;;  %4872 = vpow2.f32 %v3385_v61  ;;  %v3497_v48 = vadd.f32 %v4857_v28, %v3496_v7  ;;  %v3234_v58 = vsub.f32 %v5123_v2, %v7751_v21  ;;  %v3235_v44 = vsub.f32 %v5124_v35, %v7751_v21  ;;  %3489 = vadd.xlane.f32.xlu2 %v3488_v36 }
 0x3b1   : > { %v4863_v19 = vpop.eup %4862  ;;  %4874 = vpow2.f32 %v3387_v40  ;;  %v3109_v61 = vpop.permute.xlu0 %3108  ;;  %v3353_v28 = vmul.f32 1.442695, %v3207_v17  ;;  %v3355_v18 = vmul.f32 1.442695, %v3208_v30  ;;  %v3493_v15 = vadd.f32 %v7691_v3, %v3492_v1  ;;  %v5127_v17 = vld [vmem:[%s6365_s24 + $0x1d0] sm:$0xff] }
 0x3b2   : > { %v7771_v38 = vpop.eup %4864  ;;  %4876 = vpow2.f32 %v3341_v53  ;;  %v3498_v24 = vadd.f32 %v4859_v14, %v3497_v48  ;;  %v3236_v53 = vsub.f32 %v7327_v25, %v7751_v21  ;;  %v7785_v62 = vpop.permute.xlu2 %3143  ;;  %v5126_v25 = vld [vmem:[%s6365_s24 + $0x1c8] sm:$0xff]  ;;  %v3506_v27 = vadd.f32 %v7714_v52, %v7711_v9  ;;  %v5129_v52 = vld [vmem:[%s6365_s24 + $0x2a0] sm:$0xff] }
 0x3b3   : > { %v7775_v34 = vpop.eup %4866  ;;  %4878 = vpow2.f32 %v3343_v11  ;;  %v5125_v11 = vld [vmem:[%s6365_s24 + $0x1c0] sm:$0xff]  ;;  %v7791_v10 = vpop.permute.xlu1 %3103  ;;  %v3218_v21 = vsub.f32 %v5126_v25, %v3109_v61  ;;  %v3407_v3 = vmul.f32 1.442695, %v3234_v58  ;;  %v3409_v1 = vmul.f32 1.442695, %v3235_v44  ;;  %v5131_v25 = vld [vmem:[%s6365_s24 + $0x2b0] sm:$0xff] }
 0x3b4   : > { %v7781_v40 = vpop.eup %4868  ;;  %4880 = vpow2.f32 %v3345_v51  ;;  %3499 = vadd.xlane.f32.xlu0 %v3498_v24  ;;  %v3217_v14 = vsub.f32 %v5125_v11, %v3109_v61  ;;  %v3405_v51 = vmul.f32 1.442695, %v3233_v60  ;;  %3494 = vadd.xlane.f32.xlu1 %v3493_v15  ;;  %v3219_v30 = vsub.f32 %v5127_v17, %v3109_v61  ;;  %v5132_v17 = vld [vmem:[%s6365_s24 + $0x1a8] sm:$0xff] }
 0x3b5   : > { %v7787_v8 = vpop.eup %4870  ;;  %4882 = vpow2.f32 %v3347_v55  ;;  %v3411_v48 = vmul.f32 1.442695, %v3236_v53  ;;  %v3213_v60 = vsub.f32 %v5128_v41, %v7791_v10  ;;  %v3501_v58 = vadd.f32 %v4863_v19, %v7764_v54  ;;  %v5130_v53 = vld [vmem:[%s6365_s24 + $0x2a8] sm:$0xff] }
 0x3b6   : > { %v7793_v7 = vpop.eup %4872  ;;  %4884 = vpow2.f32 %v3349_v12  ;;  %v3220_v12 = vsub.f32 %v7199_v42, %v3109_v61  ;;  %v3373_v9 = vmul.f32 1.442695, %v3217_v14  ;;  %v3375_v44 = vmul.f32 1.442695, %v3218_v21 }
 0x3b7   : > { %v7798_v55 = vpop.eup %4874  ;;  %4886 = vpow2.f32 %v3351_v5  ;;  %v3245_v5 = vsub.f32 %v5129_v52, %v7785_v62  ;;  %v3507_v24 = vadd.f32 %v7719_v32, %v3506_v27  ;;  %v3377_v61 = vmul.f32 1.442695, %v3219_v30 }
 0x3b8   : > { %v4877_v36 = vpop.eup %4876  ;;  %4888 = vpow2.f32 %v3353_v28  ;;  %v3246_v15 = vsub.f32 %v5130_v53, %v7785_v62  ;;  %v3379_v14 = vmul.f32 1.442695, %v3220_v12  ;;  %v3247_v54 = vsub.f32 %v5131_v25, %v7785_v62 }
 0x3b9   : > { %v4879_v2 = vpop.eup %4878  ;;  %4890 = vpow2.f32 %v3355_v18  ;;  %v3502_v18 = vadd.f32 %v7771_v38, %v3501_v58  ;;  %v3248_v32 = vsub.f32 %v7355_v57, %v7785_v62  ;;  %v3508_v27 = vadd.f32 %v7722_v46, %v3507_v24 }
 0x3ba   : > { %v4881_v35 = vpop.eup %4880  ;;  %4892 = vpow2.f32 %v3405_v51  ;;  %v3511_v28 = vadd.f32 %v4879_v2, %v4877_v36  ;;  %v3429_v38 = vmul.f32 1.442695, %v3245_v5  ;;  %v3159_v36 = vpop.permute.xlu2 %3158  ;;  %v5133_v2 = vld [vmem:[%s6365_s24 + $0x1b0] sm:$0xff]  ;;  %v3216_v62 = vsub.f32 %v7252_v31, %v7791_v10  ;;  %v5134_v5 = vld [vmem:[%s6365_s24 + $0x300] sm:$0xff] }
 0x3bb   : > { %v4883_v42 = vpop.eup %4882  ;;  %4894 = vpow2.f32 %v3407_v3  ;;  %v3503_v21 = vadd.f32 %v7775_v34, %v3502_v18  ;;  %v3215_v57 = vsub.f32 %v5133_v2, %v7791_v10  ;;  %v3433_v34 = vmul.f32 1.442695, %v3247_v54 }
 0x3bc   : > { %v4885_v11 = vpop.eup %4884  ;;  %4896 = vpow2.f32 %v3409_v1  ;;  %v3512_v19 = vadd.f32 %v4881_v35, %v3511_v28  ;;  %v3214_v1 = vsub.f32 %v5132_v17, %v7791_v10  ;;  %v7819_v12 = vpop.permute.xlu0 %3123  ;;  %3509 = vadd.xlane.f32.xlu1 %v3508_v27  ;;  %v3435_v52 = vmul.f32 1.442695, %v3248_v32  ;;  %v5136_v10 = vld [vmem:[%s6365_s24 + $0x310] sm:$0xff]  ;;  %v5138_v17 = vld [vmem:[%s6365_s24 + $0x228] sm:$0xff] }
 0x3bd   : > { %v4887_v51 = vpop.eup %4886  ;;  %4898 = vpow2.f32 %v3411_v48  ;;  %v3431_v48 = vmul.f32 1.442695, %v3246_v15  ;;  %3504 = vadd.xlane.f32.xlu2 %v3503_v21  ;;  %v3257_v58 = vsub.f32 %v5134_v5, %v3159_v36  ;;  %v3259_v53 = vsub.f32 %v5136_v10, %v3159_v36  ;;  %v7836_v15 = vpop.permute.xlu1 %3118  ;;  %v5137_v21 = vld [vmem:[%s6365_s24 + $0x220] sm:$0xff] }
 0x3be   : > { %v4889_v3 = vpop.eup %4888  ;;  %4900 = vpow2.f32 %v3373_v9  ;;  %v3513_v30 = vadd.f32 %v4883_v42, %v3512_v19  ;;  %v3367_v24 = vmul.f32 1.442695, %v3214_v1  ;;  %v3369_v42 = vmul.f32 1.442695, %v3215_v57  ;;  %v5140_v5 = vld [vmem:[%s6365_s24 + $0x200] sm:$0xff] }
 0x3bf   : > { %v4891_v41 = vpop.eup %4890  ;;  %4902 = vpow2.f32 %v3375_v44  ;;  %v3365_v44 = vmul.f32 1.442695, %v3213_v60  ;;  %v3516_v25 = vadd.f32 %v4887_v51, %v4885_v11  ;;  %v3521_v60 = vadd.f32 %v7739_v33, %v7733_v59 }
 0x3c0   : > { %v7823_v46 = vpop.eup %4892  ;;  %4904 = vpow2.f32 %v3377_v61  ;;  %3514 = vadd.xlane.f32.xlu0 %v3513_v30  ;;  %v5135_v61 = vld [vmem:[%s6365_s24 + $0x308] sm:$0xff]  ;;  %v3260_v19 = vsub.f32 %v7372_v39, %v3159_v36  ;;  %v3453_v32 = vmul.f32 1.442695, %v3257_v58  ;;  %v3229_v27 = vsub.f32 %v5137_v21, %v7819_v12 }
 0x3c1   : > { %v7827_v9 = vpop.eup %4894  ;;  %4906 = vpow2.f32 %v3379_v14  ;;  %v3258_v31 = vsub.f32 %v5135_v61, %v3159_v36  ;;  %v3371_v14 = vmul.f32 1.442695, %v3216_v62  ;;  %v3230_v1 = vsub.f32 %v5138_v17, %v7819_v12  ;;  %v5142_v61 = vld [vmem:[%s6365_s24 + $0x210] sm:$0xff] }
 0x3c2   : > { %v7830_v35 = vpop.eup %4896  ;;  %4908 = vpow2.f32 %v3429_v38  ;;  %v3517_v30 = vadd.f32 %v4889_v3, %v3516_v25  ;;  %v3522_v11 = vadd.f32 %v7747_v43, %v3521_v60  ;;  %v3457_v33 = vmul.f32 1.442695, %v3259_v53 }
 0x3c3   : > { %v7832_v28 = vpop.eup %4898  ;;  %4910 = vpow2.f32 %v3431_v48  ;;  %v3455_v59 = vmul.f32 1.442695, %v3258_v31  ;;  %v5139_v48 = vld [vmem:[%s6365_s24 + $0x230] sm:$0xff]  ;;  %v3232_v2 = vsub.f32 %v7294_v22, %v7819_v12  ;;  %v3459_v62 = vmul.f32 1.442695, %v3260_v19 }
 0x3c4   : > { %v4901_v18 = vpop.eup %4900  ;;  %4912 = vpow2.f32 %v3433_v34  ;;  %v3231_v39 = vsub.f32 %v5139_v48, %v7819_v12  ;;  %v3518_v57 = vadd.f32 %v4891_v41, %v3517_v30  ;;  %v3523_v3 = vadd.f32 %v7753_v6, %v3522_v11  ;;  %v7853_v34 = vpop.permute.xlu0 %3138  ;;  %v5145_v11 = vld [vmem:[%s6365_s24 + $0x290] sm:$0xff] }
 0x3c5   : > { %v4903_v54 = vpop.eup %4902  ;;  %4914 = vpow2.f32 %v3435_v52  ;;  %v3397_v52 = vmul.f32 1.442695, %v3229_v27  ;;  %v3225_v58 = vsub.f32 %v5140_v5, %v7836_v15  ;;  %v3227_v31 = vsub.f32 %v5142_v61, %v7836_v15  ;;  %v7873_v21 = vpop.permute.xlu1 %3133  ;;  %v5147_v5 = vld [vmem:[%s6365_s24 + $0x268] sm:$0xff] }
 0x3c6   : > { %v4905_v38 = vpop.eup %4904  ;;  %4916 = vpow2.f32 %v3365_v44  ;;  %3519 = vadd.xlane.f32.xlu2 %v3518_v57  ;;  %3524 = vadd.xlane.f32.xlu1 %v3523_v3  ;;  %v3531_v6 = vadd.f32 %v4903_v54, %v4901_v18  ;;  %v3401_v41 = vmul.f32 1.442695, %v3231_v39  ;;  %v3536_v10 = vadd.f32 %v7787_v8, %v7781_v40  ;;  %v5143_v54 = vld [vmem:[%s6365_s24 + $0x280] sm:$0xff] }
 0x3c7   : > { %v4907_v51 = vpop.eup %4906  ;;  %4918 = vpow2.f32 %v3367_v24  ;;  %v3399_v24 = vmul.f32 1.442695, %v3230_v1  ;;  %v3228_v25 = vsub.f32 %v7289_v63, %v7836_v15  ;;  %v3389_v18 = vmul.f32 1.442695, %v3225_v58 }
 0x3c8   : > { %v7848_v36 = vpop.eup %4908  ;;  %4920 = vpow2.f32 %v3369_v42  ;;  %v5141_v42 = vld [vmem:[%s6365_s24 + $0x208] sm:$0xff]  ;;  %v3532_v60 = vadd.f32 %v4905_v38, %v3531_v6  ;;  %v3537_v27 = vadd.f32 %v7793_v7, %v3536_v10  ;;  %v3393_v63 = vmul.f32 1.442695, %v3227_v31 }
 0x3c9   : > { %v7855_v43 = vpop.eup %4910  ;;  %4922 = vpow2.f32 %v3371_v14  ;;  %v3226_v22 = vsub.f32 %v5141_v42, %v7836_v15  ;;  %v3403_v14 = vmul.f32 1.442695, %v3232_v2  ;;  %v5144_v15 = vld [vmem:[%s6365_s24 + $0x288] sm:$0xff]  ;;  %v3244_v7 = vsub.f32 %v7322_v16, %v7853_v34  ;;  %v5148_v42 = vld [vmem:[%s6365_s24 + $0x270] sm:$0xff] }
 0x3ca   : > { %v7859_v44 = vpop.eup %4912  ;;  %4924 = vpow2.f32 %v3453_v32  ;;  %v3241_v32 = vsub.f32 %v5143_v54, %v7853_v34  ;;  %v3533_v17 = vadd.f32 %v4907_v51, %v3532_v60  ;;  %v3242_v38 = vsub.f32 %v5144_v15, %v7853_v34 }
 0x3cb   : > { %v7863_v12 = vpop.eup %4914  ;;  %4926 = vpow2.f32 %v3455_v59  ;;  %v3391_v8 = vmul.f32 1.442695, %v3226_v22  ;;  %v3243_v59 = vsub.f32 %v5145_v11, %v7853_v34  ;;  %v3538_v51 = vadd.f32 %v7798_v55, %v3537_v27  ;;  %v5150_v27 = vld [vmem:[%s6365_s24 + $0x2e8] sm:$0xff] }
 0x3cc   : > { %v4917_v53 = vpop.eup %4916  ;;  %4928 = vpow2.f32 %v3457_v33  ;;  %v3395_v2 = vmul.f32 1.442695, %v3228_v25  ;;  %v3421_v57 = vmul.f32 1.442695, %v3241_v32  ;;  %v3238_v58 = vsub.f32 %v5147_v5, %v7873_v21  ;;  %v3154_v55 = vpop.permute.xlu0 %3153 }
 0x3cd   : > { %v4919_v19 = vpop.eup %4918  ;;  %4930 = vpow2.f32 %v3459_v62  ;;  %v5146_v62 = vld [vmem:[%s6365_s24 + $0x260] sm:$0xff]  ;;  %v3239_v22 = vsub.f32 %v5148_v42, %v7873_v21  ;;  %v3551_v6 = vadd.f32 %v7827_v9, %v7823_v46  ;;  %v3425_v61 = vmul.f32 1.442695, %v3243_v59 }
 0x3ce   : > { %v4921_v40 = vpop.eup %4920  ;;  %4932 = vpow2.f32 %v3397_v52  ;;  %v3526_v1 = vadd.f32 %v4919_v19, %v4917_v53  ;;  %v3237_v52 = vsub.f32 %v5146_v62, %v7873_v21  ;;  %3534 = vadd.xlane.f32.xlu2 %v3533_v17  ;;  %3539 = vadd.xlane.f32.xlu1 %v3538_v51  ;;  %v3427_v31 = vmul.f32 1.442695, %v3244_v7  ;;  %v5152_v7 = vld [vmem:[%s6365_s24 + $0x2c0] sm:$0xff]  ;;  %v5153_v62 = vld [vmem:[%s6365_s24 + $0x2c8] sm:$0xff] }
 0x3cf   : > { %v4923_v30 = vpop.eup %4922  ;;  %4934 = vpow2.f32 %v3399_v24  ;;  %v3423_v24 = vmul.f32 1.442695, %v3242_v38  ;;  %v3240_v53 = vsub.f32 %v7317_v29, %v7873_v21  ;;  %v3552_v60 = vadd.f32 %v7830_v35, %v3551_v6 }
 0x3d0   : > { %v7880_v33 = vpop.eup %4924  ;;  %4936 = vpow2.f32 %v3401_v41  ;;  %v3527_v48 = vadd.f32 %v4921_v40, %v3526_v1  ;;  %v3415_v46 = vmul.f32 1.442695, %v3238_v58  ;;  %v3417_v32 = vmul.f32 1.442695, %v3239_v22  ;;  %v3149_v1 = vpop.permute.xlu1 %3148 }
 0x3d1   : > { %v7885_v39 = vpop.eup %4926  ;;  %4938 = vpow2.f32 %v3403_v14  ;;  %v5149_v14 = vld [vmem:[%s6365_s24 + $0x2e0] sm:$0xff]  ;;  %v3254_v40 = vsub.f32 %v5150_v27, %v3154_v55  ;;  %v3553_v29 = vadd.f32 %v7832_v28, %v3552_v60  ;;  %v3566_v35 = vadd.f32 %v7855_v43, %v7848_v36 }
 0x3d2   : > { %v7887_v3 = vpop.eup %4928  ;;  %4940 = vpow2.f32 %v3389_v18  ;;  %v3528_v16 = vadd.f32 %v4923_v30, %v3527_v48  ;;  %v3253_v25 = vsub.f32 %v5149_v14, %v3154_v55  ;;  %v3413_v18 = vmul.f32 1.442695, %v3237_v52 }
 0x3d3   : > { %v7893_v34 = vpop.eup %4930  ;;  %4942 = vpow2.f32 %v3391_v8  ;;  %v5151_v8 = vld [vmem:[%s6365_s24 + $0x2f0] sm:$0xff]  ;;  %v3419_v15 = vmul.f32 1.442695, %v3240_v53  ;;  %v3256_v38 = vsub.f32 %v7350_v4, %v3154_v55  ;;  %v3249_v51 = vsub.f32 %v5152_v7, %v3149_v1 }
 0x3d4   : > { %v4933_v41 = vpop.eup %4932  ;;  %4944 = vpow2.f32 %v3393_v63  ;;  %3529 = vadd.xlane.f32.xlu0 %v3528_v16  ;;  %v3255_v17 = vsub.f32 %v5151_v8, %v3154_v55  ;;  %v3445_v11 = vmul.f32 1.442695, %v3253_v25  ;;  %v3250_v36 = vsub.f32 %v5153_v62, %v3149_v1  ;;  %v5154_v55 = vld [vmem:[%s6365_s24 + $0x2d0] sm:$0xff] }
 0x3d5   : > { %v4935_v10 = vpop.eup %4934  ;;  %4946 = vpow2.f32 %v3395_v2  ;;  %v3567_v4 = vadd.f32 %v7859_v44, %v3566_v35  ;;  %v3451_v16 = vmul.f32 1.442695, %v3256_v38  ;;  %v3437_v22 = vmul.f32 1.442695, %v3249_v51 }
 0x3d6   : > { %v4937_v19 = vpop.eup %4936  ;;  %4948 = vpow2.f32 %v3421_v57  ;;  %v3546_v9 = vadd.f32 %v4935_v10, %v4933_v41  ;;  %3554 = vadd.xlane.f32.xlu1 %v3553_v29  ;;  %v3447_v57 = vmul.f32 1.442695, %v3254_v40  ;;  %v3449_v52 = vmul.f32 1.442695, %v3255_v17 }
 0x3d7   : > { %v4939_v54 = vpop.eup %4938  ;;  %4950 = vpow2.f32 %v3423_v24  ;;  %v3251_v24 = vsub.f32 %v5154_v55, %v3149_v1  ;;  %v3439_v10 = vmul.f32 1.442695, %v3250_v36  ;;  %v3568_v44 = vadd.f32 %v7863_v12, %v3567_v4  ;;  %v2911_v36 = vld [vmem:[#allocation4] sm:$0xff]  ;;  %v2912_v4 = vld [vmem:[#allocation4 + $0x8] sm:$0xff]  ;;  %v3664_v55 = vld [vmem:[%s5781_s26] sm:$0xff] }
 0x3d8   : > { %v4941_v30 = vpop.eup %4940  ;;  %4952 = vpow2.f32 %v3425_v61  ;;  %v3547_v21 = vadd.f32 %v4937_v19, %v3546_v9  ;;  %v3581_v25 = vadd.f32 %v7885_v39, %v7880_v33  ;;  %v8575_v51 = vsub.f32 %v7409_v23, %v7412_v47 }
 0x3d9   : > { %v4943_v63 = vpop.eup %4942  ;;  %4954 = vpow2.f32 %v3427_v31  ;;  %v3252_v31 = vsub.f32 %v7345_v49, %v3149_v1  ;;  %v3441_v19 = vmul.f32 1.442695, %v3251_v24  ;;  %vm3689_vm12 = vcmp.ge.s32.totalorder %v3664_v55, 0 }
 0x3da   : > { %v4945_v59 = vpop.eup %4944  ;;  %4956 = vpow2.f32 %v3413_v18  ;;  %v3548_v48 = vadd.f32 %v4939_v54, %v3547_v21  ;;  %v3541_v2 = vadd.f32 %v4943_v63, %v4941_v30  ;;  %v3582_v12 = vadd.f32 %v7887_v3, %v3581_v25 }
 0x3db   : > { %v4947_v28 = vpop.eup %4946  ;;  %4958 = vpow2.f32 %v3415_v46  ;;  %v3443_v49 = vmul.f32 1.442695, %v3252_v31 }
 0x3dc   : > { %v4949_v43 = vpop.eup %4948  ;;  %4960 = vpow2.f32 %v3417_v32  ;;  %3549 = vadd.xlane.f32.xlu2 %v3548_v48  ;;  %v3542_v5 = vadd.f32 %v4945_v59, %v3541_v2  ;;  %v3583_v30 = vadd.f32 %v7893_v34, %v3582_v12  ;;  %v2961_v34 = vmul.f32 1.442695, %v8575_v51  ;;  %v2913_v2 = vld [vmem:[#allocation4 + $0x10] sm:$0xff] }
 0x3dd   : > { %v4951_v58 = vpop.eup %4950  ;;  %4962 = vpow2.f32 %v3419_v15 }
 0x3de   : > { %v4953_v42 = vpop.eup %4952  ;;  %4964 = vpow2.f32 %v3445_v11  ;;  %v3543_v6 = vadd.f32 %v4947_v28, %v3542_v5  ;;  %v3561_v41 = vadd.f32 %v4951_v58, %v4949_v43  ;;  %3569 = vadd.xlane.f32.xlu1 %v3568_v44  ;;  %v8574_v11 = vsub.f32 %v7396_v26, %v7401_v13 }
 0x3df   : > { %v4955_v61 = vpop.eup %4954  ;;  %4966 = vpow2.f32 %v3447_v57  ;;  %v8576_v26 = vsub.f32 %v7420_v0, %v7423_v56  ;;  %v8577_v58 = vsub.f32 %v7431_v45, %v7436_v50  ;;  %v3665_v56 = vld [vmem:[%s5781_s26 + $0x8] sm:$0xff]  ;;  %v8579_v44 = vsub.f32 %v7453_v20, %v7459_v37 }
 0x3e0   : > { %v4957_v53 = vpop.eup %4956  ;;  %4968 = vpow2.f32 %v3449_v52  ;;  %3544 = vadd.xlane.f32.xlu0 %v3543_v6  ;;  %v3562_v14 = vadd.f32 %v4953_v42, %v3561_v41  ;;  %v2965_v59 = vmul.f32 1.442695, %v8574_v11  ;;  %vm3690_vm3 = vcmp.ge.s32.totalorder %v3665_v56, 0 }
 0x3e1   : > { %v4959_v60 = vpop.eup %4958  ;;  %4970 = vpow2.f32 %v3451_v16  ;;  %v2963_v13 = vmul.f32 1.442695, %v8576_v26  ;;  %v2969_v16 = vmul.f32 1.442695, %v8577_v58  ;;  %v8578_v6 = vmov 0.0  }
 0x3e2   : > { %v4961_v18 = vpop.eup %4960  ;;  %4972 = vpow2.f32 %v3437_v22  ;;  %v3563_v46 = vadd.f32 %v4955_v61, %v3562_v14  ;;  %v3556_v9 = vadd.f32 %v4959_v60, %v4957_v53  ;;  %v3666_v22 = vld [vmem:[%s5781_s26 + $0x10] sm:$0xff]  ;;  %v7938_v41 = vsel %vm3689_vm12, 1.0, %v8578_v6  ;;  %v3667_v53 = vld [vmem:[%s5781_s26 + $0x18] sm:$0xff] }
 0x3e3   : > { %v4963_v54 = vpop.eup %4962  ;;  %4974 = vpow2.f32 %v3439_v10  ;;  %v7941_v61 = vsel %vm3690_vm3, 1.0, %v8578_v6  ;;  %vm3691_vm5 = vcmp.ge.s32.totalorder %v3666_v22, 0  ;;  %v4021_v45 = vsel %vm1336_vm4, %v7938_v41, 0.0  ;;  %v2915_v10 = vld [vmem:[#allocation4 + $0x20] sm:$0xff] }
 0x3e4   : > { %v4965_v32 = vpop.eup %4964  ;;  %3564 = vadd.xlane.f32.xlu2 %v3563_v46  ;;  %v3557_v27 = vadd.f32 %v4961_v18, %v3556_v9  ;;  %4976 = vpow2.f32 %v3441_v19  ;;  %v4022_v50 = vsel %vm1336_vm4, %v7941_v61, 0.0  ;;  %v2967_v14 = vmul.f32 1.442695, %v8579_v44 }
 0x3e5   : > { %v4967_v40 = vpop.eup %4966  ;;  %4978 = vpow2.f32 %v3443_v49  ;;  %v7960_v25 = vsel %vm3691_vm5, 1.0, %v8578_v6  ;;  %v4023_v60 = vadd.f32 %v4022_v50, %v4021_v45  ;;  %vm3692_vm6 = vcmp.ge.s32.totalorder %v3667_v53, 0 }
 0x3e6   : > { %v4969_v8 = vpop.eup %4968  ;;  %v3558_v33 = vadd.f32 %v4963_v54, %v3557_v27  ;;  %v3576_v39 = vadd.f32 %v4967_v40, %v4965_v32  ;;  %3584 = vadd.xlane.f32.xlu1 %v3583_v30  ;;  %4980 = vpow2.f32 %v2965_v59  ;;  %v4024_v19 = vsel %vm1336_vm4, %v7960_v25, 0.0 }
 0x3e7   : > { %v4971_v17 = vpop.eup %4970  ;;  %4982 = vpow2.f32 %v2961_v34 }
 0x3e8   : > { %v4973_v1 = vpop.eup %4972  ;;  %3559 = vadd.xlane.f32.xlu0 %v3558_v33  ;;  %v3577_v29 = vadd.f32 %v4969_v8, %v3576_v39  ;;  %4984 = vpow2.f32 %v2963_v13 }
 0x3e9   : > { %v4975_v21 = vpop.eup %4974  ;;  %4986 = vpow2.f32 %v2969_v16 }
 0x3ea   : > { %v3578_v35 = vadd.f32 %v4971_v17, %v3577_v29  ;;  %v3571_v63 = vadd.f32 %v4975_v21, %v4973_v1  ;;  %v4977_v15 = vpop.eup %4976 }
 0x3eb   : > { %v4979_v3 = vpop.eup %4978 }
 0x3ec   : > { %3579 = vadd.xlane.f32.xlu2 %v3578_v35  ;;  %v3572_v38 = vadd.f32 %v4977_v15, %v3571_v63  ;;  %v4981_v48 = vpop.eup %4980 }
 0x3ed   : > { %v3013_v28 = vmul.f32 %v4981_v48, %v2913_v2  ;;  %v4983_v57 = vpop.eup %4982 }
 0x3ee   : > { %v3573_v7 = vadd.f32 %v4979_v3, %v3572_v38  ;;  %v3011_v52 = vmul.f32 %v4983_v57, %v2911_v36  ;;  %v4985_v5 = vpop.eup %4984 }
 0x3ef   : > { %v3012_v0 = vmul.f32 %v4985_v5, %v2912_v4  ;;  %v4987_v31 = vpop.eup %4986 }
 0x3f0   : > { %3574 = vadd.xlane.f32.xlu0 %v3573_v7  ;;  %v3015_v18 = vmul.f32 %v4987_v31, %v2915_v10 }
 0x3f9   : > { %v3465_v23 = vpop.xlane.xlu1 %3464 }
 0x3fa   : > { %v3586_v47 = vadd.f32 %v3465_v23, %v3011_v52 }
 0x3fb   : > { %v3475_v62 = vpop.xlane.xlu2 %3474 }
 0x3fc   : > { %v3588_v43 = vadd.f32 %v3475_v62, %v3013_v28  ;;  %3611 = vst.msk [vmem:[#allocation4] sm:$0xff] %vm1336_vm4, %v3586_v47 }
 0x3fe   : > { %3613 = vst.msk [vmem:[#allocation4 + $0x10] sm:$0xff] %vm1336_vm4, %v3588_v43 }
 0x40a   : > { %v3470_v24 = vpop.xlane.xlu0 %3469 }
 0x40b   : > { %v3587_v42 = vadd.f32 %v3470_v24, %v3012_v0 }
 0x40d   : > { %3612 = vst.msk [vmem:[#allocation4 + $0x8] sm:$0xff] %vm1336_vm4, %v3587_v42 }
 0x40e   : > { %5182 = shalt.err (!%p5179_p5)
}
 0x40f   : > { %s5270_s13 = smov 512   ;;  %s5271_s11 = smov 32   ;;  %v8580_v20 = vld [vmem:[#allocation30_spill] sm:$0xff]  ;;  %v8581_v37 = vld [vmem:[#allocation13_spill] sm:$0xff]  ;;  %v3668_v54 = vld [vmem:[%s5781_s26 + $0x20] sm:$0xff]  ;;  %4988 = vpow2.f32 %v2967_v14  ;;  %v7990_v27 = vsel %vm3692_vm6, 1.0, %v8578_v6  ;;  %v4025_v12 = vadd.f32 %v4024_v19, %v4023_v60 }
 0x410   : > { %4710 = dma.vmem_to_hbm [thread:$0]  (%p5359_p4), %s7949_s23, 12800, %s4115_s25, %s4078_s14, %s5270_s13, %s5270_s13, %s5271_s11   ;;  %v8582_v46 = vsub.f32 %v8580_v20, %v8581_v37  ;;  %vm3693_vm7 = vcmp.ge.s32.totalorder %v3668_v54, 0  ;;  %v4026_v40 = vsel %vm1336_vm4, %v7990_v27, 0.0 }
 0x411   : > { %s8583_s16 = smul.u32 200, %s5257_s30  ;;  %s4083_s30 = scalar_lea.sflag [#allocation9], %s5921_s21 }
 0x412   : > { %v2971_v9 = vmul.f32 1.442695, %v8582_v46  ;;  %s5203_s2 = scalar_lea.hbm %s8351_s6, 400 }
 0x413   : > { %s4130_s20 = scalar_lea.hbm %s8351_s6, %s8583_s16 }
 0x414   : > { %s4133_s22 = sshll.u32 %s4130_s20, 4  ;;  %s4134_s22 = int_to_ptr.hbm [resolvable:$true] %s4133_s22 }
 0x415   : > { %v3485_v49 = vpop.xlane.xlu0 %3484  ;;  %s5197_s23 = sshra.s32 %s4134_s22, 4  ;;  %s5198_s23 = int_to_ptr.hbm [resolvable:$true] %s5197_s23 }
 0x416   : > { %v3590_v32 = vadd.f32 %v3485_v49, %v3015_v18  ;;  %s5199_s25 = scalar_lea.hbm %s5198_s23, 200  ;;  %p5204_p10 = scmp.lt.s32.totalorder %s5198_s23, %s8351_s6 }
 0x417   : > { %p5200_p6 = scmp.ne.s32.totalorder %s5198_s23, %s5199_s25  ;;  %p5205_p11 = scmp.lt.s32.totalorder %s5203_s2, %s5199_s25 }
 0x418   : > { %3615 = vst.msk [vmem:[#allocation4 + $0x20] sm:$0xff] %vm1336_vm4, %v3590_v32 }
 0x419   : > { %p5201_p7 = pnand %p5200_p6, %p5359_p4  ;;  %p5206_p12 = por %p5205_p11, %p5204_p10 }
 0x41b   : > { %p5202_p9 = pneg %p5201_p7 }
 0x41d   : > { %p5207_p13 = pnand %p5206_p12, %p5202_p9 }
 0x41f   : > { %5210 = shalt.err (!%p5207_p13)
}
 0x420   : > { %s5272_s21 = smov 128   ;;  %s5273_s16 = smov 8   ;;  %4990 = vpow2.f32 %v2971_v9  ;;  %v8584_v8 = vld [vmem:[#allocation32_spill] sm:$0xff]  ;;  %v3790_v1 = vld [vmem:[#allocation4 + $0x8] sm:$0xff]  ;;  %v8590_v63 = vld [vmem:[#allocation37_spill] sm:$0xff]  ;;  %v8018_v11 = vsel %vm3693_vm7, 1.0, %v8578_v6  ;;  %v4027_v59 = vadd.f32 %v4026_v40, %v4025_v12  ;;  %v4989_v34 = vpop.eup %4988  ;;  %v3480_v10 = vpop.xlane.xlu1 %3479 }
 0x421   : > { %4711 = dma.vmem_to_hbm [thread:$0]  (%p5359_p4), %s7986_s12, 3200, %s4134_s22, %s4083_s30, %s5272_s21, %s5272_s21, %s5273_s16   ;;  %v8585_v33 = vld [vmem:[#allocation20_spill] sm:$0xff]  ;;  %v8588_v29 = vld [vmem:[#allocation18_spill] sm:$0xff]  ;;  %v8591_v15 = vld [vmem:[#allocation17_spill] sm:$0xff]  ;;  %4992 = vlog2.f32 %v3790_v1  ;;  %v4028_v7 = vsel %vm1336_vm4, %v8018_v11, 0.0 }
 0x422   : > { %v8586_v39 = vsub.f32 %v8584_v8, %v8585_v33  ;;  %v8587_v30 = vld [vmem:[#allocation24_spill] sm:$0xff]  ;;  %v8592_v38 = vsub.f32 %v8590_v63, %v8591_v15  ;;  %v8593_v48 = vld [vmem:[#allocation29_spill] sm:$0xff]  ;;  %v8594_v2 = vld [vmem:[#allocation35_spill] sm:$0xff]  ;;  %v4029_v4 = vadd.f32 %v4028_v7, %v4027_v59  ;;  %s501_s12 = scalar_lea.vmem %s8353_s8, %s5379_s19  ;;  %s495_s20 = scalar_lea.vmem %s8352_s7, %s5379_s19 }
 0x423   : > { %v8589_v21 = vsub.f32 %v8587_v30, %v8588_v29  ;;  %v3669_v51 = vld [vmem:[%s5781_s26 + $0x28] sm:$0xff]  ;;  %v8595_v28 = vsub.f32 %v8593_v48, %v8594_v2  ;;  %v8596_v43 = vld [vmem:[#allocation23_spill] sm:$0xff]  ;;  %v2916_v47 = vld [vmem:[#allocation4 + $0x28] sm:$0xff] }
 0x424   : > { %v2975_v17 = vmul.f32 1.442695, %v8586_v39  ;;  %v2977_v3 = vmul.f32 1.442695, %v8592_v38  ;;  %v3789_v62 = vld [vmem:[#allocation4] sm:$0xff]  ;;  %v2914_v36 = vld [vmem:[#allocation4 + $0x18] sm:$0xff] }
 0x425   : > { %v2973_v35 = vmul.f32 1.442695, %v8589_v21  ;;  %v2981_v57 = vmul.f32 1.442695, %v8595_v28  ;;  %vm3694_vm8 = vcmp.ge.s32.totalorder %v3669_v51, 0  ;;  %v8597_v26 = vld [vmem:[#allocation16_spill] sm:$0xff]  ;;  %v3014_v24 = vmul.f32 %v4989_v34, %v2914_v36  ;;  %v3490_v21 = vpop.xlane.xlu2 %3489 }
 0x426   : > { %4994 = vpow2.f32 %v2975_v17  ;;  %v8598_v13 = vsub.f32 %v8596_v43, %v8597_v26  ;;  %v4991_v23 = vpop.eup %4990  ;;  %v8030_v5 = vsel %vm3694_vm8, 1.0, %v8578_v6  ;;  %v8599_v58 = vld [vmem:[#allocation15_spill] sm:$0xff]  ;;  %v8600_v16 = vld [vmem:[#allocation14_spill] sm:$0xff]  ;;  %v8602_v22 = vld [vmem:[#allocation21_spill] sm:$0xff] }
 0x427   : > { %4996 = vpow2.f32 %v2973_v35  ;;  %v8601_v55 = vsub.f32 %v8599_v58, %v8600_v16  ;;  %v3791_v56 = vld [vmem:[#allocation4 + $0x10] sm:$0xff]  ;;  %v4030_v42 = vsel %vm1336_vm4, %v8030_v5, 0.0  ;;  %v8603_v45 = vld [vmem:[#allocation22_spill] sm:$0xff]  ;;  %v4993_v14 = vpop.eup %4992  ;;  %v3589_v60 = vadd.f32 %v3480_v10, %v3014_v24  ;;  %v8606_v37 = vld [vmem:[#allocation33_spill] sm:$0xff]  ;;  %v3500_v51 = vpop.xlane.xlu0 %3499 }
 0x428   : > { %v2983_v52 = vmul.f32 1.442695, %v8598_v13  ;;  %4998 = vpow2.f32 %v2977_v3  ;;  %v8604_v50 = vsub.f32 %v8602_v22, %v8603_v45  ;;  %v3671_v53 = vld [vmem:[%s5781_s26 + $0x38] sm:$0xff]  ;;  %v3670_v44 = vld [vmem:[%s5781_s26 + $0x30] sm:$0xff]  ;;  %v3016_v19 = vmul.f32 %v4991_v23, %v2916_v47  ;;  %v2918_v49 = vld [vmem:[#allocation4 + $0x38] sm:$0xff] }
 0x429   : > { %v2989_v0 = vmul.f32 1.442695, %v8601_v55  ;;  %5000 = vlog2.f32 %v3789_v62  ;;  %vm3695_vm9 = vcmp.ge.s32.totalorder %v3670_v44, 0  ;;  %v8605_v20 = vld [vmem:[#allocation26_spill] sm:$0xff]  ;;  %v4031_v54 = vadd.f32 %v4030_v42, %v4029_v4  ;;  %v8608_v40 = vld [vmem:[#allocation25_spill] sm:$0xff]  ;;  %v8609_v8 = vld [vmem:[#allocation31_spill] sm:$0xff] }
 0x42a   : > { %5002 = vpow2.f32 %v2981_v57  ;;  %v2979_v31 = vmul.f32 1.442695, %v8604_v50  ;;  %v8607_v46 = vsub.f32 %v8605_v20, %v8606_v37  ;;  %v8046_v32 = vsel %vm3695_vm9, 1.0, %v8578_v6  ;;  %3614 = vst.msk [vmem:[#allocation4 + $0x18] sm:$0xff] %vm1336_vm4, %v3589_v60  ;;  %v2917_v17 = vld [vmem:[#allocation4 + $0x30] sm:$0xff]  ;;  %v3793_v15 = vld [vmem:[#allocation4 + $0x20] sm:$0xff] }
 0x42b   : > { %5004 = vpow2.f32 %v2983_v52  ;;  %v8610_v33 = vsub.f32 %v8608_v40, %v8609_v8  ;;  %vm3696_vm10 = vcmp.ge.s32.totalorder %v3671_v53, 0  ;;  %v4032_v1 = vsel %vm1336_vm4, %v8046_v32, 0.0  ;;  %v3672_v35 = vld [vmem:[%s5781_s26 + $0x40] sm:$0xff]  ;;  %v3765_v28 = vld [vmem:[#allocation3 + $0x8] sm:$0xff]  ;;  %v3495_v52 = vpop.xlane.xlu1 %3494 }
 0x42c   : > { %v4995_v18 = vpop.eup %4994  ;;  %v2985_v9 = vmul.f32 1.442695, %v8607_v46  ;;  %5006 = vlog2.f32 %v3791_v56  ;;  %v3817_v29 = vmul.f32 0.6931472, %v4993_v14  ;;  %v3591_v38 = vadd.f32 %v3490_v21, %v3016_v19  ;;  %v2919_v36 = vld [vmem:[#allocation4 + $0x40] sm:$0xff]  ;;  %v2921_v23 = vld [vmem:[#allocation4 + $0x50] sm:$0xff] }
 0x42d   : > { %v4997_v12 = vpop.eup %4996  ;;  %5008 = vpow2.f32 %v2989_v0  ;;  %v2987_v39 = vmul.f32 1.442695, %v8610_v33  ;;  %v3018_v3 = vmul.f32 %v4995_v18, %v2918_v49  ;;  %v8056_v7 = vsel %vm3696_vm10, 1.0, %v8578_v6  ;;  %v3890_v4 = vld [vmem:[#allocation5 + $0x8] sm:$0xff]  ;;  %v3764_v58 = vld [vmem:[#allocation3] sm:$0xff]  ;;  %v8615_v50 = vld [vmem:[#allocation41_spill] sm:$0xff] }
 0x42e   : > { %v4999_v30 = vpop.eup %4998  ;;  %5010 = vpow2.f32 %v2979_v31  ;;  %v3017_v34 = vmul.f32 %v4997_v12, %v2917_v17  ;;  %v4033_v48 = vadd.f32 %v4032_v1, %v4031_v54  ;;  %3616 = vst.msk [vmem:[#allocation4 + $0x28] sm:$0xff] %vm1336_vm4, %v3591_v38  ;;  %v4034_v57 = vsel %vm1336_vm4, %v8056_v7, 0.0  ;;  %v8611_v16 = vld [vmem:[#allocation27_spill] sm:$0xff]  ;;  %v2922_v42 = vld [vmem:[#allocation4 + $0x58] sm:$0xff]  ;;  %v2920_v19 = vld [vmem:[#allocation4 + $0x48] sm:$0xff] }
 0x42f   : > { %v5001_v63 = vpop.eup %5000  ;;  %5012 = vpow2.f32 %v2985_v9  ;;  %v3593_v62 = vadd.f32 %v3500_v51, %v3018_v3  ;;  %vm3697_vm11 = vcmp.ge.s32.totalorder %v3672_v35, 0  ;;  %v3865_v13 = vadd.f32 %v3817_v29, %v3765_v28  ;;  %v8612_v55 = vld [vmem:[#allocation39_spill] sm:$0xff]  ;;  %v8614_v45 = vld [vmem:[#allocation28_spill] sm:$0xff]  ;;  %v3674_v9 = vld [vmem:[%s5781_s26 + $0x50] sm:$0xff] }
 0x430   : > { %v5003_v59 = vpop.eup %5002  ;;  %5014 = vpow2.f32 %v2987_v39  ;;  %v3815_v26 = vmul.f32 0.6931472, %v5001_v63  ;;  %v8613_v0 = vsub.f32 %v8611_v16, %v8612_v55  ;;  %v3592_v24 = vadd.f32 %v3495_v52, %v3017_v34  ;;  %v2925_v18 = vld [vmem:[#allocation4 + $0x70] sm:$0xff]  ;;  %v3673_v54 = vld [vmem:[%s5781_s26 + $0x48] sm:$0xff]  ;;  %v2924_v63 = vld [vmem:[#allocation4 + $0x68] sm:$0xff] }
 0x431   : > { %v5005_v2 = vpop.eup %5004  ;;  %5016 = vlog2.f32 %v3793_v15  ;;  %3618 = vst.msk [vmem:[#allocation4 + $0x38] sm:$0xff] %vm1336_vm4, %v3593_v62  ;;  %v8616_v31 = vsub.f32 %v8614_v45, %v8615_v50  ;;  %v3792_v53 = vld [vmem:[#allocation4 + $0x18] sm:$0xff]  ;;  %v3019_v44 = vmul.f32 %v4999_v30, %v2919_v36  ;;  %v8070_v14 = vsel %vm3697_vm11, 1.0, %v8578_v6  ;;  %v2923_v33 = vld [vmem:[#allocation4 + $0x60] sm:$0xff]  ;;  %v8617_v17 = vld [vmem:[#allocation19_spill] sm:$0xff] }
 0x432   : > { %v5007_v43 = vpop.eup %5006  ;;  %v2993_v56 = vmul.f32 1.442695, %v8613_v0  ;;  %v4035_v60 = vadd.f32 %v4034_v57, %v4033_v48  ;;  %5018 = vlog2.f32 %v3792_v53  ;;  %3617 = vst.msk [vmem:[#allocation4 + $0x30] sm:$0xff] %vm1336_vm4, %v3592_v24  ;;  %v4036_v37 = vsel %vm1336_vm4, %v8070_v14, 0.0  ;;  %v8618_v1 = vld [vmem:[#allocation40_spill] sm:$0xff]  ;;  %v3766_v38 = vld [vmem:[#allocation3 + $0x10] sm:$0xff] }
 0x433   : > { %v5009_v47 = vpop.eup %5008  ;;  %v2991_v10 = vmul.f32 1.442695, %v8616_v31  ;;  %v3819_v20 = vmul.f32 0.6931472, %v5007_v43  ;;  %v3021_v46 = vmul.f32 %v5003_v59, %v2921_v23  ;;  %v3864_v12 = vadd.f32 %v3815_v26, %v3764_v58  ;;  %v3889_v34 = vld [vmem:[#allocation5] sm:$0xff]  ;;  %v8621_v62 = vld [vmem:[#allocation45_spill] sm:$0xff]  ;;  %v3505_v23 = vpop.xlane.xlu2 %3504 }
 0x434   : > { %v5011_v22 = vpop.eup %5010  ;;  %v3915_v40 = vsub.f32 %v3865_v13, %v3890_v4  ;;  %vm3698_vm13 = vcmp.ge.s32.totalorder %v3673_v54, 0  ;;  %v8077_v8 = vmul.f32 %v5005_v2, %v2922_v42  ;;  %5020 = vpow2.f32 %v2993_v56  ;;  %v8620_v57 = vld [vmem:[#allocation42_spill] sm:$0xff]  ;;  %v3515_v24 = vpop.xlane.xlu0 %3514  ;;  %v3767_v53 = vld [vmem:[#allocation3 + $0x18] sm:$0xff] }
 0x435   : > { %v5013_v49 = vpop.eup %5012  ;;  %v8619_v30 = vsub.f32 %v8617_v17, %v8618_v1  ;;  %v3020_v21 = vmul.f32 %v5011_v22, %v2920_v19  ;;  %v8082_v35 = vmul.f32 %v5009_v47, %v2925_v18  ;;  %5022 = vpow2.f32 %v2991_v10  ;;  %v3794_v3 = vld [vmem:[#allocation4 + $0x28] sm:$0xff]  ;;  %v3510_v47 = vpop.xlane.xlu1 %3509  ;;  %v3891_v22 = vld [vmem:[#allocation5 + $0x10] sm:$0xff]  ;;  %v8627_v1 = vld [vmem:[#allocation47_spill] sm:$0xff] }
 0x436   : > { %v5015_v39 = vpop.eup %5014  ;;  %v4037_v59 = vadd.f32 %v4036_v37, %v4035_v60  ;;  %vm3699_vm14 = vcmp.ge.s32.totalorder %v3674_v9, 0  ;;  %v8085_v51 = vsel %vm3698_vm13, 1.0, %v8578_v6  ;;  %v3866_v48 = vadd.f32 %v3819_v20, %v3766_v38  ;;  %v3675_v4 = vld [vmem:[%s5781_s26 + $0x58] sm:$0xff]  ;;  %v3768_v18 = vld [vmem:[#allocation3 + $0x20] sm:$0xff] }
 0x437   : > { %v2995_v29 = vmul.f32 1.442695, %v8619_v30  ;;  %v5017_v15 = vpop.eup %5016  ;;  %5024 = vlog2.f32 %v3794_v3  ;;  %v4038_v2 = vsel %vm1336_vm4, %v8085_v51, 0.0  ;;  %v8089_v28 = vmul.f32 %v5013_v49, %v2923_v33  ;;  %v8623_v20 = vld [vmem:[#allocation43_spill] sm:$0xff]  ;;  %v8624_v37 = vld [vmem:[#allocation46_spill] sm:$0xff]  ;;  %v8626_v17 = vld [vmem:[#allocation44_spill] sm:$0xff] }
 0x438   : > { %v8622_v36 = vsub.f32 %v8620_v57, %v8621_v62  ;;  %v3914_v26 = vsub.f32 %v3864_v12, %v3889_v34  ;;  %v3940_v13 = vmul.f32 %v7941_v61, %v3915_v40  ;;  %v3796_v52 = vld [vmem:[#allocation4 + $0x38] sm:$0xff]  ;;  %v8096_v58 = vmul.f32 %v5015_v39, %v2924_v63  ;;  %v5019_v16 = vpop.eup %5018  ;;  %v2927_v40 = vld [vmem:[#allocation4 + $0x80] sm:$0xff] }
 0x439   : > { %v3823_v55 = vmul.f32 0.6931472, %v5017_v15  ;;  %v3594_v0 = vadd.f32 %v3505_v23, %v3019_v44  ;;  %v8100_v56 = vsel %vm3699_vm14, 1.0, %v8578_v6  ;;  %v3595_v42 = vadd.f32 %v3510_v47, %v3020_v21  ;;  %v3795_v50 = vld [vmem:[#allocation4 + $0x30] sm:$0xff]  ;;  %v2926_v12 = vld [vmem:[#allocation4 + $0x78] sm:$0xff]  ;;  %v3892_v39 = vld [vmem:[#allocation5 + $0x18] sm:$0xff] }
 0x43a   : > { %v2999_v43 = vmul.f32 1.442695, %v8622_v36  ;;  %v3821_v45 = vmul.f32 0.6931472, %v5019_v16  ;;  %5026 = vlog2.f32 %v3796_v52  ;;  %v3596_v61 = vadd.f32 %v3515_v24, %v3021_v46  ;;  %v5021_v10 = vpop.eup %5020  ;;  %v3894_v47 = vld [vmem:[#allocation5 + $0x28] sm:$0xff] }
 0x43b   : > { %v4039_v31 = vadd.f32 %v4038_v2, %v4037_v59  ;;  %v3916_v60 = vsub.f32 %v3866_v48, %v3891_v22  ;;  %5028 = vlog2.f32 %v3795_v50  ;;  %3619 = vst.msk [vmem:[#allocation4 + $0x40] sm:$0xff] %vm1336_vm4, %v3594_v0  ;;  %v4040_v44 = vsel %vm1336_vm4, %v8100_v56, 0.0  ;;  %v5023_v19 = vpop.eup %5022  ;;  %v3769_v59 = vld [vmem:[#allocation3 + $0x28] sm:$0xff]  ;;  %v3676_v2 = vld [vmem:[%s5781_s26 + $0x60] sm:$0xff]  ;;  %v3770_v22 = vld [vmem:[#allocation3 + $0x30] sm:$0xff] }
 0x43c   : > { %vm3700_vm15 = vcmp.ge.s32.totalorder %v3675_v4, 0  ;;  %5030 = vpow2.f32 %v2995_v29  ;;  %v8625_v9 = vsub.f32 %v8623_v20, %v8624_v37  ;;  %v3939_v46 = vmul.f32 %v7938_v41, %v3914_v26  ;;  %3621 = vst.msk [vmem:[#allocation4 + $0x50] sm:$0xff] %vm1336_vm4, %v3596_v61  ;;  %v8630_v4 = vld [vmem:[#allocation51_spill] sm:$0xff] }
 0x43d   : > { %v3867_v49 = vadd.f32 %v3821_v45, %v3767_v53  ;;  %v5025_v33 = vpop.eup %5024  ;;  %v8628_v30 = vsub.f32 %v8626_v17, %v8627_v1  ;;  %5032 = vpow2.f32 %v2999_v43  ;;  %v3965_v29 = vsel %vm1336_vm4, %v3940_v13, 0.0  ;;  %3620 = vst.msk [vmem:[#allocation4 + $0x48] sm:$0xff] %vm1336_vm4, %v3595_v42  ;;  %v3893_v43 = vld [vmem:[#allocation5 + $0x20] sm:$0xff] }
 0x43e   : > { %v8108_v54 = vmul.f32 1.442695, %v8625_v9  ;;  %v3868_v63 = vadd.f32 %v3823_v55, %v3768_v18  ;;  %v3825_v41 = vmul.f32 0.6931472, %v5025_v33  ;;  %v8119_v38 = vsel %vm3700_vm15, 1.0, %v8578_v6  ;;  %v3520_v9 = vpop.xlane.xlu2 %3519 }
 0x43f   : > { %v2997_v21 = vmul.f32 1.442695, %v8628_v30  ;;  %v3917_v15 = vsub.f32 %v3867_v49, %v3892_v39  ;;  %v4041_v3 = vadd.f32 %v4040_v44, %v4039_v31  ;;  %v3941_v34 = vmul.f32 %v7960_v25, %v3916_v60  ;;  %v8629_v25 = vld [vmem:[#allocation48_spill] sm:$0xff]  ;;  %v8632_v60 = vld [vmem:[#allocation50_spill] sm:$0xff]  ;;  %v8633_v44 = vld [vmem:[#allocation53_spill] sm:$0xff]  ;;  %v3525_v49 = vpop.xlane.xlu1 %3524 }
 0x440   : > { %v4042_v48 = vsel %vm1336_vm4, %v8119_v38, 0.0  ;;  %v8125_v57 = vmul.f32 %v5023_v19, %v2926_v12  ;;  %v8127_v62 = vmul.f32 %v5021_v10, %v2927_v40  ;;  %v5027_v36 = vpop.eup %5026  ;;  %v3964_v26 = vsel %vm1336_vm4, %v3939_v46, 0.0  ;;  %v3678_v10 = vld [vmem:[%s5781_s26 + $0x70] sm:$0xff]  ;;  %v3677_v30 = vld [vmem:[%s5781_s26 + $0x68] sm:$0xff] }
 0x441   : > { %v3942_v13 = vmul.f32 %v7990_v27, %v3917_v15  ;;  %v3869_v52 = vadd.f32 %v3825_v41, %v3769_v59  ;;  %vm3701_vm0 = vcmp.ge.s32.totalorder %v3676_v2, 0  ;;  %v5029_v23 = vpop.eup %5028  ;;  %5034 = vpow2.f32 %v2997_v21  ;;  %v3895_v21 = vld [vmem:[#allocation5 + $0x30] sm:$0xff] }
 0x442   : > { %v8631_v16 = vsub.f32 %v8629_v25, %v8630_v4  ;;  %v3966_v0 = vadd.f32 %v3965_v29, %v3964_v26  ;;  %v3918_v24 = vsub.f32 %v3868_v63, %v3893_v43  ;;  %v8136_v42 = vpop.eup %5030  ;;  %v3827_v50 = vmul.f32 0.6931472, %v5029_v23  ;;  %v3797_v61 = vld [vmem:[#allocation4 + $0x40] sm:$0xff]  ;;  %v3771_v29 = vld [vmem:[#allocation3 + $0x38] sm:$0xff] }
 0x443   : > { %v3919_v45 = vsub.f32 %v3869_v52, %v3894_v47  ;;  %v4043_v27 = vadd.f32 %v4042_v48, %v4041_v3  ;;  %v8139_v31 = vsel %vm3701_vm0, 1.0, %v8578_v6  ;;  %v8142_v53 = vpop.eup %5032  ;;  %v8634_v19 = vsub.f32 %v8632_v60, %v8633_v44  ;;  %v3799_v37 = vld [vmem:[#allocation4 + $0x50] sm:$0xff]  ;;  %v3896_v47 = vld [vmem:[#allocation5 + $0x38] sm:$0xff] }
 0x444   : > { %v8134_v55 = vmul.f32 1.442695, %v8631_v16  ;;  %v3829_v20 = vmul.f32 0.6931472, %v5027_v36  ;;  %5036 = vlog2.f32 %v3797_v61  ;;  %v4044_v46 = vsel %vm1336_vm4, %v8139_v31, 0.0  ;;  %v3798_v39 = vld [vmem:[#allocation4 + $0x48] sm:$0xff] }
 0x445   : > { %v3003_v18 = vmul.f32 1.442695, %v8634_v19  ;;  %v3967_v12 = vsel %vm1336_vm4, %v3941_v34, 0.0  ;;  %v3969_v40 = vsel %vm1336_vm4, %v3942_v13, 0.0  ;;  %v3870_v33 = vadd.f32 %v3827_v50, %v3770_v22  ;;  %v8636_v36 = vld [vmem:[#allocation52_spill] sm:$0xff] }
 0x446   : > { %5038 = vlog2.f32 %v3799_v37  ;;  %v3968_v17 = vadd.f32 %v3967_v12, %v3966_v0  ;;  %v3597_v1 = vadd.f32 %v3520_v9, %v8077_v8  ;;  %vm3703_vm1 = vcmp.ge.s32.totalorder %v3678_v10, 0  ;;  %v8635_v8 = vld [vmem:[#allocation49_spill] sm:$0xff]  ;;  %v3772_v22 = vld [vmem:[#allocation3 + $0x40] sm:$0xff]  ;;  %v2928_v37 = vld [vmem:[#allocation4 + $0x88] sm:$0xff] }
 0x447   : > { %5040 = vlog2.f32 %v3798_v39  ;;  %v3943_v63 = vmul.f32 %v8018_v11, %v3918_v24  ;;  %v3944_v15 = vmul.f32 %v8030_v5, %v3919_v45  ;;  %v4045_v41 = vadd.f32 %v4044_v46, %v4043_v27  ;;  %v5035_v59 = vpop.eup %5034  ;;  %v3535_v27 = vpop.xlane.xlu2 %3534  ;;  %v2929_v9 = vld [vmem:[#allocation4 + $0x90] sm:$0xff]  ;;  %v3897_v46 = vld [vmem:[#allocation5 + $0x40] sm:$0xff] }
 0x448   : > { %v3598_v3 = vadd.f32 %v3525_v49, %v8089_v28  ;;  %v3970_v34 = vadd.f32 %v3969_v40, %v3968_v17  ;;  %v3871_v48 = vadd.f32 %v3829_v20, %v3771_v29  ;;  %v3920_v2 = vsub.f32 %v3870_v33, %v3895_v21  ;;  %3622 = vst.msk [vmem:[#allocation4 + $0x58] sm:$0xff] %vm1336_vm4, %v3597_v1  ;;  %v3679_v28 = vld [vmem:[%s5781_s26 + $0x78] sm:$0xff]  ;;  %v3540_v60 = vpop.xlane.xlu1 %3539  ;;  %v3773_v49 = vld [vmem:[#allocation3 + $0x48] sm:$0xff]  ;;  %v3530_v33 = vpop.xlane.xlu0 %3529 }
 0x449   : > { %vm3702_vm2 = vcmp.ge.s32.totalorder %v3677_v30, 0  ;;  %5042 = vpow2.f32 %v8108_v54  ;;  %v8637_v43 = vsub.f32 %v8635_v8, %v8636_v36  ;;  %v8166_v11 = vsel %vm3703_vm1, 1.0, %v8578_v6  ;;  %v3681_v17 = vld [vmem:[%s5781_s26 + $0x88] sm:$0xff]  ;;  %v3898_v36 = vld [vmem:[#allocation5 + $0x48] sm:$0xff] }
 0x44a   : > { %3623 = vst.msk [vmem:[#allocation4 + $0x60] sm:$0xff] %vm1336_vm4, %v3598_v3  ;;  %v8169_v5 = vsel %vm3702_vm2, 1.0, %v8578_v6  ;;  %v5037_v13 = vpop.eup %5036  ;;  %5044 = vpow2.f32 %v3003_v18  ;;  %v4048_v54 = vsel %vm1336_vm4, %v8166_v11, 0.0  ;;  %vm3704_vm12 = vcmp.ge.s32.totalorder %v3679_v28, 0  ;;  %v3680_v3 = vld [vmem:[%s5781_s26 + $0x80] sm:$0xff] }
 0x44b   : > { %v8161_v26 = vmul.f32 1.442695, %v8637_v43  ;;  %v4046_v52 = vsel %vm1336_vm4, %v8169_v5, 0.0  ;;  %v3971_v25 = vsel %vm1336_vm4, %v3943_v63, 0.0  ;;  %v3973_v4 = vsel %vm1336_vm4, %v3944_v15, 0.0 }
 0x44c   : > { %v5039_v23 = vpop.eup %5038  ;;  %v3831_v16 = vmul.f32 0.6931472, %v5037_v13  ;;  %v4047_v0 = vadd.f32 %v4046_v52, %v4045_v41  ;;  %v3972_v45 = vadd.f32 %v3971_v25, %v3970_v34  ;;  %v3921_v50 = vsub.f32 %v3871_v48, %v3896_v47  ;;  %v2931_v48 = vld [vmem:[#allocation4 + $0xa0] sm:$0xff]  ;;  %v8639_v52 = vld [vmem:[#allocation55_spill] sm:$0xff] }
 0x44d   : > { %v5041_v24 = vpop.eup %5040  ;;  %v3945_v61 = vmul.f32 %v8046_v32, %v3920_v2  ;;  %v8180_v10 = vsel %vm3704_vm12, 1.0, %v8578_v6  ;;  %v3600_v18 = vadd.f32 %v3535_v27, %v8082_v35  ;;  %v3835_v40 = vmul.f32 0.6931472, %v5039_v23 }
 0x44e   : > { %v3872_v44 = vadd.f32 %v3831_v16, %v3772_v22  ;;  %v3833_v19 = vmul.f32 0.6931472, %v5041_v24  ;;  %v4049_v20 = vadd.f32 %v4048_v54, %v4047_v0  ;;  %v3974_v12 = vadd.f32 %v3973_v4, %v3972_v45  ;;  %v8638_v54 = vld [vmem:[#allocation54_spill] sm:$0xff] }
 0x44f   : > { %v4050_v32 = vsel %vm1336_vm4, %v8180_v10, 0.0  ;;  %v3601_v39 = vadd.f32 %v3540_v60, %v8125_v57  ;;  %v5043_v1 = vpop.eup %5042  ;;  %5046 = vpow2.f32 %v8134_v55  ;;  %v3800_v21 = vld [vmem:[#allocation4 + $0x58] sm:$0xff]  ;;  %3625 = vst.msk [vmem:[#allocation4 + $0x70] sm:$0xff] %vm1336_vm4, %v3600_v18  ;;  %v3599_v29 = vadd.f32 %v3530_v33, %v8096_v58  ;;  %v3774_v55 = vld [vmem:[#allocation3 + $0x50] sm:$0xff] }
 0x450   : > { %v3922_v30 = vsub.f32 %v3872_v44, %v3897_v46  ;;  %v3873_v35 = vadd.f32 %v3833_v19, %v3773_v49  ;;  %v5045_v63 = vpop.eup %5044  ;;  %v3946_v15 = vmul.f32 %v8056_v7, %v3921_v50  ;;  %5048 = vlog2.f32 %v3800_v21  ;;  %v2932_v58 = vld [vmem:[#allocation4 + $0xa8] sm:$0xff]  ;;  %v3555_v4 = vpop.xlane.xlu1 %3554 }
 0x451   : > { %v3801_v41 = vld [vmem:[#allocation4 + $0x60] sm:$0xff]  ;;  %3626 = vst.msk [vmem:[#allocation4 + $0x78] sm:$0xff] %vm1336_vm4, %v3601_v39  ;;  %v3028_v57 = vmul.f32 %v8136_v42, %v2928_v37  ;;  %v3029_v34 = vmul.f32 %v5035_v59, %v2929_v9  ;;  %v3975_v2 = vsel %vm1336_vm4, %v3945_v61, 0.0  ;;  %v4051_v8 = vadd.f32 %v4050_v32, %v4049_v20  ;;  %v3550_v20 = vpop.xlane.xlu2 %3549 }
 0x452   : > { %5050 = vlog2.f32 %v3801_v41  ;;  %3624 = vst.msk [vmem:[#allocation4 + $0x68] sm:$0xff] %vm1336_vm4, %v3599_v29  ;;  %vm3706_vm3 = vcmp.ge.s32.totalorder %v3681_v17, 0  ;;  %v3976_v7 = vadd.f32 %v3975_v2, %v3974_v12  ;;  %v3947_v43 = vmul.f32 %v8070_v14, %v3922_v30  ;;  %v3682_v50 = vld [vmem:[%s5781_s26 + $0x90] sm:$0xff]  ;;  %v3776_v30 = vld [vmem:[#allocation3 + $0x60] sm:$0xff] }
 0x453   : > { %v3874_v28 = vadd.f32 %v3835_v40, %v3774_v55  ;;  %vm3705_vm5 = vcmp.ge.s32.totalorder %v3680_v3, 0  ;;  %5052 = vpow2.f32 %v8161_v26  ;;  %v3923_v42 = vsub.f32 %v3873_v35, %v3898_v36  ;;  %v3899_v26 = vld [vmem:[#allocation5 + $0x50] sm:$0xff]  ;;  %v3775_v40 = vld [vmem:[#allocation3 + $0x58] sm:$0xff] }
 0x454   : > { %v8199_v59 = vsel %vm3705_vm5, 1.0, %v8578_v6  ;;  %v8201_v13 = vmul.f32 %v5043_v1, %v2931_v48  ;;  %v8640_v23 = vsub.f32 %v8638_v54, %v8639_v52  ;;  %v8207_v25 = vsel %vm3706_vm3, 1.0, %v8578_v6  ;;  %v3684_v29 = vld [vmem:[%s5781_s26 + $0xa0] sm:$0xff] }
 0x455   : > { %v4052_v14 = vsel %vm1336_vm4, %v8199_v59, 0.0  ;;  %v3032_v16 = vmul.f32 %v5045_v63, %v2932_v58  ;;  %v8211_v0 = vpop.eup %5046  ;;  %v3977_v24 = vsel %vm1336_vm4, %v3946_v15, 0.0  ;;  %v4054_v22 = vsel %vm1336_vm4, %v8207_v25, 0.0  ;;  %v3683_v63 = vld [vmem:[%s5781_s26 + $0x98] sm:$0xff]  ;;  %v3900_v15 = vld [vmem:[#allocation5 + $0x58] sm:$0xff] }
 0x456   : > { %v3009_v47 = vmul.f32 1.442695, %v8640_v23  ;;  %v4053_v45 = vadd.f32 %v4052_v14, %v4051_v8  ;;  %v3604_v61 = vadd.f32 %v3555_v4, %v3029_v34  ;;  %v5049_v27 = vpop.eup %5048  ;;  %v3978_v60 = vadd.f32 %v3977_v24, %v3976_v7  ;;  %v3803_v18 = vld [vmem:[#allocation4 + $0x70] sm:$0xff]  ;;  %v3901_v34 = vld [vmem:[#allocation5 + $0x60] sm:$0xff]  ;;  %v2930_v7 = vld [vmem:[#allocation4 + $0x98] sm:$0xff] }
 0x457   : > { %v3979_v44 = vsel %vm1336_vm4, %v3947_v43, 0.0  ;;  %v3924_v19 = vsub.f32 %v3874_v28, %v3899_v26  ;;  %vm3707_vm6 = vcmp.ge.s32.totalorder %v3682_v50, 0  ;;  %v3948_v9 = vmul.f32 %v8085_v51, %v3923_v42  ;;  %v2933_v42 = vld [vmem:[#allocation4 + $0xb0] sm:$0xff] }
 0x458   : > { %v5051_v37 = vpop.eup %5050  ;;  %v3837_v46 = vmul.f32 0.6931472, %v5049_v27  ;;  %5054 = vlog2.f32 %v3803_v18  ;;  %v3804_v49 = vld [vmem:[#allocation4 + $0x78] sm:$0xff]  ;;  %v3603_v12 = vadd.f32 %v3550_v20, %v3028_v57  ;;  %3629 = vst.msk [vmem:[#allocation4 + $0x90] sm:$0xff] %vm1336_vm4, %v3604_v61  ;;  %v8221_v39 = vsel %vm3707_vm6, 1.0, %v8578_v6  ;;  %v3545_v57 = vpop.xlane.xlu0 %3544  ;;  %v3777_v61 = vld [vmem:[#allocation3 + $0x68] sm:$0xff] }
 0x459   : > { %v3839_v33 = vmul.f32 0.6931472, %v5051_v37  ;;  %v3802_v32 = vld [vmem:[#allocation4 + $0x68] sm:$0xff]  ;;  %5056 = vlog2.f32 %v3804_v49  ;;  %v4055_v17 = vadd.f32 %v4054_v22, %v4053_v45  ;;  %v8223_v1 = vpop.eup %5052  ;;  %v3980_v51 = vadd.f32 %v3979_v44, %v3978_v60  ;;  %v3570_v28 = vpop.xlane.xlu1 %3569 }
 0x45a   : > { %v3875_v35 = vadd.f32 %v3837_v46, %v3775_v40  ;;  %5058 = vlog2.f32 %v3802_v32  ;;  %3628 = vst.msk [vmem:[#allocation4 + $0x88] sm:$0xff] %vm1336_vm4, %v3603_v12  ;;  %v4056_v21 = vsel %vm1336_vm4, %v8221_v39, 0.0  ;;  %vm3709_vm7 = vcmp.ge.s32.totalorder %v3684_v29, 0  ;;  %v3565_v45 = vpop.xlane.xlu2 %3564  ;;  %v2935_v46 = vld [vmem:[#allocation4 + $0xc0] sm:$0xff]  ;;  %v3687_v12 = vld [vmem:[%s5781_s26 + $0xb8] sm:$0xff] }
 0x45b   : > { %v3876_v41 = vadd.f32 %v3839_v33, %v3776_v30  ;;  %v4057_v3 = vadd.f32 %v4056_v21, %v4055_v17  ;;  %vm3708_vm8 = vcmp.ge.s32.totalorder %v3683_v63, 0  ;;  %5060 = vpow2.f32 %v3009_v47  ;;  %v3686_v40 = vld [vmem:[%s5781_s26 + $0xb0] sm:$0xff]  ;;  %v3779_v63 = vld [vmem:[#allocation3 + $0x78] sm:$0xff] }
 0x45c   : > { %v3925_v48 = vsub.f32 %v3875_v35, %v3900_v15  ;;  %v3602_v55 = vadd.f32 %v3545_v57, %v8127_v62  ;;  %v8232_v2 = vsel %vm3708_vm8, 1.0, %v8578_v6  ;;  %v3949_v8 = vmul.f32 %v8100_v56, %v3924_v19  ;;  %v3685_v56 = vld [vmem:[%s5781_s26 + $0xa8] sm:$0xff] }
 0x45d   : > { %v3981_v58 = vsel %vm1336_vm4, %v3948_v9, 0.0  ;;  %v3926_v36 = vsub.f32 %v3876_v41, %v3901_v34  ;;  %v4058_v43 = vsel %vm1336_vm4, %v8232_v2, 0.0  ;;  %v8242_v62 = vsel %vm3709_vm7, 1.0, %v8578_v6 }
 0x45e   : > { %v5055_v54 = vpop.eup %5054  ;;  %v3950_v52 = vmul.f32 %v8119_v38, %v3925_v48  ;;  %3627 = vst.msk [vmem:[#allocation4 + $0x80] sm:$0xff] %vm1336_vm4, %v3602_v55  ;;  %v4059_v23 = vadd.f32 %v4058_v43, %v4057_v3  ;;  %v3607_v47 = vadd.f32 %v3570_v28, %v3032_v16  ;;  %v3982_v4 = vadd.f32 %v3981_v58, %v3980_v51  ;;  %v3778_v38 = vld [vmem:[#allocation3 + $0x70] sm:$0xff]  ;;  %v2934_v16 = vld [vmem:[#allocation4 + $0xb8] sm:$0xff]  ;;  %v3902_v51 = vld [vmem:[#allocation5 + $0x68] sm:$0xff] }
 0x45f   : > { %v5057_v14 = vpop.eup %5056  ;;  %v3843_v26 = vmul.f32 0.6931472, %v5055_v54  ;;  %v3807_v24 = vld [vmem:[#allocation4 + $0x90] sm:$0xff]  ;;  %v4060_v22 = vsel %vm1336_vm4, %v8242_v62, 0.0  ;;  %vm3710_vm9 = vcmp.ge.s32.totalorder %v3685_v56, 0  ;;  %v3606_v27 = vadd.f32 %v3565_v45, %v8201_v13  ;;  %v3903_v48 = vld [vmem:[#allocation5 + $0x70] sm:$0xff] }
 0x460   : > { %v5059_v50 = vpop.eup %5058  ;;  %5062 = vlog2.f32 %v3807_v24  ;;  %v3030_v60 = vmul.f32 %v8142_v53, %v2930_v7  ;;  %3632 = vst.msk [vmem:[#allocation4 + $0xa8] sm:$0xff] %vm1336_vm4, %v3607_v47  ;;  %v8251_v44 = vmul.f32 %v8211_v0, %v2933_v42  ;;  %v3983_v19 = vsel %vm1336_vm4, %v3949_v8, 0.0  ;;  %v3560_v30 = vpop.xlane.xlu0 %3559  ;;  %v3781_v45 = vld [vmem:[#allocation3 + $0x88] sm:$0xff] }
 0x461   : > { %v3985_v18 = vsel %vm1336_vm4, %v3950_v52, 0.0  ;;  %v3951_v20 = vmul.f32 %v8139_v31, %v3926_v36  ;;  %v3841_v37 = vmul.f32 0.6931472, %v5059_v50  ;;  %v3806_v9 = vld [vmem:[#allocation4 + $0x88] sm:$0xff]  ;;  %v5061_v13 = vpop.eup %5060  ;;  %v3845_v49 = vmul.f32 0.6931472, %v5057_v14 }
 0x462   : > { %5064 = vlog2.f32 %v3806_v9  ;;  %3631 = vst.msk [vmem:[#allocation4 + $0xa0] sm:$0xff] %vm1336_vm4, %v3606_v27  ;;  %v8259_v53 = vsel %vm3710_vm9, 1.0, %v8578_v6  ;;  %v4061_v0 = vadd.f32 %v4060_v22, %v4059_v23  ;;  %v3984_v33 = vadd.f32 %v3983_v19, %v3982_v4  ;;  %v3688_v36 = vld [vmem:[%s5781_s26 + $0xc0] sm:$0xff]  ;;  %v3580_v42 = vpop.xlane.xlu2 %3579  ;;  %v3904_v4 = vld [vmem:[#allocation5 + $0x78] sm:$0xff]  ;;  %v3585_v22 = vpop.xlane.xlu1 %3584 }
 0x463   : > { %v3878_v32 = vadd.f32 %v3843_v26, %v3778_v38  ;;  %v3877_v17 = vadd.f32 %v3841_v37, %v3777_v61  ;;  %v4062_v31 = vsel %vm1336_vm4, %v8259_v53, 0.0  ;;  %v3605_v35 = vadd.f32 %v3560_v30, %v3030_v60  ;;  %v3782_v37 = vld [vmem:[#allocation3 + $0x90] sm:$0xff] }
 0x464   : > { %v4063_v21 = vadd.f32 %v4062_v31, %v4061_v0  ;;  %vm3712_vm10 = vcmp.ge.s32.totalorder %v3687_v12, 0  ;;  %v3034_v29 = vmul.f32 %v8223_v1, %v2934_v16  ;;  %v3986_v15 = vadd.f32 %v3985_v18, %v3984_v33  ;;  %v3780_v33 = vld [vmem:[#allocation3 + $0x80] sm:$0xff] }
 0x465   : > { %v3927_v41 = vsub.f32 %v3877_v17, %v3902_v51  ;;  %v3805_v57 = vld [vmem:[#allocation4 + $0x80] sm:$0xff]  ;;  %vm3711_vm11 = vcmp.ge.s32.totalorder %v3686_v40, 0  ;;  %v3035_v3 = vmul.f32 %v5061_v13, %v2935_v46  ;;  %v3987_v55 = vsel %vm1336_vm4, %v3951_v20, 0.0  ;;  %3630 = vst.msk [vmem:[#allocation4 + $0x98] sm:$0xff] %vm1336_vm4, %v3605_v35  ;;  %v3905_v51 = vld [vmem:[#allocation5 + $0x80] sm:$0xff]  ;;  %v3907_v35 = vld [vmem:[#allocation5 + $0x90] sm:$0xff] }
 0x466   : > { %v5063_v34 = vpop.eup %5062  ;;  %v3879_v8 = vadd.f32 %v3845_v49, %v3779_v63  ;;  %5066 = vlog2.f32 %v3805_v57  ;;  %v8269_v58 = vsel %vm3711_vm11, 1.0, %v8578_v6  ;;  %v3928_v7 = vsub.f32 %v3878_v32, %v3903_v48  ;;  %v3906_v49 = vld [vmem:[#allocation5 + $0x88] sm:$0xff] }
 0x467   : > { %v3952_v1 = vmul.f32 %v8169_v5, %v3927_v41  ;;  %v3810_v43 = vld [vmem:[#allocation4 + $0xa8] sm:$0xff]  ;;  %v8275_v28 = vsel %vm3712_vm10, 1.0, %v8578_v6  ;;  %v4064_v54 = vsel %vm1336_vm4, %v8269_v58, 0.0  ;;  %v3851_v23 = vmul.f32 0.6931472, %v5063_v34 }
 0x468   : > { %v5065_v52 = vpop.eup %5064  ;;  %v4066_v56 = vsel %vm1336_vm4, %v8275_v28, 0.0  ;;  %v3609_v47 = vadd.f32 %v3580_v42, %v3034_v29  ;;  %v4065_v14 = vadd.f32 %v4064_v54, %v4063_v21  ;;  %5068 = vlog2.f32 %v3810_v43  ;;  %v3575_v16 = vpop.xlane.xlu0 %3574  ;;  %v3909_v42 = vld [vmem:[#allocation5 + $0xa0] sm:$0xff] }
 0x469   : > { %v3989_v26 = vsel %vm1336_vm4, %v3952_v1, 0.0  ;;  %v3849_v5 = vmul.f32 0.6931472, %v5065_v52  ;;  %v3809_v24 = vld [vmem:[#allocation4 + $0xa0] sm:$0xff]  ;;  %vm3713_vm13 = vcmp.ge.s32.totalorder %v3688_v36, 0  ;;  %v3988_v50 = vadd.f32 %v3987_v55, %v3986_v15 }
 0x46a   : > { %v3929_v38 = vsub.f32 %v3879_v8, %v3904_v4  ;;  %5070 = vlog2.f32 %v3809_v24  ;;  %3634 = vst.msk [vmem:[#allocation4 + $0xb8] sm:$0xff] %vm1336_vm4, %v3609_v47  ;;  %v8284_v61 = vsel %vm3713_vm13, 1.0, %v8578_v6  ;;  %v3953_v27 = vmul.f32 %v8166_v11, %v3928_v7  ;;  %v3783_v47 = vld [vmem:[#allocation3 + $0x98] sm:$0xff] }
 0x46b   : > { %v3881_v60 = vadd.f32 %v3849_v5, %v3781_v45  ;;  %v4067_v19 = vadd.f32 %v4066_v56, %v4065_v14  ;;  %v4068_v18 = vsel %vm1336_vm4, %v8284_v61, 0.0  ;;  %v3990_v9 = vadd.f32 %v3989_v26, %v3988_v50  ;;  %v3908_v50 = vld [vmem:[#allocation5 + $0x98] sm:$0xff] }
 0x46c   : > { %v5067_v20 = vpop.eup %5066  ;;  %v3608_v46 = vadd.f32 %v3575_v16, %v8251_v44  ;;  %v3610_v13 = vadd.f32 %v3585_v22, %v3035_v3  ;;  %v3882_v12 = vadd.f32 %v3851_v23, %v3782_v37  ;;  %v3808_v40 = vld [vmem:[#allocation4 + $0x98] sm:$0xff]  ;;  %v3991_v17 = vsel %vm1336_vm4, %v3953_v27, 0.0  ;;  %v3910_v16 = vld [vmem:[#allocation5 + $0xa8] sm:$0xff] }
 0x46d   : > { %v3847_v0 = vmul.f32 0.6931472, %v5067_v20  ;;  %v4069_v6 = vadd.f32 %v4068_v18, %v4067_v19  ;;  %v3931_v32 = vsub.f32 %v3881_v60, %v3906_v49  ;;  %5072 = vlog2.f32 %v3808_v40  ;;  %v3784_v3 = vld [vmem:[#allocation3 + $0xa0] sm:$0xff]  ;;  %v3787_v19 = vld [vmem:[#allocation3 + $0xb8] sm:$0xff] }
 0x46e   : > { %3633 = vst.msk [vmem:[#allocation4 + $0xb0] sm:$0xff] %vm1336_vm4, %v3608_v46  ;;  %v5069_v11 = vpop.eup %5068  ;;  %v3954_v30 = vmul.f32 %v8180_v10, %v3929_v38  ;;  %v3992_v21 = vadd.f32 %v3991_v17, %v3990_v9  ;;  %v3932_v15 = vsub.f32 %v3882_v12, %v3907_v35  ;;  %vm4019_vm14 = vcmask 0  }
 0x46f   : > { %v3880_v31 = vadd.f32 %v3847_v0, %v3780_v33  ;;  %3635 = vst.msk [vmem:[#allocation4 + $0xc0] sm:$0xff] %vm1336_vm4, %v3610_v13  ;;  %v4070_v29 = vrot.slane %v4069_v6, 4  ;;  %v3956_v34 = vmul.f32 %v8207_v25, %v3931_v32  ;;  %v3857_v36 = vmul.f32 0.6931472, %v5069_v11  ;;  %v3785_v25 = vld [vmem:[#allocation3 + $0xa8] sm:$0xff]  ;;  %v3786_v32 = vld [vmem:[#allocation3 + $0xb0] sm:$0xff] }
 0x470   : > { %v5071_v44 = vpop.eup %5070  ;;  %v3993_v55 = vsel %vm1336_vm4, %v3954_v30, 0.0  ;;  %v3957_v52 = vmul.f32 %v8221_v39, %v3932_v15  ;;  %v3912_v33 = vld [vmem:[#allocation5 + $0xb8] sm:$0xff]  ;;  %v3788_v30 = vld [vmem:[#allocation3 + $0xc0] sm:$0xff] }
 0x471   : > { %v3930_v63 = vsub.f32 %v3880_v31, %v3905_v51  ;;  %v3855_v41 = vmul.f32 0.6931472, %v5071_v44  ;;  %v3812_v57 = vld [vmem:[#allocation4 + $0xb8] sm:$0xff]  ;;  %v4071_v48 = vadd.f32 %v4070_v29, %v4069_v6  ;;  %v3994_v1 = vadd.f32 %v3993_v55, %v3992_v21  ;;  %v3913_v29 = vld [vmem:[#allocation5 + $0xc0] sm:$0xff] }
 0x472   : > { %5074 = vlog2.f32 %v3812_v57  ;;  %v3997_v14 = vsel %vm1336_vm4, %v3956_v34, 0.0  ;;  %v3885_v22 = vadd.f32 %v3857_v36, %v3785_v25  ;;  %v3999_v18 = vsel %vm1336_vm4, %v3957_v52, 0.0  ;;  %v3911_v51 = vld [vmem:[#allocation5 + $0xb0] sm:$0xff] }
 0x473   : > { %v3955_v10 = vmul.f32 %v8199_v59, %v3930_v63  ;;  %v3884_v8 = vadd.f32 %v3855_v41, %v3784_v3  ;;  %v5073_v7 = vpop.eup %5072  ;;  %v4072_v43 = vrot.slane %v4071_v48, 2 }
 0x474   : > { %v3853_v23 = vmul.f32 0.6931472, %v5073_v7  ;;  %v3935_v46 = vsub.f32 %v3885_v22, %v3910_v16 }
 0x475   : > { %v3995_v54 = vsel %vm1336_vm4, %v3955_v10, 0.0  ;;  %v3811_v56 = vld [vmem:[#allocation4 + $0xb0] sm:$0xff]  ;;  %v4073_v59 = vadd.f32 %v4072_v43, %v4071_v48  ;;  %v3934_v5 = vsub.f32 %v3884_v8, %v3909_v42 }
 0x476   : > { %v3996_v4 = vadd.f32 %v3995_v54, %v3994_v1  ;;  %5076 = vlog2.f32 %v3811_v56  ;;  %v3813_v26 = vld [vmem:[#allocation4 + $0xc0] sm:$0xff]  ;;  %v3883_v24 = vadd.f32 %v3853_v23, %v3783_v47 }
 0x477   : > { %5078 = vlog2.f32 %v3813_v26  ;;  %v4074_v27 = vrot.slane %v4073_v59, 1  ;;  %v3959_v37 = vmul.f32 %v8242_v62, %v3934_v5  ;;  %v3960_v62 = vmul.f32 %v8259_v53, %v3935_v46 }
 0x478   : > { %v5075_v45 = vpop.eup %5074  ;;  %v3998_v38 = vadd.f32 %v3997_v14, %v3996_v4  ;;  %v3933_v39 = vsub.f32 %v3883_v24, %v3908_v50 }
 0x479   : > { %v3861_v60 = vmul.f32 0.6931472, %v5075_v45  ;;  %v4075_v20 = vadd.f32 %v4074_v27, %v4073_v59  ;;  %v4003_v31 = vsel %vm1336_vm4, %v3959_v37, 0.0  ;;  %v4005_v41 = vsel %vm1336_vm4, %v3960_v62, 0.0 }
 0x47a   : > { %v3958_v9 = vmul.f32 %v8232_v2, %v3933_v39  ;;  %v4000_v0 = vadd.f32 %v3999_v18, %v3998_v38 }
 0x47b   : > { %v3887_v13 = vadd.f32 %v3861_v60, %v3787_v19  ;;  %4076 = vst.msk [vmem:[%s501_s12] sm:$0x1] %vm4019_vm14, %v4075_v20 }
 0x47c   : > { %v5077_v49 = vpop.eup %5076  ;;  %v4001_v40 = vsel %vm1336_vm4, %v3958_v9, 0.0 }
 0x47d   : > { %v5079_v12 = vpop.eup %5078  ;;  %v3859_v6 = vmul.f32 0.6931472, %v5077_v49  ;;  %v4002_v11 = vadd.f32 %v4001_v40, %v4000_v0  ;;  %v3937_v2 = vsub.f32 %v3887_v13, %v3912_v33 }
 0x47e   : > { %v3863_v17 = vmul.f32 0.6931472, %v5079_v12 }
 0x47f   : > { %v3886_v44 = vadd.f32 %v3859_v6, %v3786_v32  ;;  %v4004_v35 = vadd.f32 %v4003_v31, %v4002_v11  ;;  %v3962_v57 = vmul.f32 %v8275_v28, %v3937_v2 }
 0x480   : > { %v3888_v21 = vadd.f32 %v3863_v17, %v3788_v30 }
 0x481   : > { %v3936_v63 = vsub.f32 %v3886_v44, %v3911_v51  ;;  %v4006_v34 = vadd.f32 %v4005_v41, %v4004_v35  ;;  %v4009_v10 = vsel %vm1336_vm4, %v3962_v57, 0.0 }
 0x482   : > { %v3938_v15 = vsub.f32 %v3888_v21, %v3913_v29 }
 0x483   : > { %v3961_v3 = vmul.f32 %v8269_v58, %v3936_v63 }
 0x484   : > { %v3963_v53 = vmul.f32 %v8284_v61, %v3938_v15 }
 0x485   : > { %v4007_v48 = vsel %vm1336_vm4, %v3961_v3, 0.0 }
 0x486   : > { %v4008_v55 = vadd.f32 %v4007_v48, %v4006_v34  ;;  %v4011_v36 = vsel %vm1336_vm4, %v3963_v53, 0.0 }
 0x488   : > { %v4010_v8 = vadd.f32 %v4009_v10, %v4008_v55 }
 0x48a   : > { %v4012_v7 = vadd.f32 %v4011_v36, %v4010_v8 }
 0x48c   : > { %v4013_v1 = vrot.slane %v4012_v7, 4 }
 0x48e   : > { %v4014_v43 = vadd.f32 %v4013_v1, %v4012_v7 }
 0x490   : > { %v4015_v42 = vrot.slane %v4014_v43, 2 }
 0x492   : > { %v4016_v54 = vadd.f32 %v4015_v42, %v4014_v43 }
 0x494   : > { %v4017_v52 = vrot.slane %v4016_v54, 1 }
 0x496   : > { %v4018_v58 = vadd.f32 %v4017_v52, %v4016_v54 }
 0x498   : > { %4020 = vst.msk [vmem:[%s495_s20] sm:$0x1] %vm4019_vm14, %v4018_v58 }
 0x499 PF: > { %p4721_p4 = scmp.ge.s32.totalorder %s5265_s10, 2  ;;  %s4154_s22 = sand.u32 1, %s5245_s27  }
 0x49a   : > { %s4155_s30 = scalar_lea.sflag [#allocation7], %s4154_s22 }
 0x49b   : > { %p4715_p0 = pnand %p4721_p4, %p5366_p8 }
 0x49d   : > { %p4716_p1 = pneg %p4715_p0 }
 0x49f   : > { %5236 = dma.done.wait (%p4716_p1), %s4155_s30, 12800  }
 0x4a0   : > { %5238 = vsyncadd (%p4716_p1), %s4155_s30, 4294954496  ;;  %s4165_s23 = scalar_lea.sflag [#allocation9], %s4154_s22 }
 0x4a1   : > { %5240 = dma.done.wait (%p4716_p1), %s4165_s23, 3200  }
 0x4a2   : > { %5242 = vsyncadd (%p4716_p1), %s4165_s23, 4294964096  ;;  %s25_s10 = sadd.s32 1, %s5265_s10   ;;  %s8641_s19 = sld [smem:[#allocation12_spill]] }
 0x4a3   : > { %p22_p2 = scmp.ge.s32.totalorder %s25_s10, 4   ;;  %s8642_s27 = smov %s5249_s28 }
 0x4a4   : > { %s8643_s28 = smov %s5253_s29  ;;  %s8644_s29 = smov %s5372_s18 }
 0x4a5   : > { %s8645_s30 = smov %s5261_s9  ;;  %24 = sbr.rel (!%p22_p2) target bundleno = 10 (0xa), region = 136 }
 0x4a8   : > { %s8646_s9 = smov %s8641_s19 }
 0x4aa   :  { %4189 = vsyncpa [#allocation7], 1 }
 0x4ab   :  { %4191 = vsyncpa [#allocation7 + $0x1], 1 }
 0x4ac   :  { %4192 = vsyncpa [#allocation9], 1 }
 0x4ad   :  { %4194 = vsyncpa [#allocation9 + $0x1], 1 }

</bundles_post_ra>
